<compile_context>
chip_gen: v5e
topology: v5e:2x2
jax: 0.10.0
libtpu: 0.0.40
codegen_flags: <defaults>
</compile_context>

<pallas_src>
import functools

import jax
import jax.numpy as jnp
from jax.experimental import pallas as pl
from jax.experimental.pallas import tpu as pltpu

C_PAD = 128          # channels zero-padded to a full 128-lane register width
K1 = 256             # conv1 im2col K (4*4*4*cin, zero-padded)
_BN_EPS = 1e-5


# ------------------------------ Pallas kernel ------------------------------ #

def _res_bottom_kernel(p_ref, w1_ref, b1_ref, w2_ref, b2_ref, w3_ref, b3_ref,
                       o_ref, pad1_ref, pad2_ref, *, bb, ohp, owp):
    """Fused stem + BasicBlock for one batch block; intermediates stay in VMEM.

    p_ref    : (bb, oh1*ow1, 256) bf16   host-side im2col patches of conv1
                                         (rows ordered m = q*oh1*owp + oh*owp + owh)
    w1_ref   : (256, 128) bf16           conv1 weight (BN1 scale folded)
    w2_ref   : (9, 128, 128) bf16        BasicBlock conv1 3x3 taps (BN folded)
    w3_ref   : (9, 128, 128) bf16        BasicBlock conv2 3x3 taps (BN folded)
    b*_ref   : (1, 128) f32              folded BN biases
    o_ref    : (bb, ohp, owp, 128) bf16  output (channels padded to 128)
    pad1_ref : (bb, ohp+2, owp+2, 128) bf16  zero-bordered pooled output (residual)
    pad2_ref : (bb, ohp+2, owp+2, 128) bf16  zero-bordered BasicBlock-conv1 output
    """
    f32 = jnp.float32
    bf16 = jnp.bfloat16

    # Zero ONLY the 1-wide borders (interiors are overwritten every step).
    zrow = jnp.zeros((bb, 1, owp + 2, C_PAD), bf16)
    zcol = jnp.zeros((bb, ohp + 2, 1, C_PAD), bf16)
    for ref in (pad1_ref, pad2_ref):
        ref[:, pl.ds(0, 1), :, :] = zrow
        ref[:, pl.ds(ohp + 1, 1), :, :] = zrow
        ref[:, :, pl.ds(0, 1), :] = zcol
        ref[:, :, pl.ds(owp + 1, 1), :] = zcol

    w1 = w1_ref[...]
    b1 = b1_ref[...]

    # ---- conv1 (+BN+ReLU) as one matmul, then vectorised 3x3/s2 maxpool ----
    for bi in range(bb):
        y = jnp.dot(p_ref[bi], w1, preferred_element_type=f32)      # (oh1*ow1, 128)
        y = jnp.maximum(y + b1, 0.0)
        # Rows were pre-ordered host-side: m = q*(oh1*owp) + oh*owp + owh with
        # ow = 2*owh + q, so every pooling step is a leading-dim op + one roll.
        y5 = y.reshape(2, ohp, 2, owp, C_PAD)            # (q, ph, s, owh, c), oh=2ph+s
        pair_h = jnp.maximum(y5[:, :, 0], y5[:, :, 1])   # rows 2ph, 2ph+1
        odd_h = y5[:, :, 1]
        up = jnp.concatenate(                            # row 2ph-1 (clipped: y >= 0)
            [jnp.zeros((2, 1, owp, C_PAD), f32), odd_h[:, :-1]], axis=1)
        hmax = jnp.maximum(pair_h, up)                   # (2, ohp, owp, c)
        c_even, c_odd = hmax[0], hmax[1]                 # cols 2pw / 2pw+1
        left = pltpu.roll(c_odd, shift=1, axis=1)        # col 2pw-1 (circular)
        pw0 = jax.lax.broadcasted_iota(jnp.int32, (ohp, owp, C_PAD), 1) == 0
        left = jnp.where(pw0, 0.0, left)                 # clip left edge (acts >= 0)
        pooled = jnp.maximum(jnp.maximum(c_even, c_odd), left)
        pad1_ref[bi, pl.ds(1, ohp), pl.ds(1, owp), :] = pooled.astype(bf16)

    # ---- BasicBlock conv1 (3x3/s1/p1) + BN + ReLU, batch folded into M ------
    m_blk = bb * ohp * owp
    acc = jnp.zeros((m_blk, C_PAD), f32)
    for a in range(3):
        for b in range(3):
            win = pad1_ref[:, pl.ds(a, ohp), pl.ds(b, owp), :]
            acc += jnp.dot(win.reshape(m_blk, C_PAD), w2_ref[a * 3 + b],
                           preferred_element_type=f32)
    y2 = jnp.maximum(acc + b2_ref[...], 0.0)
    pad2_ref[:, pl.ds(1, ohp), pl.ds(1, owp), :] = (
        y2.reshape(bb, ohp, owp, C_PAD).astype(bf16))

    # ---- BasicBlock conv2 (3x3/s1/p1) + BN + residual + ReLU ----------------
    acc = jnp.zeros((m_blk, C_PAD), f32)
    for a in range(3):
        for b in range(3):
            win = pad2_ref[:, pl.ds(a, ohp), pl.ds(b, owp), :]
            acc += jnp.dot(win.reshape(m_blk, C_PAD), w3_ref[a * 3 + b],
                           preferred_element_type=f32)
    res = pad1_ref[:, pl.ds(1, ohp), pl.ds(1, owp), :].reshape(m_blk, C_PAD)
    y3 = jnp.maximum(acc + b3_ref[...] + res.astype(f32), 0.0)
    o_ref[...] = y3.reshape(bb, ohp, owp, C_PAD).astype(bf16)


# ----------------------- host-side weight preparation ---------------------- #

def _fold_bn(bn):
    gamma, beta, mean, var = bn
    scale = gamma / jnp.sqrt(var + _BN_EPS)
    return scale, beta - mean * scale


def _prep_conv1(w, bn):
    """7x7/s2 conv + BN -> (256,128) matmul weight over host-side im2col patches."""
    scale, bias = _fold_bn(bn)
    co, ci, kh, kw = w.shape                                        # (8, 3, 7, 7)
    wp = jnp.pad(w, ((0, 0), (0, 0), (0, 8 - kh), (0, 8 - kw)))     # kernel -> 8x8
    wr = wp.reshape(co, ci, 4, 2, 4, 2)                             # co,c,a,p,b,q
    wr = jnp.transpose(wr, (2, 4, 3, 5, 1, 0))                      # a,b,p,q,c,co
    wr = wr.reshape(64 * ci, co) * scale[None, :]                   # fold BN scale
    wr = jnp.pad(wr, ((0, K1 - 64 * ci), (0, C_PAD - co)))
    bm = jnp.pad(bias, (0, C_PAD - co)).reshape(1, C_PAD).astype(jnp.float32)
    return wr.astype(jnp.bfloat16), bm


def _prep_conv3x3(w, bn):
    scale, bias = _fold_bn(bn)
    co, ci, kh, kw = w.shape                                        # (8, 8, 3, 3)
    wm = jnp.transpose(w, (2, 3, 1, 0)) * scale[None, None, None, :]
    wm = jnp.pad(wm, ((0, 0), (0, 0), (0, C_PAD - ci), (0, C_PAD - co)))
    wm = wm.reshape(kh * kw, C_PAD, C_PAD).astype(jnp.bfloat16)
    bm = jnp.pad(bias, (0, C_PAD - co)).reshape(1, C_PAD).astype(jnp.float32)
    return wm, bm


def _batch_block(n):
    """Images per grid step: fold batch into M, but keep >= 2 grid steps (v7x)."""
    if n % 4 == 0 and n // 4 >= 2:
        return 4
    if n % 2 == 0 and n // 2 >= 2:
        return 2
    return 1


# ----------------------------- ResBottom forward --------------------------- #

def res_bottom_forward(x_nchw, params):
    n, cin, h, w = x_nchw.shape
    co = params["conv1_w"].shape[0]
    assert h % 4 == 0 and w % 4 == 0 and (h // 4) % 8 == 0 and (w // 4) % 8 == 0
    assert 64 * cin <= K1
    oh1, ow1 = h // 2, w // 2            # conv1 output spatial (16x16)
    ohp, owp = oh1 // 2, ow1 // 2        # maxpool / block output spatial (8x8)
    m1 = oh1 * ow1
    bb = _batch_block(n)

    # NCHW -> NHWC, pad 3, space-to-depth(2): 7x7/s2 conv == 4x4/s1 conv over s2d.
    x = jnp.transpose(x_nchw, (0, 2, 3, 1))
    xp = jnp.pad(x, ((0, 0), (3, 3), (3, 3), (0, 0)))                # (N, 38, 38, cin)
    hs, ws = (h + 6) // 2, (w + 6) // 2
    s2d = xp.reshape(n, hs, 2, ws, 2, cin)
    s2d = jnp.transpose(s2d, (0, 1, 3, 2, 4, 5)).reshape(n, hs, ws, 4 * cin)

    # Host-side im2col of the 4x4/s1 conv (tiny relayout; K padded to 256).
    cols = [s2d[:, a:a + oh1, b:b + ow1, :] for a in range(4) for b in range(4)]
    patches = jnp.concatenate(cols, axis=-1)                         # (N, oh1, ow1, 64*cin)
    # Reorder rows as m = q*(oh1*owp) + oh*owp + owh (ow = 2*owh + q) so the
    # in-kernel maxpool needs only leading-dim ops + one sublane roll.
    patches = patches.reshape(n, oh1, owp, 2, 64 * cin)
    patches = jnp.transpose(patches, (0, 3, 1, 2, 4)).reshape(n, m1, 64 * cin)
    patches = jnp.pad(patches, ((0, 0), (0, 0), (0, K1 - 64 * cin)))
    patches = patches.astype(jnp.bfloat16)                           # (N, 256, 256)

    w1m, b1m = _prep_conv1(params["conv1_w"], params["bn1"])
    w2m, b2m = _prep_conv3x3(params["blk_conv1_w"], params["blk_bn1"])
    w3m, b3m = _prep_conv3x3(params["blk_conv2_w"], params["blk_bn2"])

    kernel = functools.partial(_res_bottom_kernel, bb=bb, ohp=ohp, owp=owp)

    out = pl.pallas_call(
        kernel,
        out_shape=jax.ShapeDtypeStruct((n, ohp, owp, C_PAD), jnp.bfloat16),
        grid_spec=pltpu.PrefetchScalarGridSpec(
            num_scalar_prefetch=0,
            grid=(n // bb,),
            in_specs=[
                pl.BlockSpec((bb, m1, K1), lambda i: (i, 0, 0)),
                pl.BlockSpec((K1, C_PAD), lambda i: (0, 0)),
                pl.BlockSpec((1, C_PAD), lambda i: (0, 0)),
                pl.BlockSpec((9, C_PAD, C_PAD), lambda i: (0, 0, 0)),
                pl.BlockSpec((1, C_PAD), lambda i: (0, 0)),
                pl.BlockSpec((9, C_PAD, C_PAD), lambda i: (0, 0, 0)),
                pl.BlockSpec((1, C_PAD), lambda i: (0, 0)),
            ],
            out_specs=pl.BlockSpec((bb, ohp, owp, C_PAD), lambda i: (i, 0, 0, 0)),
            scratch_shapes=[
                pltpu.VMEM((bb, ohp + 2, owp + 2, C_PAD), jnp.bfloat16),  # pooled/residual
                pltpu.VMEM((bb, ohp + 2, owp + 2, C_PAD), jnp.bfloat16),  # blk-conv1 out
            ],
        ),
        compiler_params=pltpu.CompilerParams(
            dimension_semantics=("parallel",),           # megacore / v7x dual-TC
        ),
    )(patches, w1m, b1m, w2m, b2m, w3m, b3m)

    out = out[..., :co].astype(jnp.float32)              # drop the channel padding
    return jnp.transpose(out, (0, 3, 1, 2))              # NHWC -> NCHW


# ----------------------------- pure-JAX reference --------------------------- #

def _ref_forward(x_nchw, params):
    def conv(x, wgt, stride, pad):
        w_hwio = jnp.transpose(wgt, (2, 3, 1, 0))
        return jax.lax.conv_general_dilated(
            x, w_hwio, (stride, stride), ((pad, pad), (pad, pad)),
            dimension_numbers=("NHWC", "HWIO", "NHWC"))

    def bn(x, p):
        g, b, m, v = p
        s = g / jnp.sqrt(v + _BN_EPS)
        return x * s + (b - m * s)

    x = jnp.transpose(x_nchw, (0, 2, 3, 1))
    y = jax.nn.relu(bn(conv(x, params["conv1_w"], 2, 3), params["bn1"]))
    y = jax.lax.reduce_window(y, -jnp.inf, jax.lax.max, (1, 3, 3, 1), (1, 2, 2, 1),
                              ((0, 0), (1, 1), (1, 1), (0, 0)))
    identity = y
    y = jax.nn.relu(bn(conv(y, params["blk_conv1_w"], 1, 1), params["blk_bn1"]))
    y = bn(conv(y, params["blk_conv2_w"], 1, 1), params["blk_bn2"])
    y = jax.nn.relu(y + identity)
    return jnp.transpose(y, (0, 3, 1, 2))


# ------------------------------ param init --------------------------------- #

def init_params(key, cin=3, c=8):
    ks = jax.random.split(key, 6)

    def conv_w(k, cout, cin_, kh, kw):
        fan_in = cin_ * kh * kw
        return jax.random.normal(k, (cout, cin_, kh, kw), jnp.float32) / jnp.sqrt(
            float(fan_in))

    def bn(k, c_):
        k1, k2 = jax.random.split(k)
        gamma = 1.0 + 0.1 * jax.random.normal(k1, (c_,), jnp.float32)
        beta = 0.1 * jax.random.normal(k2, (c_,), jnp.float32)
        running_mean = jnp.zeros((c_,), jnp.float32)
        running_var = jnp.ones((c_,), jnp.float32)
        return (gamma, beta, running_mean, running_var)

    return {
        "conv1_w": conv_w(ks[0], c, cin, 7, 7),
        "bn1": bn(ks[1], c),
        "blk_conv1_w": conv_w(ks[2], c, c, 3, 3),
        "blk_bn1": bn(ks[3], c),
        "blk_conv2_w": conv_w(ks[4], c, c, 3, 3),
        "blk_bn2": bn(ks[5], c),
    }


if __name__ == "__main__":
    key = jax.random.PRNGKey(0)
    kx, kp = jax.random.split(key)

    x = jax.random.normal(kx, (2, 3, 32, 32), jnp.float32)   # NCHW, like PyTorch
    params = init_params(kp, cin=3, c=8)

    y = jax.jit(res_bottom_forward)(x, params)
    jax.block_until_ready(y)

    # 32x32 -> conv1/2 -> 16x16 -> maxpool/2 -> 8x8 ; layer1 keeps 8x8, C=8
    assert y.shape == (2, 8, 8, 8), y.shape
    assert bool(jnp.all(jnp.isfinite(y)))

    # Numerical check vs. a pure-JAX/XLA reference (bf16 MXU inputs + bf16
    # residual/output storage -> loose mixed tolerance).
    y_ref = jax.jit(_ref_forward)(x, params)
    err = float(jnp.max(jnp.abs(y - y_ref) / (1.0 + jnp.abs(y_ref))))
    assert err < 1e-1, f"max rel err vs reference: {err}"

    print("KERNEL_OK")
</pallas_src>

<mosaic_0001>
module attributes {stable_mosaic.version = 11 : i64} {
  func.func @_res_bottom_kernel(%arg0: i32, %arg1: memref<1x256x256xbf16, #tpu.memory_space<vmem>>, %arg2: memref<256x128xbf16, #tpu.memory_space<vmem>>, %arg3: memref<1x128xf32, #tpu.memory_space<vmem>>, %arg4: memref<9x128x128xbf16, #tpu.memory_space<vmem>>, %arg5: memref<1x128xf32, #tpu.memory_space<vmem>>, %arg6: memref<9x128x128xbf16, #tpu.memory_space<vmem>>, %arg7: memref<1x128xf32, #tpu.memory_space<vmem>>, %arg8: memref<1x8x8x128xbf16, #tpu.memory_space<vmem>>, %arg9: memref<1x10x10x128xbf16, #tpu.memory_space<vmem>>, %arg10: memref<1x10x10x128xbf16, #tpu.memory_space<vmem>>) attributes {dimension_semantics = [#tpu.dimension_semantics<parallel>], iteration_bounds = array<i64: 2>, scalar_prefetch = 0 : i64, scratch_operands = 2 : i64, tpu.core_type = #tpu.core_type<tc>, window_params = [{transform_indices = @transform_0, window_bounds = array<i64: 1, 256, 256>}, {pipeline_mode = #tpu.pipeline_mode<synchronous>, transform_indices = @transform_1, window_bounds = array<i64: 256, 128>}, {pipeline_mode = #tpu.pipeline_mode<synchronous>, transform_indices = @transform_2, window_bounds = array<i64: 1, 128>}, {pipeline_mode = #tpu.pipeline_mode<synchronous>, transform_indices = @transform_3, window_bounds = array<i64: 9, 128, 128>}, {pipeline_mode = #tpu.pipeline_mode<synchronous>, transform_indices = @transform_4, window_bounds = array<i64: 1, 128>}, {pipeline_mode = #tpu.pipeline_mode<synchronous>, transform_indices = @transform_5, window_bounds = array<i64: 9, 128, 128>}, {pipeline_mode = #tpu.pipeline_mode<synchronous>, transform_indices = @transform_6, window_bounds = array<i64: 1, 128>}, {transform_indices = @transform_7, window_bounds = array<i64: 1, 8, 8, 128>}]} {
    %cst = arith.constant 0.000000e+00 : bf16
    %0 = vector.broadcast %cst : bf16 to vector<1x1x10x128xbf16>
    %cst_0 = arith.constant 0.000000e+00 : bf16
    %1 = vector.broadcast %cst_0 : bf16 to vector<1x10x1x128xbf16>
    %c0 = arith.constant 0 : index
    %c0_1 = arith.constant 0 : index
    %c0_2 = arith.constant 0 : index
    %c0_3 = arith.constant 0 : index
    %2 = vector.load %arg9[%c0, %c0_1, %c0_2, %c0_3] : memref<1x10x10x128xbf16, #tpu.memory_space<vmem>>, vector<1x1x10x128xbf16>
    tpu.vector_store %arg9[%c0, %c0_1, %c0_2, %c0_3], %0 {strides = array<i32>} : memref<1x10x10x128xbf16, #tpu.memory_space<vmem>>, vector<1x1x10x128xbf16>,
    %c0_4 = arith.constant 0 : index
    %c9 = arith.constant 9 : index
    %c0_5 = arith.constant 0 : index
    %c0_6 = arith.constant 0 : index
    %3 = vector.load %arg9[%c0_4, %c9, %c0_5, %c0_6] : memref<1x10x10x128xbf16, #tpu.memory_space<vmem>>, vector<1x1x10x128xbf16>
    tpu.vector_store %arg9[%c0_4, %c9, %c0_5, %c0_6], %0 {strides = array<i32>} : memref<1x10x10x128xbf16, #tpu.memory_space<vmem>>, vector<1x1x10x128xbf16>,
    %c0_7 = arith.constant 0 : index
    %c0_8 = arith.constant 0 : index
    %c0_9 = arith.constant 0 : index
    %c0_10 = arith.constant 0 : index
    %4 = vector.load %arg9[%c0_7, %c0_8, %c0_9, %c0_10] : memref<1x10x10x128xbf16, #tpu.memory_space<vmem>>, vector<1x10x1x128xbf16>
    tpu.vector_store %arg9[%c0_7, %c0_8, %c0_9, %c0_10], %1 {strides = array<i32>} : memref<1x10x10x128xbf16, #tpu.memory_space<vmem>>, vector<1x10x1x128xbf16>,
    %c0_11 = arith.constant 0 : index
    %c0_12 = arith.constant 0 : index
    %c9_13 = arith.constant 9 : index
    %c0_14 = arith.constant 0 : index
    %5 = vector.load %arg9[%c0_11, %c0_12, %c9_13, %c0_14] : memref<1x10x10x128xbf16, #tpu.memory_space<vmem>>, vector<1x10x1x128xbf16>
    tpu.vector_store %arg9[%c0_11, %c0_12, %c9_13, %c0_14], %1 {strides = array<i32>} : memref<1x10x10x128xbf16, #tpu.memory_space<vmem>>, vector<1x10x1x128xbf16>,
    %c0_15 = arith.constant 0 : index
    %c0_16 = arith.constant 0 : index
    %c0_17 = arith.constant 0 : index
    %c0_18 = arith.constant 0 : index
    %6 = vector.load %arg10[%c0_15, %c0_16, %c0_17, %c0_18] : memref<1x10x10x128xbf16, #tpu.memory_space<vmem>>, vector<1x1x10x128xbf16>
    tpu.vector_store %arg10[%c0_15, %c0_16, %c0_17, %c0_18], %0 {strides = array<i32>} : memref<1x10x10x128xbf16, #tpu.memory_space<vmem>>, vector<1x1x10x128xbf16>,
    %c0_19 = arith.constant 0 : index
    %c9_20 = arith.constant 9 : index
    %c0_21 = arith.constant 0 : index
    %c0_22 = arith.constant 0 : index
    %7 = vector.load %arg10[%c0_19, %c9_20, %c0_21, %c0_22] : memref<1x10x10x128xbf16, #tpu.memory_space<vmem>>, vector<1x1x10x128xbf16>
    tpu.vector_store %arg10[%c0_19, %c9_20, %c0_21, %c0_22], %0 {strides = array<i32>} : memref<1x10x10x128xbf16, #tpu.memory_space<vmem>>, vector<1x1x10x128xbf16>,
    %c0_23 = arith.constant 0 : index
    %c0_24 = arith.constant 0 : index
    %c0_25 = arith.constant 0 : index
    %c0_26 = arith.constant 0 : index
    %8 = vector.load %arg10[%c0_23, %c0_24, %c0_25, %c0_26] : memref<1x10x10x128xbf16, #tpu.memory_space<vmem>>, vector<1x10x1x128xbf16>
    tpu.vector_store %arg10[%c0_23, %c0_24, %c0_25, %c0_26], %1 {strides = array<i32>} : memref<1x10x10x128xbf16, #tpu.memory_space<vmem>>, vector<1x10x1x128xbf16>,
    %c0_27 = arith.constant 0 : index
    %c0_28 = arith.constant 0 : index
    %c9_29 = arith.constant 9 : index
    %c0_30 = arith.constant 0 : index
    %9 = vector.load %arg10[%c0_27, %c0_28, %c9_29, %c0_30] : memref<1x10x10x128xbf16, #tpu.memory_space<vmem>>, vector<1x10x1x128xbf16>
    tpu.vector_store %arg10[%c0_27, %c0_28, %c9_29, %c0_30], %1 {strides = array<i32>} : memref<1x10x10x128xbf16, #tpu.memory_space<vmem>>, vector<1x10x1x128xbf16>,
    %c0_31 = arith.constant 0 : index
    %c0_32 = arith.constant 0 : index
    %10 = vector.load %arg2[%c0_31, %c0_32] : memref<256x128xbf16, #tpu.memory_space<vmem>>, vector<256x128xbf16>
    %c0_33 = arith.constant 0 : index
    %c0_34 = arith.constant 0 : index
    %11 = vector.load %arg3[%c0_33, %c0_34] : memref<1x128xf32, #tpu.memory_space<vmem>>, vector<1x128xf32>
    %c0_35 = arith.constant 0 : index
    %c0_36 = arith.constant 0 : index
    %c0_37 = arith.constant 0 : index
    %12 = vector.load %arg1[%c0_35, %c0_36, %c0_37] : memref<1x256x256xbf16, #tpu.memory_space<vmem>>, vector<1x256x256xbf16>
    %13 = vector.shape_cast %12 : vector<1x256x256xbf16> to vector<256x256xbf16>
    %cst_38 = arith.constant dense<0.000000e+00> : vector<256x128xf32>
    %14 = tpu.matmul %13, %10, %cst_38 {dimension_numbers = #tpu.dot_dimension_numbers<[1], [0], [0], [1], [0, 0, 1, 1], [], []>} : vector<256x256xbf16>, vector<256x128xbf16>, vector<256x128xf32> -> vector<256x128xf32>
    %15 = vector.broadcast %11 : vector<1x128xf32> to vector<256x128xf32>
    %16 = arith.addf %14, %15 : vector<256x128xf32>
    %cst_39 = arith.constant 0.000000e+00 : f32
    %17 = vector.broadcast %cst_39 : f32 to vector<256x128xf32>
    %18 = arith.maximumf %16, %17 : vector<256x128xf32>
    %19 = vector.shape_cast %18 : vector<256x128xf32> to vector<2x8x2x8x128xf32>
    %20 = vector.extract_strided_slice %19 {offsets = [0, 0, 0, 0, 0], sizes = [2, 8, 1, 8, 128], strides = [1, 1, 1, 1, 1]} : vector<2x8x2x8x128xf32> to vector<2x8x1x8x128xf32>
    %21 = vector.shape_cast %20 : vector<2x8x1x8x128xf32> to vector<2x8x8x128xf32>
    %22 = vector.extract_strided_slice %19 {offsets = [0, 0, 1, 0, 0], sizes = [2, 8, 1, 8, 128], strides = [1, 1, 1, 1, 1]} : vector<2x8x2x8x128xf32> to vector<2x8x1x8x128xf32>
    %23 = vector.shape_cast %22 : vector<2x8x1x8x128xf32> to vector<2x8x8x128xf32>
    %24 = arith.maximumf %21, %23 : vector<2x8x8x128xf32>
    %25 = vector.extract_strided_slice %19 {offsets = [0, 0, 1, 0, 0], sizes = [2, 8, 1, 8, 128], strides = [1, 1, 1, 1, 1]} : vector<2x8x2x8x128xf32> to vector<2x8x1x8x128xf32>
    %26 = vector.shape_cast %25 : vector<2x8x1x8x128xf32> to vector<2x8x8x128xf32>
    %cst_40 = arith.constant 0.000000e+00 : f32
    %27 = vector.broadcast %cst_40 : f32 to vector<2x1x8x128xf32>
    %28 = vector.extract_strided_slice %26 {offsets = [0, 0, 0, 0], sizes = [2, 7, 8, 128], strides = [1, 1, 1, 1]} : vector<2x8x8x128xf32> to vector<2x7x8x128xf32>
    %29 = tpu.concatenate %27, %28 in 1 : vector<2x1x8x128xf32>, vector<2x7x8x128xf32> -> vector<2x8x8x128xf32>
    %30 = arith.maximumf %24, %29 : vector<2x8x8x128xf32>
    %31 = vector.extract_strided_slice %30 {offsets = [0, 0, 0, 0], sizes = [1, 8, 8, 128], strides = [1, 1, 1, 1]} : vector<2x8x8x128xf32> to vector<1x8x8x128xf32>
    %32 = vector.shape_cast %31 : vector<1x8x8x128xf32> to vector<8x8x128xf32>
    %33 = vector.extract_strided_slice %30 {offsets = [1, 0, 0, 0], sizes = [1, 8, 8, 128], strides = [1, 1, 1, 1]} : vector<2x8x8x128xf32> to vector<1x8x8x128xf32>
    %34 = vector.shape_cast %33 : vector<1x8x8x128xf32> to vector<8x8x128xf32>
    %c1_i32 = arith.constant 1 : i32
    %35 = tpu.dynamic_rotate %34 by %c1_i32 dim 1 : vector<8x8x128xf32>, i32 -> vector<8x8x128xf32>
    %36 = tpu.iota {dimensions = array<i32: 1>} : vector<8x8x128xi32>
    %c0_i32 = arith.constant 0 : i32
    %37 = vector.broadcast %c0_i32 : i32 to vector<8x8x128xi32>
    %38 = arith.cmpi eq, %36, %37 : vector<8x8x128xi32>
    %cst_41 = arith.constant 0.000000e+00 : f32
    %39 = vector.broadcast %cst_41 : f32 to vector<8x8x128xf32>
    %40 = arith.select %38, %39, %35 : vector<8x8x128xi1>, vector<8x8x128xf32>
    %41 = arith.maximumf %32, %34 : vector<8x8x128xf32>
    %42 = arith.maximumf %41, %40 : vector<8x8x128xf32>
    %43 = arith.truncf %42 : vector<8x8x128xf32> to vector<8x8x128xbf16>
    %c0_42 = arith.constant 0 : index
    %c1 = arith.constant 1 : index
    %c1_43 = arith.constant 1 : index
    %c0_44 = arith.constant 0 : index
    %44 = vector.load %arg9[%c0_42, %c1, %c1_43, %c0_44] : memref<1x10x10x128xbf16, #tpu.memory_space<vmem>>, vector<1x8x8x128xbf16>
    %45 = vector.shape_cast %44 : vector<1x8x8x128xbf16> to vector<8x8x128xbf16>
    %46 = vector.shape_cast %43 : vector<8x8x128xbf16> to vector<1x8x8x128xbf16>
    tpu.vector_store %arg9[%c0_42, %c1, %c1_43, %c0_44], %46 {strides = array<i32>} : memref<1x10x10x128xbf16, #tpu.memory_space<vmem>>, vector<1x8x8x128xbf16>,
    %cst_45 = arith.constant 0.000000e+00 : f32
    %47 = vector.broadcast %cst_45 : f32 to vector<64x128xf32>
    %c0_46 = arith.constant 0 : index
    %c0_47 = arith.constant 0 : index
    %c0_48 = arith.constant 0 : index
    %c0_49 = arith.constant 0 : index
    %48 = vector.load %arg9[%c0_46, %c0_47, %c0_48, %c0_49] : memref<1x10x10x128xbf16, #tpu.memory_space<vmem>>, vector<1x8x8x128xbf16>
    %49 = vector.shape_cast %48 : vector<1x8x8x128xbf16> to vector<64x128xbf16>
    %c0_50 = arith.constant 0 : index
    %c0_51 = arith.constant 0 : index
    %c0_52 = arith.constant 0 : index
    %50 = vector.load %arg4[%c0_50, %c0_51, %c0_52] : memref<9x128x128xbf16, #tpu.memory_space<vmem>>, vector<1x128x128xbf16>
    %51 = vector.shape_cast %50 : vector<1x128x128xbf16> to vector<128x128xbf16>
    %cst_53 = arith.constant dense<0.000000e+00> : vector<64x128xf32>
    %52 = tpu.matmul %49, %51, %cst_53 {dimension_numbers = #tpu.dot_dimension_numbers<[1], [0], [0], [1], [0, 0, 1, 1], [], []>} : vector<64x128xbf16>, vector<128x128xbf16>, vector<64x128xf32> -> vector<64x128xf32>
    %53 = arith.addf %47, %52 : vector<64x128xf32>
    %c0_54 = arith.constant 0 : index
    %c0_55 = arith.constant 0 : index
    %c1_56 = arith.constant 1 : index
    %c0_57 = arith.constant 0 : index
    %54 = vector.load %arg9[%c0_54, %c0_55, %c1_56, %c0_57] : memref<1x10x10x128xbf16, #tpu.memory_space<vmem>>, vector<1x8x8x128xbf16>
    %55 = vector.shape_cast %54 : vector<1x8x8x128xbf16> to vector<64x128xbf16>
    %c1_58 = arith.constant 1 : index
    %c0_59 = arith.constant 0 : index
    %c0_60 = arith.constant 0 : index
    %56 = vector.load %arg4[%c1_58, %c0_59, %c0_60] : memref<9x128x128xbf16, #tpu.memory_space<vmem>>, vector<1x128x128xbf16>
    %57 = vector.shape_cast %56 : vector<1x128x128xbf16> to vector<128x128xbf16>
    %cst_61 = arith.constant dense<0.000000e+00> : vector<64x128xf32>
    %58 = tpu.matmul %55, %57, %cst_61 {dimension_numbers = #tpu.dot_dimension_numbers<[1], [0], [0], [1], [0, 0, 1, 1], [], []>} : vector<64x128xbf16>, vector<128x128xbf16>, vector<64x128xf32> -> vector<64x128xf32>
    %59 = arith.addf %53, %58 : vector<64x128xf32>
    %c0_62 = arith.constant 0 : index
    %c0_63 = arith.constant 0 : index
    %c2 = arith.constant 2 : index
    %c0_64 = arith.constant 0 : index
    %60 = vector.load %arg9[%c0_62, %c0_63, %c2, %c0_64] : memref<1x10x10x128xbf16, #tpu.memory_space<vmem>>, vector<1x8x8x128xbf16>
    %61 = vector.shape_cast %60 : vector<1x8x8x128xbf16> to vector<64x128xbf16>
    %c2_65 = arith.constant 2 : index
    %c0_66 = arith.constant 0 : index
    %c0_67 = arith.constant 0 : index
    %62 = vector.load %arg4[%c2_65, %c0_66, %c0_67] : memref<9x128x128xbf16, #tpu.memory_space<vmem>>, vector<1x128x128xbf16>
    %63 = vector.shape_cast %62 : vector<1x128x128xbf16> to vector<128x128xbf16>
    %cst_68 = arith.constant dense<0.000000e+00> : vector<64x128xf32>
    %64 = tpu.matmul %61, %63, %cst_68 {dimension_numbers = #tpu.dot_dimension_numbers<[1], [0], [0], [1], [0, 0, 1, 1], [], []>} : vector<64x128xbf16>, vector<128x128xbf16>, vector<64x128xf32> -> vector<64x128xf32>
    %65 = arith.addf %59, %64 : vector<64x128xf32>
    %c0_69 = arith.constant 0 : index
    %c1_70 = arith.constant 1 : index
    %c0_71 = arith.constant 0 : index
    %c0_72 = arith.constant 0 : index
    %66 = vector.load %arg9[%c0_69, %c1_70, %c0_71, %c0_72] : memref<1x10x10x128xbf16, #tpu.memory_space<vmem>>, vector<1x8x8x128xbf16>
    %67 = vector.shape_cast %66 : vector<1x8x8x128xbf16> to vector<64x128xbf16>
    %c3 = arith.constant 3 : index
    %c0_73 = arith.constant 0 : index
    %c0_74 = arith.constant 0 : index
    %68 = vector.load %arg4[%c3, %c0_73, %c0_74] : memref<9x128x128xbf16, #tpu.memory_space<vmem>>, vector<1x128x128xbf16>
    %69 = vector.shape_cast %68 : vector<1x128x128xbf16> to vector<128x128xbf16>
    %cst_75 = arith.constant dense<0.000000e+00> : vector<64x128xf32>
    %70 = tpu.matmul %67, %69, %cst_75 {dimension_numbers = #tpu.dot_dimension_numbers<[1], [0], [0], [1], [0, 0, 1, 1], [], []>} : vector<64x128xbf16>, vector<128x128xbf16>, vector<64x128xf32> -> vector<64x128xf32>
    %71 = arith.addf %65, %70 : vector<64x128xf32>
    %c0_76 = arith.constant 0 : index
    %c1_77 = arith.constant 1 : index
    %c1_78 = arith.constant 1 : index
    %c0_79 = arith.constant 0 : index
    %72 = vector.load %arg9[%c0_76, %c1_77, %c1_78, %c0_79] : memref<1x10x10x128xbf16, #tpu.memory_space<vmem>>, vector<1x8x8x128xbf16>
    %73 = vector.shape_cast %72 : vector<1x8x8x128xbf16> to vector<64x128xbf16>
    %c4 = arith.constant 4 : index
    %c0_80 = arith.constant 0 : index
    %c0_81 = arith.constant 0 : index
    %74 = vector.load %arg4[%c4, %c0_80, %c0_81] : memref<9x128x128xbf16, #tpu.memory_space<vmem>>, vector<1x128x128xbf16>
    %75 = vector.shape_cast %74 : vector<1x128x128xbf16> to vector<128x128xbf16>
    %cst_82 = arith.constant dense<0.000000e+00> : vector<64x128xf32>
    %76 = tpu.matmul %73, %75, %cst_82 {dimension_numbers = #tpu.dot_dimension_numbers<[1], [0], [0], [1], [0, 0, 1, 1], [], []>} : vector<64x128xbf16>, vector<128x128xbf16>, vector<64x128xf32> -> vector<64x128xf32>
    %77 = arith.addf %71, %76 : vector<64x128xf32>
    %c0_83 = arith.constant 0 : index
    %c1_84 = arith.constant 1 : index
    %c2_85 = arith.constant 2 : index
    %c0_86 = arith.constant 0 : index
    %78 = vector.load %arg9[%c0_83, %c1_84, %c2_85, %c0_86] : memref<1x10x10x128xbf16, #tpu.memory_space<vmem>>, vector<1x8x8x128xbf16>
    %79 = vector.shape_cast %78 : vector<1x8x8x128xbf16> to vector<64x128xbf16>
    %c5 = arith.constant 5 : index
    %c0_87 = arith.constant 0 : index
    %c0_88 = arith.constant 0 : index
    %80 = vector.load %arg4[%c5, %c0_87, %c0_88] : memref<9x128x128xbf16, #tpu.memory_space<vmem>>, vector<1x128x128xbf16>
    %81 = vector.shape_cast %80 : vector<1x128x128xbf16> to vector<128x128xbf16>
    %cst_89 = arith.constant dense<0.000000e+00> : vector<64x128xf32>
    %82 = tpu.matmul %79, %81, %cst_89 {dimension_numbers = #tpu.dot_dimension_numbers<[1], [0], [0], [1], [0, 0, 1, 1], [], []>} : vector<64x128xbf16>, vector<128x128xbf16>, vector<64x128xf32> -> vector<64x128xf32>
    %83 = arith.addf %77, %82 : vector<64x128xf32>
    %c0_90 = arith.constant 0 : index
    %c2_91 = arith.constant 2 : index
    %c0_92 = arith.constant 0 : index
    %c0_93 = arith.constant 0 : index
    %84 = vector.load %arg9[%c0_90, %c2_91, %c0_92, %c0_93] : memref<1x10x10x128xbf16, #tpu.memory_space<vmem>>, vector<1x8x8x128xbf16>
    %85 = vector.shape_cast %84 : vector<1x8x8x128xbf16> to vector<64x128xbf16>
    %c6 = arith.constant 6 : index
    %c0_94 = arith.constant 0 : index
    %c0_95 = arith.constant 0 : index
    %86 = vector.load %arg4[%c6, %c0_94, %c0_95] : memref<9x128x128xbf16, #tpu.memory_space<vmem>>, vector<1x128x128xbf16>
    %87 = vector.shape_cast %86 : vector<1x128x128xbf16> to vector<128x128xbf16>
    %cst_96 = arith.constant dense<0.000000e+00> : vector<64x128xf32>
    %88 = tpu.matmul %85, %87, %cst_96 {dimension_numbers = #tpu.dot_dimension_numbers<[1], [0], [0], [1], [0, 0, 1, 1], [], []>} : vector<64x128xbf16>, vector<128x128xbf16>, vector<64x128xf32> -> vector<64x128xf32>
    %89 = arith.addf %83, %88 : vector<64x128xf32>
    %c0_97 = arith.constant 0 : index
    %c2_98 = arith.constant 2 : index
    %c1_99 = arith.constant 1 : index
    %c0_100 = arith.constant 0 : index
    %90 = vector.load %arg9[%c0_97, %c2_98, %c1_99, %c0_100] : memref<1x10x10x128xbf16, #tpu.memory_space<vmem>>, vector<1x8x8x128xbf16>
    %91 = vector.shape_cast %90 : vector<1x8x8x128xbf16> to vector<64x128xbf16>
    %c7 = arith.constant 7 : index
    %c0_101 = arith.constant 0 : index
    %c0_102 = arith.constant 0 : index
    %92 = vector.load %arg4[%c7, %c0_101, %c0_102] : memref<9x128x128xbf16, #tpu.memory_space<vmem>>, vector<1x128x128xbf16>
    %93 = vector.shape_cast %92 : vector<1x128x128xbf16> to vector<128x128xbf16>
    %cst_103 = arith.constant dense<0.000000e+00> : vector<64x128xf32>
    %94 = tpu.matmul %91, %93, %cst_103 {dimension_numbers = #tpu.dot_dimension_numbers<[1], [0], [0], [1], [0, 0, 1, 1], [], []>} : vector<64x128xbf16>, vector<128x128xbf16>, vector<64x128xf32> -> vector<64x128xf32>
    %95 = arith.addf %89, %94 : vector<64x128xf32>
    %c0_104 = arith.constant 0 : index
    %c2_105 = arith.constant 2 : index
    %c2_106 = arith.constant 2 : index
    %c0_107 = arith.constant 0 : index
    %96 = vector.load %arg9[%c0_104, %c2_105, %c2_106, %c0_107] : memref<1x10x10x128xbf16, #tpu.memory_space<vmem>>, vector<1x8x8x128xbf16>
    %97 = vector.shape_cast %96 : vector<1x8x8x128xbf16> to vector<64x128xbf16>
    %c8 = arith.constant 8 : index
    %c0_108 = arith.constant 0 : index
    %c0_109 = arith.constant 0 : index
    %98 = vector.load %arg4[%c8, %c0_108, %c0_109] : memref<9x128x128xbf16, #tpu.memory_space<vmem>>, vector<1x128x128xbf16>
    %99 = vector.shape_cast %98 : vector<1x128x128xbf16> to vector<128x128xbf16>
    %cst_110 = arith.constant dense<0.000000e+00> : vector<64x128xf32>
    %100 = tpu.matmul %97, %99, %cst_110 {dimension_numbers = #tpu.dot_dimension_numbers<[1], [0], [0], [1], [0, 0, 1, 1], [], []>} : vector<64x128xbf16>, vector<128x128xbf16>, vector<64x128xf32> -> vector<64x128xf32>
    %101 = arith.addf %95, %100 : vector<64x128xf32>
    %c0_111 = arith.constant 0 : index
    %c0_112 = arith.constant 0 : index
    %102 = vector.load %arg5[%c0_111, %c0_112] : memref<1x128xf32, #tpu.memory_space<vmem>>, vector<1x128xf32>
    %103 = vector.broadcast %102 : vector<1x128xf32> to vector<64x128xf32>
    %104 = arith.addf %101, %103 : vector<64x128xf32>
    %cst_113 = arith.constant 0.000000e+00 : f32
    %105 = vector.broadcast %cst_113 : f32 to vector<64x128xf32>
    %106 = arith.maximumf %104, %105 : vector<64x128xf32>
    %107 = vector.shape_cast %106 : vector<64x128xf32> to vector<1x8x8x128xf32>
    %108 = arith.truncf %107 : vector<1x8x8x128xf32> to vector<1x8x8x128xbf16>
    %c0_114 = arith.constant 0 : index
    %c1_115 = arith.constant 1 : index
    %c1_116 = arith.constant 1 : index
    %c0_117 = arith.constant 0 : index
    %109 = vector.load %arg10[%c0_114, %c1_115, %c1_116, %c0_117] : memref<1x10x10x128xbf16, #tpu.memory_space<vmem>>, vector<1x8x8x128xbf16>
    tpu.vector_store %arg10[%c0_114, %c1_115, %c1_116, %c0_117], %108 {strides = array<i32>} : memref<1x10x10x128xbf16, #tpu.memory_space<vmem>>, vector<1x8x8x128xbf16>,
    %cst_118 = arith.constant 0.000000e+00 : f32
    %110 = vector.broadcast %cst_118 : f32 to vector<64x128xf32>
    %c0_119 = arith.constant 0 : index
    %c0_120 = arith.constant 0 : index
    %c0_121 = arith.constant 0 : index
    %c0_122 = arith.constant 0 : index
    %111 = vector.load %arg10[%c0_119, %c0_120, %c0_121, %c0_122] : memref<1x10x10x128xbf16, #tpu.memory_space<vmem>>, vector<1x8x8x128xbf16>
    %112 = vector.shape_cast %111 : vector<1x8x8x128xbf16> to vector<64x128xbf16>
    %c0_123 = arith.constant 0 : index
    %c0_124 = arith.constant 0 : index
    %c0_125 = arith.constant 0 : index
    %113 = vector.load %arg6[%c0_123, %c0_124, %c0_125] : memref<9x128x128xbf16, #tpu.memory_space<vmem>>, vector<1x128x128xbf16>
    %114 = vector.shape_cast %113 : vector<1x128x128xbf16> to vector<128x128xbf16>
    %cst_126 = arith.constant dense<0.000000e+00> : vector<64x128xf32>
    %115 = tpu.matmul %112, %114, %cst_126 {dimension_numbers = #tpu.dot_dimension_numbers<[1], [0], [0], [1], [0, 0, 1, 1], [], []>} : vector<64x128xbf16>, vector<128x128xbf16>, vector<64x128xf32> -> vector<64x128xf32>
    %116 = arith.addf %110, %115 : vector<64x128xf32>
    %c0_127 = arith.constant 0 : index
    %c0_128 = arith.constant 0 : index
    %c1_129 = arith.constant 1 : index
    %c0_130 = arith.constant 0 : index
    %117 = vector.load %arg10[%c0_127, %c0_128, %c1_129, %c0_130] : memref<1x10x10x128xbf16, #tpu.memory_space<vmem>>, vector<1x8x8x128xbf16>
    %118 = vector.shape_cast %117 : vector<1x8x8x128xbf16> to vector<64x128xbf16>
    %c1_131 = arith.constant 1 : index
    %c0_132 = arith.constant 0 : index
    %c0_133 = arith.constant 0 : index
    %119 = vector.load %arg6[%c1_131, %c0_132, %c0_133] : memref<9x128x128xbf16, #tpu.memory_space<vmem>>, vector<1x128x128xbf16>
    %120 = vector.shape_cast %119 : vector<1x128x128xbf16> to vector<128x128xbf16>
    %cst_134 = arith.constant dense<0.000000e+00> : vector<64x128xf32>
    %121 = tpu.matmul %118, %120, %cst_134 {dimension_numbers = #tpu.dot_dimension_numbers<[1], [0], [0], [1], [0, 0, 1, 1], [], []>} : vector<64x128xbf16>, vector<128x128xbf16>, vector<64x128xf32> -> vector<64x128xf32>
    %122 = arith.addf %116, %121 : vector<64x128xf32>
    %c0_135 = arith.constant 0 : index
    %c0_136 = arith.constant 0 : index
    %c2_137 = arith.constant 2 : index
    %c0_138 = arith.constant 0 : index
    %123 = vector.load %arg10[%c0_135, %c0_136, %c2_137, %c0_138] : memref<1x10x10x128xbf16, #tpu.memory_space<vmem>>, vector<1x8x8x128xbf16>
    %124 = vector.shape_cast %123 : vector<1x8x8x128xbf16> to vector<64x128xbf16>
    %c2_139 = arith.constant 2 : index
    %c0_140 = arith.constant 0 : index
    %c0_141 = arith.constant 0 : index
    %125 = vector.load %arg6[%c2_139, %c0_140, %c0_141] : memref<9x128x128xbf16, #tpu.memory_space<vmem>>, vector<1x128x128xbf16>
    %126 = vector.shape_cast %125 : vector<1x128x128xbf16> to vector<128x128xbf16>
    %cst_142 = arith.constant dense<0.000000e+00> : vector<64x128xf32>
    %127 = tpu.matmul %124, %126, %cst_142 {dimension_numbers = #tpu.dot_dimension_numbers<[1], [0], [0], [1], [0, 0, 1, 1], [], []>} : vector<64x128xbf16>, vector<128x128xbf16>, vector<64x128xf32> -> vector<64x128xf32>
    %128 = arith.addf %122, %127 : vector<64x128xf32>
    %c0_143 = arith.constant 0 : index
    %c1_144 = arith.constant 1 : index
    %c0_145 = arith.constant 0 : index
    %c0_146 = arith.constant 0 : index
    %129 = vector.load %arg10[%c0_143, %c1_144, %c0_145, %c0_146] : memref<1x10x10x128xbf16, #tpu.memory_space<vmem>>, vector<1x8x8x128xbf16>
    %130 = vector.shape_cast %129 : vector<1x8x8x128xbf16> to vector<64x128xbf16>
    %c3_147 = arith.constant 3 : index
    %c0_148 = arith.constant 0 : index
    %c0_149 = arith.constant 0 : index
    %131 = vector.load %arg6[%c3_147, %c0_148, %c0_149] : memref<9x128x128xbf16, #tpu.memory_space<vmem>>, vector<1x128x128xbf16>
    %132 = vector.shape_cast %131 : vector<1x128x128xbf16> to vector<128x128xbf16>
    %cst_150 = arith.constant dense<0.000000e+00> : vector<64x128xf32>
    %133 = tpu.matmul %130, %132, %cst_150 {dimension_numbers = #tpu.dot_dimension_numbers<[1], [0], [0], [1], [0, 0, 1, 1], [], []>} : vector<64x128xbf16>, vector<128x128xbf16>, vector<64x128xf32> -> vector<64x128xf32>
    %134 = arith.addf %128, %133 : vector<64x128xf32>
    %c0_151 = arith.constant 0 : index
    %c1_152 = arith.constant 1 : index
    %c1_153 = arith.constant 1 : index
    %c0_154 = arith.constant 0 : index
    %135 = vector.load %arg10[%c0_151, %c1_152, %c1_153, %c0_154] : memref<1x10x10x128xbf16, #tpu.memory_space<vmem>>, vector<1x8x8x128xbf16>
    %136 = vector.shape_cast %135 : vector<1x8x8x128xbf16> to vector<64x128xbf16>
    %c4_155 = arith.constant 4 : index
    %c0_156 = arith.constant 0 : index
    %c0_157 = arith.constant 0 : index
    %137 = vector.load %arg6[%c4_155, %c0_156, %c0_157] : memref<9x128x128xbf16, #tpu.memory_space<vmem>>, vector<1x128x128xbf16>
    %138 = vector.shape_cast %137 : vector<1x128x128xbf16> to vector<128x128xbf16>
    %cst_158 = arith.constant dense<0.000000e+00> : vector<64x128xf32>
    %139 = tpu.matmul %136, %138, %cst_158 {dimension_numbers = #tpu.dot_dimension_numbers<[1], [0], [0], [1], [0, 0, 1, 1], [], []>} : vector<64x128xbf16>, vector<128x128xbf16>, vector<64x128xf32> -> vector<64x128xf32>
    %140 = arith.addf %134, %139 : vector<64x128xf32>
    %c0_159 = arith.constant 0 : index
    %c1_160 = arith.constant 1 : index
    %c2_161 = arith.constant 2 : index
    %c0_162 = arith.constant 0 : index
    %141 = vector.load %arg10[%c0_159, %c1_160, %c2_161, %c0_162] : memref<1x10x10x128xbf16, #tpu.memory_space<vmem>>, vector<1x8x8x128xbf16>
    %142 = vector.shape_cast %141 : vector<1x8x8x128xbf16> to vector<64x128xbf16>
    %c5_163 = arith.constant 5 : index
    %c0_164 = arith.constant 0 : index
    %c0_165 = arith.constant 0 : index
    %143 = vector.load %arg6[%c5_163, %c0_164, %c0_165] : memref<9x128x128xbf16, #tpu.memory_space<vmem>>, vector<1x128x128xbf16>
    %144 = vector.shape_cast %143 : vector<1x128x128xbf16> to vector<128x128xbf16>
    %cst_166 = arith.constant dense<0.000000e+00> : vector<64x128xf32>
    %145 = tpu.matmul %142, %144, %cst_166 {dimension_numbers = #tpu.dot_dimension_numbers<[1], [0], [0], [1], [0, 0, 1, 1], [], []>} : vector<64x128xbf16>, vector<128x128xbf16>, vector<64x128xf32> -> vector<64x128xf32>
    %146 = arith.addf %140, %145 : vector<64x128xf32>
    %c0_167 = arith.constant 0 : index
    %c2_168 = arith.constant 2 : index
    %c0_169 = arith.constant 0 : index
    %c0_170 = arith.constant 0 : index
    %147 = vector.load %arg10[%c0_167, %c2_168, %c0_169, %c0_170] : memref<1x10x10x128xbf16, #tpu.memory_space<vmem>>, vector<1x8x8x128xbf16>
    %148 = vector.shape_cast %147 : vector<1x8x8x128xbf16> to vector<64x128xbf16>
    %c6_171 = arith.constant 6 : index
    %c0_172 = arith.constant 0 : index
    %c0_173 = arith.constant 0 : index
    %149 = vector.load %arg6[%c6_171, %c0_172, %c0_173] : memref<9x128x128xbf16, #tpu.memory_space<vmem>>, vector<1x128x128xbf16>
    %150 = vector.shape_cast %149 : vector<1x128x128xbf16> to vector<128x128xbf16>
    %cst_174 = arith.constant dense<0.000000e+00> : vector<64x128xf32>
    %151 = tpu.matmul %148, %150, %cst_174 {dimension_numbers = #tpu.dot_dimension_numbers<[1], [0], [0], [1], [0, 0, 1, 1], [], []>} : vector<64x128xbf16>, vector<128x128xbf16>, vector<64x128xf32> -> vector<64x128xf32>
    %152 = arith.addf %146, %151 : vector<64x128xf32>
    %c0_175 = arith.constant 0 : index
    %c2_176 = arith.constant 2 : index
    %c1_177 = arith.constant 1 : index
    %c0_178 = arith.constant 0 : index
    %153 = vector.load %arg10[%c0_175, %c2_176, %c1_177, %c0_178] : memref<1x10x10x128xbf16, #tpu.memory_space<vmem>>, vector<1x8x8x128xbf16>
    %154 = vector.shape_cast %153 : vector<1x8x8x128xbf16> to vector<64x128xbf16>
    %c7_179 = arith.constant 7 : index
    %c0_180 = arith.constant 0 : index
    %c0_181 = arith.constant 0 : index
    %155 = vector.load %arg6[%c7_179, %c0_180, %c0_181] : memref<9x128x128xbf16, #tpu.memory_space<vmem>>, vector<1x128x128xbf16>
    %156 = vector.shape_cast %155 : vector<1x128x128xbf16> to vector<128x128xbf16>
    %cst_182 = arith.constant dense<0.000000e+00> : vector<64x128xf32>
    %157 = tpu.matmul %154, %156, %cst_182 {dimension_numbers = #tpu.dot_dimension_numbers<[1], [0], [0], [1], [0, 0, 1, 1], [], []>} : vector<64x128xbf16>, vector<128x128xbf16>, vector<64x128xf32> -> vector<64x128xf32>
    %158 = arith.addf %152, %157 : vector<64x128xf32>
    %c0_183 = arith.constant 0 : index
    %c2_184 = arith.constant 2 : index
    %c2_185 = arith.constant 2 : index
    %c0_186 = arith.constant 0 : index
    %159 = vector.load %arg10[%c0_183, %c2_184, %c2_185, %c0_186] : memref<1x10x10x128xbf16, #tpu.memory_space<vmem>>, vector<1x8x8x128xbf16>
    %160 = vector.shape_cast %159 : vector<1x8x8x128xbf16> to vector<64x128xbf16>
    %c8_187 = arith.constant 8 : index
    %c0_188 = arith.constant 0 : index
    %c0_189 = arith.constant 0 : index
    %161 = vector.load %arg6[%c8_187, %c0_188, %c0_189] : memref<9x128x128xbf16, #tpu.memory_space<vmem>>, vector<1x128x128xbf16>
    %162 = vector.shape_cast %161 : vector<1x128x128xbf16> to vector<128x128xbf16>
    %cst_190 = arith.constant dense<0.000000e+00> : vector<64x128xf32>
    %163 = tpu.matmul %160, %162, %cst_190 {dimension_numbers = #tpu.dot_dimension_numbers<[1], [0], [0], [1], [0, 0, 1, 1], [], []>} : vector<64x128xbf16>, vector<128x128xbf16>, vector<64x128xf32> -> vector<64x128xf32>
    %164 = arith.addf %158, %163 : vector<64x128xf32>
    %c0_191 = arith.constant 0 : index
    %c1_192 = arith.constant 1 : index
    %c1_193 = arith.constant 1 : index
    %c0_194 = arith.constant 0 : index
    %165 = vector.load %arg9[%c0_191, %c1_192, %c1_193, %c0_194] : memref<1x10x10x128xbf16, #tpu.memory_space<vmem>>, vector<1x8x8x128xbf16>
    %166 = vector.shape_cast %165 : vector<1x8x8x128xbf16> to vector<64x128xbf16>
    %c0_195 = arith.constant 0 : index
    %c0_196 = arith.constant 0 : index
    %167 = vector.load %arg7[%c0_195, %c0_196] : memref<1x128xf32, #tpu.memory_space<vmem>>, vector<1x128xf32>
    %168 = vector.broadcast %167 : vector<1x128xf32> to vector<64x128xf32>
    %169 = arith.addf %164, %168 : vector<64x128xf32>
    %170 = arith.extf %166 : vector<64x128xbf16> to vector<64x128xf32>
    %171 = arith.addf %169, %170 : vector<64x128xf32>
    %cst_197 = arith.constant 0.000000e+00 : f32
    %172 = vector.broadcast %cst_197 : f32 to vector<64x128xf32>
    %173 = arith.maximumf %171, %172 : vector<64x128xf32>
    %174 = vector.shape_cast %173 : vector<64x128xf32> to vector<1x8x8x128xf32>
    %175 = arith.truncf %174 : vector<1x8x8x128xf32> to vector<1x8x8x128xbf16>
    %c0_198 = arith.constant 0 : index
    %c0_199 = arith.constant 0 : index
    %c0_200 = arith.constant 0 : index
    %c0_201 = arith.constant 0 : index
    %176 = vector.load %arg8[%c0_198, %c0_199, %c0_200, %c0_201] : memref<1x8x8x128xbf16, #tpu.memory_space<vmem>>, vector<1x8x8x128xbf16>
    tpu.vector_store %arg8[%c0_198, %c0_199, %c0_200, %c0_201], %175 {strides = array<i32>} : memref<1x8x8x128xbf16, #tpu.memory_space<vmem>>, vector<1x8x8x128xbf16>,
    return
  }
  func.func @transform_0(%arg0: i32) -> (i32, i32, i32) {
    %c0_i32 = arith.constant 0 : i32
    %c0_i32_0 = arith.constant 0 : i32
    %c0_i32_1 = arith.constant 0 : i32
    return %arg0, %c0_i32, %c0_i32_0 : i32, i32, i32
  }
  func.func @transform_1(%arg0: i32) -> (i32, i32) {
    %c0_i32 = arith.constant 0 : i32
    %c0_i32_0 = arith.constant 0 : i32
    %c0_i32_1 = arith.constant 0 : i32
    return %c0_i32, %c0_i32_0 : i32, i32
  }
  func.func @transform_2(%arg0: i32) -> (i32, i32) {
    %c0_i32 = arith.constant 0 : i32
    %c0_i32_0 = arith.constant 0 : i32
    %c0_i32_1 = arith.constant 0 : i32
    return %c0_i32, %c0_i32_0 : i32, i32
  }
  func.func @transform_3(%arg0: i32) -> (i32, i32, i32) {
    %c0_i32 = arith.constant 0 : i32
    %c0_i32_0 = arith.constant 0 : i32
    %c0_i32_1 = arith.constant 0 : i32
    %c0_i32_2 = arith.constant 0 : i32
    return %c0_i32, %c0_i32_0, %c0_i32_1 : i32, i32, i32
  }
  func.func @transform_4(%arg0: i32) -> (i32, i32) {
    %c0_i32 = arith.constant 0 : i32
    %c0_i32_0 = arith.constant 0 : i32
    %c0_i32_1 = arith.constant 0 : i32
    return %c0_i32, %c0_i32_0 : i32, i32
  }
  func.func @transform_5(%arg0: i32) -> (i32, i32, i32) {
    %c0_i32 = arith.constant 0 : i32
    %c0_i32_0 = arith.constant 0 : i32
    %c0_i32_1 = arith.constant 0 : i32
    %c0_i32_2 = arith.constant 0 : i32
    return %c0_i32, %c0_i32_0, %c0_i32_1 : i32, i32, i32
  }
  func.func @transform_6(%arg0: i32) -> (i32, i32) {
    %c0_i32 = arith.constant 0 : i32
    %c0_i32_0 = arith.constant 0 : i32
    %c0_i32_1 = arith.constant 0 : i32
    return %c0_i32, %c0_i32_0 : i32, i32
  }
  func.func @transform_7(%arg0: i32) -> (i32, i32, i32, i32) {
    %c0_i32 = arith.constant 0 : i32
    %c0_i32_0 = arith.constant 0 : i32
    %c0_i32_1 = arith.constant 0 : i32
    %c0_i32_2 = arith.constant 0 : i32
    return %arg0, %c0_i32, %c0_i32_0, %c0_i32_1 : i32, i32, i32, i32
  }
}

</mosaic_0001>

<bundles_post_ra>
// kernel: res_bottom_forward.1
= control target key start
LH: loop header
LB: loop body
LE: loop exit
PB: predicated region body
PF: predicated region fallthrough
CT: control target
= control target key end

     0   :  { %s6335_s24 = smov 0   ;;  %s7850_s0 = inlined_call_operand.vmem [shape: bf16[2,256,256], index: 0, kind: input, shape index: {}]   ;;  %s7851_s1 = inlined_call_operand.vmem [shape: bf16[256,128], index: 1, kind: input, shape index: {}]   ;;  %s7852_s2 = inlined_call_operand.vmem [shape: f32[1,128], index: 2, kind: input, shape index: {}]   ;;  %s7853_s3 = inlined_call_operand.vmem [shape: bf16[9,128,128], index: 3, kind: input, shape index: {}]   ;;  %s7854_s4 = inlined_call_operand.vmem [shape: f32[1,128], index: 4, kind: input, shape index: {}]   ;;  %s7855_s5 = inlined_call_operand.vmem [shape: bf16[9,128,128], index: 5, kind: input, shape index: {}]   ;;  %s7856_s6 = inlined_call_operand.vmem [shape: f32[1,128], index: 6, kind: input, shape index: {}]   ;;  %s7857_s7 = inlined_call_operand.vmem [shape: bf16[2,8,8,128], index: 7, kind: output, shape index: {}]  }
   0x1 LB: > { %s4837_s25 = sadd.s32 4294967295, %s6292_s24   ;;  %p4841_p0 = scmp.ge.s32.totalorder %s6292_s24, 1  ;;  %s6292_s24 = sphi %s6335_s24, %s17_s24  }
   0x2   : > { %p237_p1 = scmp.lt.s32.totalorder %s6292_s24, 3 }
   0x4   : > { %p238_p2 = pnand %p4841_p0, %p237_p1 }
   0x5   : > { %p269_p3 = scmp.lt.s32.totalorder (!%p238_p2), %s4837_s25, 1 }
   0x6   : > { %241 = sbr.rel (%p238_p2) target bundleno = 1077 (0x435), region = 48 }
   0xb   : > { %v6025_v0 = vld [vmem:[%s7851_s1 + $0x38] sm:$0xff]  ;;  %v6024_v2 = vld [vmem:[%s7851_s1 + $0x30] sm:$0xff]  ;;  %v6023_v4 = vld [vmem:[%s7851_s1 + $0x28] sm:$0xff]  ;;  %s7869_s25 = smov (!%p269_p3, %s4837_s25), 1  ;;  %vm285_vm0 = vcmask 1040384   ;;  %vm1105_vm6 = vcmask 1043456  }
   0xc   : > { %v6033_v1 = vld [vmem:[%s7851_s1 + $0x78] sm:$0xff]  ;;  %739 = vmatpush.bf16.msra.mxu0 %v6025_v0  ;;  %v6032_v3 = vld [vmem:[%s7851_s1 + $0x70] sm:$0xff]  ;;  %6257 = vmatpush.bf16.msra.mxu2 %v6025_v0  ;;  %v6031_v5 = vld [vmem:[%s7851_s1 + $0x68] sm:$0xff]  ;;  %s6016_s29 = sshll.u32 %s7869_s25, 8  ;;  %vm286_vm1 = vsmask.f32 256 }
   0xd   : > { %828 = vmatpush.bf16.msra.mxu1 %v6033_v1  ;;  %6265 = vmatpush.bf16.msra.mxu3 %v6033_v1  ;;  %v6022_v6 = vld [vmem:[%s7851_s1 + $0x20] sm:$0xff]  ;;  %v6021_v8 = vld [vmem:[%s7851_s1 + $0x18] sm:$0xff]  ;;  %v6020_v10 = vld [vmem:[%s7851_s1 + $0x10] sm:$0xff]  ;;  %s6395_s13 = scalar_lea.vmem %s7850_s0, %s6016_s29  ;;  %vm318_vm3 = vsmask.f32 7938  ;;  %vm1537_vm8 = vcmask 1042432  }
   0xe   : > { %v6030_v7 = vld [vmem:[%s7851_s1 + $0x60] sm:$0xff]  ;;  %v6029_v9 = vld [vmem:[%s7851_s1 + $0x58] sm:$0xff]  ;;  %v6028_v11 = vld [vmem:[%s7851_s1 + $0x50] sm:$0xff]  ;;  %vm1538_vm9 = vcmask 1046532   ;;  %vm1187_vm10 = vsmask.f32 3328 }
   0xf   : > { %v6019_v12 = vld [vmem:[%s7851_s1 + $0x8] sm:$0xff]  ;;  %v6018_v14 = vld [vmem:[%s7851_s1] sm:$0xff]  ;;  %v4856_v22 = vld [vmem:[%s6395_s13 + $0x10] sm:$0xf]  ;;  %vm1188_vm11 = vsmask.f32 7440 }
  0x10   : > { %740 = vmatpush.bf16.msra.mxu0 %v6024_v2  ;;  %6258 = vmatpush.bf16.msra.mxu2 %v6024_v2  ;;  %v6027_v13 = vld [vmem:[%s7851_s1 + $0x48] sm:$0xff]  ;;  %v6026_v15 = vld [vmem:[%s7851_s1 + $0x40] sm:$0xff]  ;;  %v6037_v23 = vld [vmem:[%s6395_s13 + $0x14] sm:$0xf0]  ;;  %s6017_s20 = sshll.u32 %s7869_s25, 5 }
  0x11   : > { %829 = vmatpush.bf16.msra.mxu1 %v6032_v3  ;;  %6266 = vmatpush.bf16.msra.mxu3 %v6032_v3  ;;  %v4848_v16 = vld [vmem:[%s6395_s13] sm:$0xf]  ;;  %v6035_v17 = vld [vmem:[%s6395_s13 + $0x4] sm:$0xf0]  ;;  %v6034_v18 = vld [vmem:[%s6395_s13 + $0x4] sm:$0xf]  ;;  %v4857_v26 = vor.u32 %v6037_v23, %v4856_v22  ;;  %s7811_s23 = scalar_lea.vmem %s7857_s7, %s6017_s20 }
  0x12   : > { %v4850_v19 = vld [vmem:[%s6395_s13 + $0x8] sm:$0xf0]  ;;  %v4849_v20 = vor.u32 %v6035_v17, %v4848_v16  ;;  %v6036_v24 = vld [vmem:[%s6395_s13 + $0x14] sm:$0xf]  ;;  %v4858_v25 = vld [vmem:[%s6395_s13 + $0x18] sm:$0xf0] }
  0x13   : > { %v4853_v21 = vor.u32 %v6034_v18, %v4850_v19  ;;  %v4861_v27 = vor.u32 %v6036_v24, %v4858_v25  ;;  %v4864_v28 = vld [vmem:[%s6395_s13 + $0x20] sm:$0xf]  ;;  %v6039_v29 = vld [vmem:[%s6395_s13 + $0x24] sm:$0xf0]  ;;  %v6038_v30 = vld [vmem:[%s6395_s13 + $0x24] sm:$0xf] }
  0x14   : > { %741 = vmatpush.bf16.msra.mxu0 %v6023_v4  ;;  %6259 = vmatpush.bf16.msra.mxu2 %v6023_v4  ;;  %v4866_v31 = vld [vmem:[%s6395_s13 + $0x28] sm:$0xf0]  ;;  %v4865_v32 = vor.u32 %v6039_v29, %v4864_v28  ;;  %v4872_v34 = vld [vmem:[%s6395_s13 + $0x30] sm:$0xf]  ;;  %v6041_v35 = vld [vmem:[%s6395_s13 + $0x34] sm:$0xf0] }
  0x15   : > { %830 = vmatpush.bf16.msra.mxu1 %v6031_v5  ;;  %6267 = vmatpush.bf16.msra.mxu3 %v6031_v5  ;;  %v4869_v33 = vor.u32 %v6038_v30, %v4866_v31  ;;  %v6040_v36 = vld [vmem:[%s6395_s13 + $0x34] sm:$0xf]  ;;  %v4874_v37 = vld [vmem:[%s6395_s13 + $0x38] sm:$0xf0]  ;;  %v4873_v38 = vor.u32 %v6041_v35, %v4872_v34  ;;  %v4960_v40 = vld [vmem:[%s6395_s13 + $0xe0] sm:$0xf] }
  0x16   : > { %v4877_v39 = vor.u32 %v6040_v36, %v4874_v37  ;;  %v6063_v41 = vld [vmem:[%s6395_s13 + $0xe4] sm:$0xf0]  ;;  %v6062_v42 = vld [vmem:[%s6395_s13 + $0xe4] sm:$0xf]  ;;  %v4962_v44 = vld [vmem:[%s6395_s13 + $0xe8] sm:$0xf0] }
  0x17   : > { %v4961_v43 = vor.u32 %v6063_v41, %v4960_v40  ;;  %v4965_v45 = vor.u32 %v6062_v42, %v4962_v44  ;;  %v4880_v46 = vld [vmem:[%s6395_s13 + $0x40] sm:$0xf]  ;;  %v6043_v47 = vld [vmem:[%s6395_s13 + $0x44] sm:$0xf0]  ;;  %v6042_v48 = vld [vmem:[%s6395_s13 + $0x44] sm:$0xf] }
  0x18   : > { %742 = vmatpush.bf16.msra.mxu0 %v6022_v6  ;;  %6260 = vmatpush.bf16.msra.mxu2 %v6022_v6  ;;  %v4882_v49 = vld [vmem:[%s6395_s13 + $0x48] sm:$0xf0]  ;;  %v4881_v50 = vor.u32 %v6043_v47, %v4880_v46  ;;  %v4968_v52 = vld [vmem:[%s6395_s13 + $0xf0] sm:$0xf]  ;;  %v6065_v53 = vld [vmem:[%s6395_s13 + $0xf4] sm:$0xf0] }
  0x19   : > { %831 = vmatpush.bf16.msra.mxu1 %v6030_v7  ;;  %6268 = vmatpush.bf16.msra.mxu3 %v6030_v7  ;;  %v4885_v51 = vor.u32 %v6042_v48, %v4882_v49  ;;  %v6064_v54 = vld [vmem:[%s6395_s13 + $0xf4] sm:$0xf]  ;;  %v4969_v55 = vor.u32 %v6065_v53, %v4968_v52  ;;  %v4970_v56 = vld [vmem:[%s6395_s13 + $0xf8] sm:$0xf0]  ;;  %v4888_v58 = vld [vmem:[%s6395_s13 + $0x50] sm:$0xf] }
  0x1a   : > { %v4973_v57 = vor.u32 %v6064_v54, %v4970_v56  ;;  %v6045_v59 = vld [vmem:[%s6395_s13 + $0x54] sm:$0xf0]  ;;  %v6044_v60 = vld [vmem:[%s6395_s13 + $0x54] sm:$0xf]  ;;  %v4890_v61 = vld [vmem:[%s6395_s13 + $0x58] sm:$0xf0] }
  0x1b   : > { %v4889_v62 = vor.u32 %v6045_v59, %v4888_v58  ;;  %v4893_v63 = vor.u32 %v6044_v60, %v4890_v61  ;;  %v4896_v0 = vld [vmem:[%s6395_s13 + $0x60] sm:$0xf]  ;;  %v6047_v1 = vld [vmem:[%s6395_s13 + $0x64] sm:$0xf0]  ;;  %v6046_v2 = vld [vmem:[%s6395_s13 + $0x64] sm:$0xf] }
  0x1c   : > { %743 = vmatpush.bf16.msra.mxu0 %v6021_v8  ;;  %6261 = vmatpush.bf16.msra.mxu2 %v6021_v8  ;;  %v4898_v3 = vld [vmem:[%s6395_s13 + $0x68] sm:$0xf0]  ;;  %v4897_v4 = vor.u32 %v6047_v1, %v4896_v0  ;;  %v4904_v6 = vld [vmem:[%s6395_s13 + $0x70] sm:$0xf]  ;;  %v6049_v7 = vld [vmem:[%s6395_s13 + $0x74] sm:$0xf0] }
  0x1d   : > { %832 = vmatpush.bf16.msra.mxu1 %v6029_v9  ;;  %6269 = vmatpush.bf16.msra.mxu3 %v6029_v9  ;;  %v4901_v5 = vor.u32 %v6046_v2, %v4898_v3  ;;  %v6048_v8 = vld [vmem:[%s6395_s13 + $0x74] sm:$0xf]  ;;  %v4906_v9 = vld [vmem:[%s6395_s13 + $0x78] sm:$0xf0]  ;;  %v6450_v16 = vld [vmem:[%s7852_s2] ss:$0 sm:$0xff] }
  0x1e   : > { %v6053_v28 = vld [vmem:[%s6395_s13 + $0x94] sm:$0xf0]  ;;  %v6052_v29 = vld [vmem:[%s6395_s13 + $0x94] sm:$0xf]  ;;  %v4922_v30 = vld [vmem:[%s6395_s13 + $0x98] sm:$0xf0] }
  0x1f   : > { %v4925_v35 = vor.u32 %v6052_v29, %v4922_v30  ;;  %v4928_v44 = vld [vmem:[%s6395_s13 + $0xa0] sm:$0xf]  ;;  %v6054_v46 = vld [vmem:[%s6395_s13 + $0xa4] sm:$0xf]  ;;  %v4930_v47 = vld [vmem:[%s6395_s13 + $0xa8] sm:$0xf0] }
  0x20   : > { %744 = vmatpush.bf16.msra.mxu0 %v6020_v10  ;;  %6262 = vmatpush.bf16.msra.mxu2 %v6020_v10  ;;  %v4905_v10 = vor.u32 %v6049_v7, %v4904_v6  ;;  %v4933_v52 = vor.u32 %v6054_v46, %v4930_v47  ;;  %v6056_v0 = vld [vmem:[%s6395_s13 + $0xb4] sm:$0xf]  ;;  %v4938_v1 = vld [vmem:[%s6395_s13 + $0xb8] sm:$0xf0]  ;;  %vm6520_vm2 = vmand %vm285_vm0, %vm286_vm1 }
  0x21   : > { %833 = vmatpush.bf16.msra.mxu1 %v6028_v11  ;;  %6270 = vmatpush.bf16.msra.mxu3 %v6028_v11  ;;  %v4909_v11 = vor.u32 %v6048_v8, %v4906_v9  ;;  %v4941_v6 = vor.u32 %v6056_v0, %v4938_v1  ;;  %vm6527_vm4 = vmand %vm285_vm0, %vm318_vm3 }
  0x22   : > { %vm6608_vm7 = vmand %vm1105_vm6, %vm318_vm3 }
  0x23   : > { %vm6669_vm12 = vmor %vm1537_vm8, %vm1538_vm9 }
  0x24   : > { %745 = vmatpush.bf16.msra.mxu0 %v6019_v12  ;;  %6263 = vmatpush.bf16.msra.mxu2 %v6019_v12  ;;  %v4912_v12 = vld [vmem:[%s6395_s13 + $0x80] sm:$0xf]  ;;  %vm6683_vm13 = vmor %vm1187_vm10, %vm1188_vm11 }
  0x25   : > { %834 = vmatpush.bf16.msra.mxu1 %v6027_v13  ;;  %6271 = vmatpush.bf16.msra.mxu3 %v6027_v13  ;;  %v6051_v13 = vld [vmem:[%s6395_s13 + $0x84] sm:$0xf0] }
  0x26   : > { %v4913_v17 = vor.u32 %v6051_v13, %v4912_v12 }
  0x28   : > { %746 = vmatpush.bf16.msra.mxu0 %v6018_v14  ;;  %6264 = vmatpush.bf16.msra.mxu2 %v6018_v14  ;;  %v6050_v14 = vld [vmem:[%s6395_s13 + $0x84] sm:$0xf] }
  0x29   : > { %835 = vmatpush.bf16.msra.mxu1 %v6026_v15  ;;  %6272 = vmatpush.bf16.msra.mxu3 %v6026_v15  ;;  %v4914_v15 = vld [vmem:[%s6395_s13 + $0x88] sm:$0xf0] }
  0x2a   : > { %v4917_v18 = vor.u32 %v6050_v14, %v4914_v15  ;;  %v4944_v14 = vld [vmem:[%s6395_s13 + $0xc0] sm:$0xf]  ;;  %v6059_v15 = vld [vmem:[%s6395_s13 + $0xc4] sm:$0xf0] }
  0x2b   : > { %747 = vmatmul.bf16.vlgmr.msra.gmra.mxu0 %v4849_v20  ;;  %817 = vmatmul.bf16.vlgmr.msra.gmra.mxu2 %v4961_v43 }
  0x2c   : > { %836 = vmatmul.bf16.vlgmr.msra.gmra.mxu1 %v4853_v21  ;;  %906 = vmatmul.bf16.vlgmr.msra.gmra.mxu3 %v4965_v45  ;;  %v6055_v45 = vld [vmem:[%s6395_s13 + $0xa4] sm:$0xf0] }
  0x3b   : > { %752 = vmatmul.bf16.gmra.mxu0 %v4857_v26  ;;  %822 = vmatmul.bf16.gmra.mxu2 %v4969_v55 }
  0x3c   : > { %841 = vmatmul.bf16.gmra.mxu1 %v4861_v27  ;;  %911 = vmatmul.bf16.gmra.mxu3 %v4973_v57  ;;  %v4920_v27 = vld [vmem:[%s6395_s13 + $0x90] sm:$0xf] }
  0x3d   : > { %v4921_v34 = vor.u32 %v6053_v28, %v4920_v27 }
  0x4b   : > { %757 = vmatmul.bf16.gmra.mxu0 %v4865_v32 }
  0x4c   : > { %846 = vmatmul.bf16.gmra.mxu1 %v4869_v33 }
  0x5b   : > { %762 = vmatmul.bf16.gmra.mxu0 %v4873_v38 }
  0x5c   : > { %851 = vmatmul.bf16.gmra.mxu1 %v4877_v39 }
  0x6b   : > { %767 = vmatmul.bf16.gmra.mxu0 %v4881_v50 }
  0x6c   : > { %856 = vmatmul.bf16.gmra.mxu1 %v4885_v51  ;;  %v4929_v51 = vor.u32 %v6055_v45, %v4928_v44 }
  0x7b   : > { %772 = vmatmul.bf16.gmra.mxu0 %v4889_v62  ;;  %v4936_v62 = vld [vmem:[%s6395_s13 + $0xb0] sm:$0xf] }
  0x7c   : > { %861 = vmatmul.bf16.gmra.mxu1 %v4893_v63  ;;  %v6057_v63 = vld [vmem:[%s6395_s13 + $0xb4] sm:$0xf0] }
  0x8b   : > { %777 = vmatmul.bf16.gmra.mxu0 %v4897_v4 }
  0x8c   : > { %866 = vmatmul.bf16.gmra.mxu1 %v4901_v5  ;;  %v4937_v5 = vor.u32 %v6057_v63, %v4936_v62 }
  0x9b   : > { %782 = vmatmul.bf16.gmra.mxu0 %v4905_v10 }
  0x9c   : > { %871 = vmatmul.bf16.gmra.mxu1 %v4909_v11 }
  0xa8   : > { %v748_v19 = vpop.f32.mrf.mxu0 }
  0xa9   : > { %v837_v20 = vpop.f32.mrf.mxu1  ;;  %v749_v21 = vadd.f32 %v6450_v16, %v748_v19  ;;  %v4945_v19 = vor.u32 %v6059_v15, %v4944_v14  ;;  %v6077_v15 = vld [vmem:[%s7853_s3 + $0x38] sm:$0xff] }
  0xaa   : > { %1484 = vmatpush.bf16.msrb.mxu3 %v6077_v15  ;;  %v326_v15 = vld [vmem:[#allocation2 + $0x14] sm:$0x1] }
  0xab   : > { %v838_v22 = vadd.f32 %v837_v20, %v749_v21  ;;  %787 = vmatmul.bf16.gmra.mxu0 %v4913_v17  ;;  %v6058_v17 = vld [vmem:[%s6395_s13 + $0xc4] sm:$0xf] }
  0xac   : > { %876 = vmatmul.bf16.gmra.mxu1 %v4917_v18  ;;  %v4946_v18 = vld [vmem:[%s6395_s13 + $0xc8] sm:$0xf0] }
  0xad   : > { %v917_v31 = vmax.f32 %v838_v22, 0.0  ;;  %v4949_v20 = vor.u32 %v6058_v17, %v4946_v18 }
  0xae   : > { %v818_v21 = vpop.f32.mrf.mxu2 }
  0xaf   : > { %v907_v27 = vpop.f32.mrf.mxu3 }
  0xb0   : > { %v750_v23 = vpop.f32.mrf.mxu0 }
  0xb1   : > { %v839_v24 = vpop.f32.mrf.mxu1  ;;  %v751_v25 = vadd.f32 %v6450_v16, %v750_v23 }
  0xb3   : > { %v840_v26 = vadd.f32 %v839_v24, %v751_v25  ;;  %v819_v25 = vadd.f32 %v6450_v16, %v818_v21 }
  0xb5   : > { %v918_v32 = vmax.f32 %v840_v26, 0.0  ;;  %v908_v28 = vadd.f32 %v907_v27, %v819_v25  ;;  %v291_v25 = vld [vmem:[#allocation2 + $0x8] sm:$0x1]  ;;  %v323_v27 = vld [vmem:[#allocation2 + $0xc] sm:$0x1] }
  0xb7   : > { %v6458_v33 = vmax.f32 %v917_v31, %v918_v32  ;;  %v4952_v31 = vld [vmem:[%s6395_s13 + $0xd0] sm:$0xf]  ;;  %v945_v44 = vmax.f32 %v908_v28, 0.0 }
  0xb8   : > { %v753_v36 = vpop.f32.mrf.mxu0 }
  0xb9   : > { %v842_v37 = vpop.f32.mrf.mxu1  ;;  %v754_v38 = vadd.f32 %v6450_v16, %v753_v36  ;;  %v820_v36 = vpop.f32.mrf.mxu2 }
  0xbb   : > { %v843_v39 = vadd.f32 %v842_v37, %v754_v38  ;;  %792 = vmatmul.bf16.gmra.mxu0 %v4921_v34  ;;  %v6060_v34 = vld [vmem:[%s6395_s13 + $0xd4] sm:$0xf]  ;;  %v821_v37 = vadd.f32 %v6450_v16, %v820_v36  ;;  %v6075_v36 = vld [vmem:[%s7853_s3 + $0x28] sm:$0xff] }
  0xbc   : > { %881 = vmatmul.bf16.gmra.mxu1 %v4925_v35  ;;  %v4954_v35 = vld [vmem:[%s6395_s13 + $0xd8] sm:$0xf0] }
  0xbd   : > { %v919_v48 = vmax.f32 %v843_v39, 0.0  ;;  %v4957_v39 = vor.u32 %v6060_v34, %v4954_v35  ;;  %v324_v34 = vsel %vm6527_vm4, 0, %v323_v27  ;;  %v6081_v27 = vld [vmem:[%s7853_s3 + $0x58] sm:$0xff] }
  0xbe   : > { %325 = vst [vmem:[#allocation2 + $0xc] sm:$0x1] %v324_v34 }
  0xc0   : > { %v755_v40 = vpop.f32.mrf.mxu0 }
  0xc1   : > { %v844_v41 = vpop.f32.mrf.mxu1  ;;  %v756_v42 = vadd.f32 %v6450_v16, %v755_v40  ;;  %v909_v40 = vpop.f32.mrf.mxu3 }
  0xc2   : > { %v6506_v45 = vadd.f32 %v909_v40, %v821_v37  ;;  %v6085_v40 = vld [vmem:[%s7853_s3 + $0x78] sm:$0xff] }
  0xc3   : > { %v845_v43 = vadd.f32 %v844_v41, %v756_v42  ;;  %1383 = vmatpush.bf16.msrb.mxu2 %v6085_v40 }
  0xc4   : > { %v946_v47 = vmax.f32 %v6506_v45, 0.0  ;;  %v6083_v45 = vld [vmem:[%s7853_s3 + $0x68] sm:$0xff] }
  0xc5   : > { %v920_v49 = vmax.f32 %v845_v43, 0.0 }
  0xc7   : > { %v950_v50 = vmax.f32 %v919_v48, %v920_v49  ;;  %v6513_v48 = vmax.f32 %v945_v44, %v946_v47 }
  0xc8   : > { %v758_v53 = vpop.f32.mrf.mxu0 }
  0xc9   : > { %v847_v54 = vpop.f32.mrf.mxu1  ;;  %v6466_v55 = vmax.f32 %v950_v50, %v918_v32  ;;  %v759_v56 = vadd.f32 %v6450_v16, %v758_v53  ;;  %v6061_v32 = vld [vmem:[%s6395_s13 + $0xd4] sm:$0xf0] }
  0xca   : > { %v4953_v38 = vor.u32 %v6061_v32, %v4952_v31  ;;  %v292_v32 = vsel %vm6520_vm2, 0, %v291_v25 }
  0xcb   : > { %v848_v57 = vadd.f32 %v847_v54, %v759_v56  ;;  %797 = vmatmul.bf16.gmra.mxu0 %v4929_v51  ;;  %v823_v51 = vpop.f32.mrf.mxu2  ;;  %v912_v56 = vpop.f32.mrf.mxu3  ;;  %293 = vst [vmem:[#allocation2 + $0x8] sm:$0x1] %v292_v32 }
  0xcc   : > { %886 = vmatmul.bf16.gmra.mxu1 %v4933_v52 }
  0xcd   : > { %v921_v2 = vmax.f32 %v848_v57, 0.0  ;;  %v312_v57 = vld [vmem:[#allocation2 + $0x40] sm:$0x1] }
  0xce   : > { %v313_v62 = vsel %vm6520_vm2, 0, %v312_v57 }
  0xcf   : > { %314 = vst [vmem:[#allocation2 + $0x40] sm:$0x1] %v313_v62 }
  0xd0   : > { %v760_v58 = vpop.f32.mrf.mxu0 }
  0xd1   : > { %v849_v59 = vpop.f32.mrf.mxu1  ;;  %v761_v60 = vadd.f32 %v6450_v16, %v760_v58 }
  0xd3   : > { %v6470_v61 = vadd.f32 %v849_v59, %v761_v60  ;;  %v344_v59 = vld [vmem:[#allocation2 + $0x44] sm:$0x1]  ;;  %v825_v1 = vpop.f32.mrf.mxu2  ;;  %v914_v14 = vpop.f32.mrf.mxu3 }
  0xd4   : > { %v345_v0 = vsel %vm6527_vm4, 0, %v344_v59  ;;  %v6073_v59 = vld [vmem:[%s7853_s3 + $0x18] sm:$0xff] }
  0xd5   : > { %v922_v3 = vmax.f32 %v6470_v61, 0.0  ;;  %346 = vst [vmem:[#allocation2 + $0x44] sm:$0x1] %v345_v0 }
  0xd7   : > { %v951_v4 = vmax.f32 %v921_v2, %v922_v3 }
  0xd8   : > { %v763_v7 = vpop.f32.mrf.mxu0 }
  0xd9   : > { %v852_v8 = vpop.f32.mrf.mxu1  ;;  %v6479_v9 = vmax.f32 %v951_v4, %v920_v49  ;;  %v764_v10 = vadd.f32 %v6450_v16, %v763_v7  ;;  %v824_v7 = vadd.f32 %v6450_v16, %v823_v51 }
  0xdb   : > { %v6482_v11 = vadd.f32 %v852_v8, %v764_v10  ;;  %802 = vmatmul.bf16.gmra.mxu0 %v4937_v5  ;;  %v6294_v5 = vmov 0   ;;  %v826_v8 = vadd.f32 %v6450_v16, %v825_v1  ;;  %v6072_v1 = vld [vmem:[%s7853_s3 + $0x10] sm:$0xff] }
  0xdc   : > { %891 = vmatmul.bf16.gmra.mxu1 %v4941_v6  ;;  %280 = vst [vmem:[#allocation2] sm:$0xf] %v6294_v5 }
  0xdd   : > { %281 = vst [vmem:[#allocation2 + $0x4] sm:$0x1] %v6294_v5 }
  0xde   : > { %283 = vst [vmem:[#allocation2 + $0x48] sm:$0xf] %v6294_v5 }
  0xdf   : > { %284 = vst [vmem:[#allocation2 + $0x4c] sm:$0x1] %v6294_v5 }
  0xe0   : > { %v6484_v12 = vpop.f32.mrf.mxu0  ;;  %350 = vst [vmem:[#allocation3] sm:$0xf] %v6294_v5 }
  0xe1   : > { %v6486_v13 = vpop.f32.mrf.mxu1  ;;  %351 = vst [vmem:[#allocation3 + $0x4] sm:$0x1] %v6294_v5 }
  0xe2   : > { %353 = vst [vmem:[#allocation3 + $0x48] sm:$0xf] %v6294_v5 }
  0xe3   : > { %354 = vst [vmem:[#allocation3 + $0x4c] sm:$0x1] %v6294_v5  ;;  %v288_v5 = vld [vmem:[#allocation2] sm:$0x1] }
  0xe6   : > { %v347_v35 = vld [vmem:[#allocation2 + $0x4c] sm:$0x1] }
  0xe7   : > { %v348_v37 = vsel %vm6527_vm4, 0, %v347_v35 }
  0xe8   : > { %v768_v22 = vpop.f32.mrf.mxu0  ;;  %349 = vst [vmem:[#allocation2 + $0x4c] sm:$0x1] %v348_v37 }
  0xe9   : > { %v857_v23 = vpop.f32.mrf.mxu1  ;;  %v769_v24 = vadd.f32 %v6450_v16, %v768_v22  ;;  %v6076_v22 = vld [vmem:[%s7853_s3 + $0x30] sm:$0xff] }
  0xea   : > { %1485 = vmatpush.bf16.msrb.mxu3 %v6076_v22  ;;  %v6071_v22 = vld [vmem:[%s7853_s3 + $0x8] sm:$0xff] }
  0xeb   : > { %v6494_v26 = vadd.f32 %v857_v23, %v769_v24  ;;  %807 = vmatmul.bf16.gmra.mxu0 %v4945_v19  ;;  %v913_v19 = vadd.f32 %v912_v56, %v824_v7 }
  0xec   : > { %896 = vmatmul.bf16.gmra.mxu1 %v4949_v20  ;;  %v915_v20 = vadd.f32 %v914_v14, %v826_v8  ;;  %v289_v8 = vsel %vm6520_vm2, 0, %v288_v5  ;;  %v294_v14 = vld [vmem:[#allocation2 + $0x10] sm:$0x1]  ;;  %v329_v5 = vld [vmem:[#allocation2 + $0x1c] sm:$0x1] }
  0xed   : > { %v947_v28 = vmax.f32 %v913_v19, 0.0  ;;  %290 = vst [vmem:[#allocation2] sm:$0x1] %v289_v8 }
  0xee   : > { %v948_v31 = vmax.f32 %v915_v20, 0.0  ;;  %1486 = vmatpush.bf16.msrb.mxu3 %v6075_v36  ;;  %v295_v20 = vsel %vm6520_vm2, 0, %v294_v14  ;;  %v330_v14 = vsel %vm6527_vm4, 0, %v329_v5  ;;  %v332_v5 = vld [vmem:[#allocation2 + $0x24] sm:$0x1] }
  0xef   : > { %296 = vst [vmem:[#allocation2 + $0x10] sm:$0x1] %v295_v20 }
  0xf0   : > { %v6496_v29 = vpop.f32.mrf.mxu0  ;;  %331 = vst [vmem:[#allocation2 + $0x1c] sm:$0x1] %v330_v14 }
  0xf1   : > { %v6498_v30 = vpop.f32.mrf.mxu1 }
  0xf8   : > { %v773_v41 = vpop.f32.mrf.mxu0 }
  0xf9   : > { %v862_v42 = vpop.f32.mrf.mxu1  ;;  %v774_v43 = vadd.f32 %v6450_v16, %v773_v41  ;;  %v989_v41 = vlaneseq }
  0xfb   : > { %v6508_v46 = vadd.f32 %v862_v42, %v774_v43  ;;  %812 = vmatmul.bf16.gmra.mxu0 %v4953_v38  ;;  %v6074_v42 = vld [vmem:[%s7853_s3 + $0x20] sm:$0xff]  ;;  %v6566_v57 = vshrl.u32 %v989_v41, 7 }
  0xfc   : > { %901 = vmatmul.bf16.gmra.mxu1 %v4957_v39  ;;  %v964_v39 = vmax.f32 %v947_v28, %v948_v31  ;;  %1487 = vmatpush.bf16.msrb.mxu3 %v6074_v42  ;;  %v6070_v31 = vld [vmem:[%s7853_s3] sm:$0xff] }
  0xfd   : > { %vm991_vm5 = vcmp.eq.s32.totalorder %v6566_v57, 0 }
 0x100   : > { %v6515_v49 = vpop.f32.mrf.mxu0  ;;  %1488 = vmatpush.bf16.msrb.mxu3 %v6073_v59 }
 0x101   : > { %v6517_v50 = vpop.f32.mrf.mxu1 }
 0x104   : > { %1489 = vmatpush.bf16.msrb.mxu3 %v6072_v1  ;;  %v965_v1 = vmax.f32 %v6458_v33, 0.0  ;;  %v6148_v33 = vld [vmem:[%s7853_s3 + $0x230] sm:$0xff] }
 0x108   : > { %v778_v52 = vpop.f32.mrf.mxu0  ;;  %1490 = vmatpush.bf16.msrb.mxu3 %v6071_v22 }
 0x109   : > { %v867_v53 = vpop.f32.mrf.mxu1  ;;  %v779_v54 = vadd.f32 %v6450_v16, %v778_v52 }
 0x10b   : > { %v868_v60 = vadd.f32 %v867_v53, %v779_v54  ;;  %v980_v53 = vmax.f32 %v964_v39, %v946_v47  ;;  %v6084_v54 = vld [vmem:[%s7853_s3 + $0x70] sm:$0xff] }
 0x10c   : > { %1384 = vmatpush.bf16.msrb.mxu2 %v6084_v54  ;;  %1491 = vmatpush.bf16.msrb.mxu3 %v6070_v31 }
 0x10d   : > { %v929_v17 = vmax.f32 %v868_v60, 0.0  ;;  %v988_v0 = vrot.slane %v980_v53, 7 }
 0x110   : > { %v780_v2 = vpop.f32.mrf.mxu0  ;;  %1385 = vmatpush.bf16.msrb.mxu2 %v6083_v45 }
 0x111   : > { %v869_v4 = vpop.f32.mrf.mxu1  ;;  %v781_v6 = vadd.f32 %v6450_v16, %v780_v2 }
 0x113   : > { %v870_v10 = vadd.f32 %v869_v4, %v781_v6  ;;  %v320_v6 = vld [vmem:[#allocation2 + $0x4] sm:$0x1] }
 0x115   : > { %v930_v18 = vmax.f32 %v870_v10, 0.0  ;;  %v999_v10 = vsel %vm991_vm5, 0.0, %v988_v0 }
 0x117   : > { %v6539_v21 = vmax.f32 %v929_v17, %v930_v18  ;;  %v6082_v17 = vld [vmem:[%s7853_s3 + $0x60] sm:$0xff] }
 0x118   : > { %v783_v23 = vpop.f32.mrf.mxu0  ;;  %1386 = vmatpush.bf16.msrb.mxu2 %v6082_v17 }
 0x119   : > { %v872_v24 = vpop.f32.mrf.mxu1  ;;  %v784_v38 = vadd.f32 %v6450_v16, %v783_v23  ;;  %v321_v23 = vsel %vm6527_vm4, 0, %v320_v6  ;;  %v6078_v6 = vld [vmem:[%s7853_s3 + $0x40] sm:$0xff] }
 0x11a   : > { %322 = vst [vmem:[#allocation2 + $0x4] sm:$0x1] %v321_v23  ;;  %v6147_v23 = vld [vmem:[%s7853_s3 + $0x228] sm:$0xff] }
 0x11b   : > { %v873_v51 = vadd.f32 %v872_v24, %v784_v38  ;;  %v6080_v38 = vld [vmem:[%s7853_s3 + $0x50] sm:$0xff] }
 0x11c   : > { %1387 = vmatpush.bf16.msrb.mxu2 %v6081_v27  ;;  %v1155_v27 = vld [vmem:[#allocation2] sm:$0xf] }
 0x11d   : > { %v931_v60 = vmax.f32 %v873_v51, 0.0 }
 0x120   : > { %v785_v43 = vpop.f32.mrf.mxu0  ;;  %1388 = vmatpush.bf16.msrb.mxu2 %v6080_v38  ;;  %v1107_v38 = vld [vmem:[#allocation2 + $0x8] sm:$0xf] }
 0x121   : > { %v874_v44 = vpop.f32.mrf.mxu1  ;;  %v786_v52 = vadd.f32 %v6450_v16, %v785_v43  ;;  %v1149_v43 = vld [vmem:[#allocation2 + $0x40] sm:$0xf] }
 0x123   : > { %v875_v56 = vadd.f32 %v874_v44, %v786_v52  ;;  %v1152_v44 = vld [vmem:[#allocation2 + $0x44] sm:$0x1] }
 0x125   : > { %v932_v62 = vmax.f32 %v875_v56, 0.0  ;;  %v6079_v56 = vld [vmem:[%s7853_s3 + $0x48] sm:$0xff] }
 0x126   : > { %1389 = vmatpush.bf16.msrb.mxu2 %v6079_v56 }
 0x127   : > { %v956_v47 = vmax.f32 %v931_v60, %v932_v62 }
 0x128   : > { %v788_v2 = vpop.f32.mrf.mxu0 }
 0x129   : > { %v877_v4 = vpop.f32.mrf.mxu1  ;;  %v972_v7 = vmax.f32 %v956_v47, %v930_v18  ;;  %v327_v18 = vsel %vm6527_vm4, 0, %v326_v15  ;;  %v789_v25 = vadd.f32 %v6450_v16, %v788_v2  ;;  %v6149_v47 = vld [vmem:[%s7853_s3 + $0x238] sm:$0xff] }
 0x12a   : > { %328 = vst [vmem:[#allocation2 + $0x14] sm:$0x1] %v327_v18  ;;  %2762 = vmatpush.bf16.msrb.mxu0 %v6149_v47  ;;  %1390 = vmatpush.bf16.msrb.mxu2 %v6078_v6 }
 0x12b   : > { %v1007_v19 = vmax.f32 %v972_v7, %v980_v53  ;;  %v878_v36 = vadd.f32 %v877_v4, %v789_v25  ;;  %v297_v4 = vld [vmem:[#allocation2 + $0x18] sm:$0x1] }
 0x12d   : > { %v1015_v24 = vmax.f32 %v1007_v19, %v999_v10  ;;  %v933_v53 = vmax.f32 %v878_v36, 0.0  ;;  %v298_v10 = vsel %vm6520_vm2, 0, %v297_v4  ;;  %v1194_v36 = vshll.u32 %v1155_v27, 16  ;;  %v300_v4 = vld [vmem:[#allocation2 + $0x20] sm:$0x1] }
 0x12e   : > { %299 = vst [vmem:[#allocation2 + $0x18] sm:$0x1] %v298_v10  ;;  %2763 = vmatpush.bf16.msrb.mxu0 %v6148_v33  ;;  %v301_v10 = vsel %vm6520_vm2, 0, %v300_v4 }
 0x12f   : > { %v1023_v28 = vpack.c.bf16 %v1015_v24, %v1015_v24  ;;  %302 = vst [vmem:[#allocation2 + $0x20] sm:$0x1] %v301_v10 }
 0x130   : > { %v790_v32 = vpop.f32.mrf.mxu0 }
 0x131   : > { %v879_v34 = vpop.f32.mrf.mxu1  ;;  %v1081_v35 = vshrl.u32 %v1023_v28, 16  ;;  %v791_v37 = vadd.f32 %v6450_v16, %v790_v32  ;;  %v1084_v40 = vshll.u32 %v1023_v28, 16 }
 0x132   : > { %2764 = vmatpush.bf16.msrb.mxu0 %v6147_v23 }
 0x133   : > { %v1083_v39 = vrot.slane %v1081_v35, 7  ;;  %v6605_v41 = vadd.f32 %v879_v34, %v791_v37  ;;  %v1191_v35 = vshrl.u32 %v1155_v27, 16  ;;  %v6146_v37 = vld [vmem:[%s7853_s3 + $0x220] sm:$0xff] }
 0x135   : > { %v1086_v51 = vor.u32 %v1084_v40, %v1083_v39  ;;  %v1087_v52 = vrot.slane %v1083_v39, 4  ;;  %v934_v54 = vmax.f32 %v6605_v41, 0.0  ;;  %v1110_v39 = vld [vmem:[#allocation2 + $0xc] sm:$0x1] }
 0x136   : > { %2765 = vmatpush.bf16.msrb.mxu0 %v6146_v37 }
 0x137   : > { %v1150_v59 = vsel %vm6608_vm7, %v1086_v51, %v1149_v43  ;;  %v1153_v60 = vsel %vm6520_vm2, %v1087_v52, %v1152_v44  ;;  %v957_v62 = vmax.f32 %v933_v53, %v934_v54 }
 0x138   : > { %1151 = vst [vmem:[#allocation2 + $0x40] sm:$0xf] %v1150_v59  ;;  %v793_v0 = vpop.f32.mrf.mxu0 }
 0x139   : > { %v882_v45 = vpop.f32.mrf.mxu1  ;;  %1154 = vst [vmem:[#allocation2 + $0x44] sm:$0x1] %v1153_v60  ;;  %v973_v2 = vmax.f32 %v957_v62, 0.0  ;;  %v794_v17 = vadd.f32 %v6450_v16, %v793_v0  ;;  %v1179_v60 = vld [vmem:[#allocation2 + $0x4] sm:$0x1]  ;;  %v1193_v62 = vrot.slane %v1191_v35, 4 }
 0x13a   : > { %v1196_v0 = vrot.slane %v1194_v36, 5  ;;  %v6143_v35 = vld [vmem:[%s7853_s3 + $0x208] sm:$0xff] }
 0x13b   : > { %v981_v7 = vrot.slane %v973_v2, 7  ;;  %v1000_v8 = vmax.f32 %v965_v1, %v973_v2  ;;  %v883_v24 = vadd.f32 %v882_v45, %v794_v17  ;;  %v6145_v45 = vld [vmem:[%s7853_s3 + $0x218] sm:$0xff]  ;;  %v1200_v1 = vshll.u32 %v1179_v60, 16  ;;  %v1513_v2 = vld [vmem:[#allocation2] sm:$0xe] }
 0x13c   : > { %2766 = vmatpush.bf16.msrb.mxu0 %v6145_v45  ;;  %v1197_v33 = vor.u32 %v1196_v0, %v1193_v62  ;;  %v5134_v17 = vrot.slane %v1513_v2, 9  ;;  %v6142_v2 = vld [vmem:[%s7853_s3 + $0x200] sm:$0xff] }
 0x13d   : > { %v992_v15 = vsel %vm991_vm5, 0.0, %v981_v7  ;;  %v935_v40 = vmax.f32 %v883_v24, 0.0 }
 0x13e   : > { %v1008_v19 = vmax.f32 %v1000_v8, %v992_v15  ;;  %v1542_v8 = vrot.slane %v1179_v60, 5  ;;  %v6144_v15 = vld [vmem:[%s7853_s3 + $0x210] sm:$0xff] }
 0x140   : > { %v1016_v20 = vpack.c.bf16 %v1008_v19, %v1008_v19  ;;  %v795_v18 = vpop.f32.mrf.mxu0  ;;  %2767 = vmatpush.bf16.msrb.mxu0 %v6144_v15  ;;  %v1543_v36 = vsel %vm6669_vm12, %v5134_v17, %v1542_v8  ;;  %v766_v17 = vadd.f32 %v6450_v16, %v6484_v12 }
 0x141   : > { %v884_v22 = vpop.f32.mrf.mxu1  ;;  %v796_v25 = vadd.f32 %v6450_v16, %v795_v18  ;;  %v1202_v18 = vrot.slane %v1200_v1, 5  ;;  %v1589_v4 = vunpack.c.l.b16 %v1543_v36  ;;  %v335_v36 = vld [vmem:[#allocation2 + $0x2c] sm:$0x1] }
 0x142   : > { %v1025_v28 = vshrl.u32 %v1016_v20, 16  ;;  %v1028_v34 = vshll.u32 %v1016_v20, 16  ;;  %v5088_v20 = vld [vmem:[#allocation2] sm:$0xf] }
 0x143   : > { %v6641_v31 = vadd.f32 %v884_v22, %v796_v25 }
 0x144   : > { %v1027_v32 = vrot.slane %v1025_v28, 7  ;;  %2768 = vmatpush.bf16.msrb.mxu0 %v6143_v35  ;;  %v303_v35 = vld [vmem:[#allocation2 + $0x28] sm:$0x1] }
 0x145   : > { %v936_v41 = vmax.f32 %v6641_v31, 0.0  ;;  %v336_v31 = vsel %vm6527_vm4, 0, %v335_v36  ;;  %v6093_v36 = vld [vmem:[%s7853_s3 + $0xb8] sm:$0xff] }
 0x146   : > { %v1030_v43 = vor.u32 %v1028_v34, %v1027_v32  ;;  %v1031_v44 = vrot.slane %v1027_v32, 4  ;;  %v1198_v34 = vrot.slane %v1197_v33, 4  ;;  %337 = vst [vmem:[#allocation2 + $0x2c] sm:$0x1] %v336_v31  ;;  %v338_v31 = vld [vmem:[#allocation2 + $0x34] sm:$0x1]  ;;  %1653 = vmatpush.bf16.msra.mxu2 %v6093_v36 }
 0x147   : > { %v958_v51 = vmax.f32 %v935_v40, %v936_v41 }
 0x148   : > { %v1108_v52 = vsel %vm6608_vm7, %v1030_v43, %v1107_v38  ;;  %v1111_v53 = vsel %vm6520_vm2, %v1031_v44, %v1110_v39  ;;  %v798_v56 = vpop.f32.mrf.mxu0  ;;  %v1203_v1 = vsel %vm6683_vm13, %v1198_v34, %v1202_v18  ;;  %2769 = vmatpush.bf16.msrb.mxu0 %v6142_v2 }
 0x149   : > { %v887_v59 = vpop.f32.mrf.mxu1  ;;  %1109 = vst [vmem:[#allocation2 + $0x8] sm:$0xf] %v1108_v52  ;;  %v974_v47 = vmax.f32 %v958_v51, %v934_v54  ;;  %v799_v14 = vadd.f32 %v6450_v16, %v798_v56  ;;  %v333_v54 = vsel %vm6527_vm4, 0, %v332_v5  ;;  %v1113_v5 = vld [vmem:[#allocation2 + $0x10] sm:$0xf] }
 0x14a   : > { %1112 = vst [vmem:[#allocation2 + $0xc] sm:$0x1] %v1111_v53 }
 0x14b   : > { %v982_v6 = vrot.slane %v974_v47, 7  ;;  %v1001_v7 = vmax.f32 %v6466_v55, %v974_v47  ;;  %334 = vst [vmem:[#allocation2 + $0x24] sm:$0x1] %v333_v54  ;;  %v888_v24 = vadd.f32 %v887_v59, %v799_v14 }
 0x14d   : > { %v993_v19 = vsel %vm991_vm5, 0.0, %v982_v6  ;;  %v1116_v6 = vld [vmem:[#allocation2 + $0x14] sm:$0x1] }
 0x14e   : > { %v1009_v55 = vmax.f32 %v1001_v7, %v993_v19  ;;  %v937_v7 = vmax.f32 %v888_v24, 0.0 }
 0x150   : > { %v1017_v23 = vpack.c.bf16 %v1009_v55, %v1009_v55  ;;  %v800_v25 = vpop.f32.mrf.mxu0  ;;  %v6066_v28 = vld [vmem:[#allocation2 + $0x4] sm:$0xf0] }
 0x151   : > { %v889_v27 = vpop.f32.mrf.mxu1  ;;  %v1156_v32 = vld [vmem:[#allocation2 + $0x8] sm:$0xf]  ;;  %v801_v37 = vadd.f32 %v6450_v16, %v800_v25  ;;  %v5089_v38 = vor.u32 %v6066_v28, %v5088_v20  ;;  %v1180_v39 = vld [vmem:[#allocation2 + $0xc] sm:$0x1] }
 0x152   : > { %v1205_v40 = vshrl.u32 %v1156_v32, 16  ;;  %v1208_v43 = vshll.u32 %v1156_v32, 16  ;;  %v1033_v44 = vshrl.u32 %v1017_v23, 16  ;;  %v1214_v51 = vshll.u32 %v1180_v39, 16  ;;  %v1514_v53 = vld [vmem:[#allocation2 + $0x8] sm:$0xe] }
 0x153   : > { %v1546_v52 = vrot.slane %v1180_v39, 5  ;;  %v6679_v56 = vadd.f32 %v889_v27, %v801_v37  ;;  %1492 = vmatmul.bf16.vlgmr.msrb.gmra.mxu3 %v5089_v38  ;;  %v5135_v0 = vrot.slane %v1514_v53, 9  ;;  %v1036_v47 = vshll.u32 %v1017_v23, 16 }
 0x154   : > { %v1207_v60 = vrot.slane %v1205_v40, 4  ;;  %v1210_v62 = vrot.slane %v1208_v43, 5  ;;  %v1035_v45 = vrot.slane %v1033_v44, 7  ;;  %v1216_v20 = vrot.slane %v1214_v51, 5 }
 0x155   : > { %v938_v8 = vmax.f32 %v6679_v56, 0.0  ;;  %v1547_v14 = vsel %vm6669_vm12, %v5135_v0, %v1546_v52  ;;  %v1319_v27 = vunpack.c.l.b16 %v1203_v1  ;;  %v6710_v37 = vadd.f32 %v6486_v13, %v766_v17 }
 0x156   : > { %v1211_v10 = vor.u32 %v1210_v62, %v1207_v60  ;;  %v1038_v33 = vor.u32 %v1036_v47, %v1035_v45  ;;  %v1039_v54 = vrot.slane %v1035_v45, 4  ;;  %v1590_v15 = vunpack.c.l.b16 %v1547_v14 }
 0x157   : > { %v959_v19 = vmax.f32 %v937_v7, %v938_v8  ;;  %v304_v40 = vsel %vm6520_vm2, 0, %v303_v35  ;;  %v924_v13 = vmax.f32 %v6710_v37, 0.0  ;;  %v923_v62 = vmax.f32 %v6482_v11, 0.0  ;;  %v1119_v7 = vld [vmem:[#allocation2 + $0x18] sm:$0xf] }
 0x158   : > { %v1212_v55 = vrot.slane %v1211_v10, 4  ;;  %v1114_v18 = vsel %vm6608_vm7, %v1038_v33, %v1113_v5  ;;  %v1117_v23 = vsel %vm6520_vm2, %v1039_v54, %v1116_v6  ;;  %v803_v24 = vpop.f32.mrf.mxu0  ;;  %v6703_v28 = vpack.c.b16 %v1590_v15, %v1589_v4  ;;  %305 = vst [vmem:[#allocation2 + $0x28] sm:$0x1] %v304_v40  ;;  %v1122_v10 = vld [vmem:[#allocation2 + $0x1c] sm:$0x1] }
 0x159   : > { %v892_v25 = vpop.f32.mrf.mxu1  ;;  %1115 = vst [vmem:[#allocation2 + $0x10] sm:$0xf] %v1114_v18  ;;  %v975_v12 = vmax.f32 %v959_v19, %v936_v41  ;;  %v804_v44 = vadd.f32 %v6450_v16, %v803_v24  ;;  %v952_v2 = vmax.f32 %v923_v62, %v924_v13  ;;  %v925_v18 = vmax.f32 %v6494_v26, 0.0 }
 0x15a   : > { %v1217_v32 = vsel %vm6683_vm13, %v1212_v55, %v1216_v20  ;;  %1118 = vst [vmem:[#allocation2 + $0x14] sm:$0x1] %v1117_v23 }
 0x15b   : > { %v1320_v34 = vunpack.c.l.b16 %v1217_v32  ;;  %v983_v38 = vrot.slane %v975_v12, 7  ;;  %v1002_v39 = vmax.f32 %v6479_v9, %v975_v12  ;;  %v771_v9 = vadd.f32 %v6450_v16, %v6496_v29 }
 0x15c   : > { %v893_v0 = vadd.f32 %v892_v25, %v804_v44  ;;  %v968_v20 = vmax.f32 %v952_v2, %v922_v3 }
 0x15d   : > { %v1327_v43 = vpack.c.b16 %v1320_v34, %v1319_v27  ;;  %v994_v41 = vsel %vm991_vm5, 0.0, %v983_v38  ;;  %v6730_v5 = vadd.f32 %v6498_v30, %v771_v9  ;;  %v306_v38 = vld [vmem:[#allocation2 + $0x30] sm:$0x1]  ;;  %v339_v9 = vsel %vm6527_vm4, 0, %v338_v31 }
 0x15e   : > { %v1010_v51 = vmax.f32 %v1002_v39, %v994_v41  ;;  %v939_v14 = vmax.f32 %v893_v0, 0.0  ;;  %v307_v44 = vsel %vm6520_vm2, 0, %v306_v38  ;;  %340 = vst [vmem:[#allocation2 + $0x34] sm:$0x1] %v339_v9 }
 0x15f   : > { %1391 = vmatmul.bf16.vlgmr.msrb.gmra.mxu2 %v1327_v43  ;;  %v926_v23 = vmax.f32 %v6730_v5, 0.0  ;;  %308 = vst [vmem:[#allocation2 + $0x30] sm:$0x1] %v307_v44  ;;  %v6099_v5 = vld [vmem:[%s7853_s3 + $0xc8] sm:$0xff] }
 0x160   : > { %v1018_v52 = vpack.c.bf16 %v1010_v51, %v1010_v51  ;;  %v805_v53 = vpop.f32.mrf.mxu0  ;;  %v1157_v1 = vld [vmem:[#allocation2 + $0x10] sm:$0xf] }
 0x161   : > { %v894_v60 = vpop.f32.mrf.mxu1  ;;  %v806_v45 = vadd.f32 %v6450_v16, %v805_v53  ;;  %v1219_v33 = vshrl.u32 %v1157_v1, 16  ;;  %v6733_v17 = vld [vmem:[#allocation2 + $0x14] sm:$0x1]  ;;  %v2625_v19 = vld [vmem:[#allocation2 + $0x10] sm:$0xe]  ;;  %v1222_v55 = vshll.u32 %v1157_v1, 16  ;;  %v953_v41 = vmax.f32 %v925_v18, %v926_v23 }
 0x162   : > { %v1041_v47 = vshrl.u32 %v1018_v52, 16  ;;  %v1044_v29 = vshll.u32 %v1018_v52, 16  ;;  %v5470_v3 = vrot.slane %v2625_v19, 9  ;;  %v2651_v32 = vrot.slane %v6733_v17, 5  ;;  %v6748_v26 = vld [vmem:[#allocation2 + $0x14] sm:$0x1] }
 0x163   : > { %v6727_v4 = vadd.f32 %v894_v60, %v806_v45  ;;  %v1221_v34 = vrot.slane %v1219_v33, 4  ;;  %v1224_v35 = vrot.slane %v1222_v55, 5  ;;  %v6753_v39 = vld [vmem:[#allocation2 + $0x10] sm:$0xe]  ;;  %v341_v52 = vld [vmem:[#allocation2 + $0x3c] sm:$0x1] }
 0x164   : > { %v1043_v6 = vrot.slane %v1041_v47, 7  ;;  %v2652_v60 = vsel %vm6669_vm12, %v5470_v3, %v2651_v32  ;;  %v5092_v0 = vld [vmem:[#allocation2 + $0x10] sm:$0xf]  ;;  %v1228_v1 = vshll.u32 %v6748_v26, 16  ;;  %v342_v2 = vsel %vm6527_vm4, 0, %v341_v52 }
 0x165   : > { %v940_v11 = vmax.f32 %v6727_v4, 0.0  ;;  %v1225_v45 = vor.u32 %v1224_v35, %v1221_v34  ;;  %v2698_v19 = vunpack.c.l.b16 %v2652_v60  ;;  %343 = vst [vmem:[#allocation2 + $0x3c] sm:$0x1] %v342_v2  ;;  %v6103_v4 = vld [vmem:[%s7853_s3 + $0xe8] sm:$0xff] }
 0x166   : > { %v1046_v54 = vor.u32 %v1044_v29, %v1043_v6  ;;  %v1047_v15 = vrot.slane %v1043_v6, 4  ;;  %v5136_v6 = vrot.slane %v6753_v39, 9  ;;  %v6774_v29 = vmax.f32 %v953_v41, %v924_v13  ;;  %v6105_v39 = vld [vmem:[%s7853_s3 + $0xf8] sm:$0xff] }
 0x167   : > { %v960_v30 = vmax.f32 %v939_v14, %v940_v11  ;;  %v1230_v9 = vrot.slane %v1228_v1, 5  ;;  %1787 = vmatpush.bf16.msra.mxu3 %v6105_v39  ;;  %v6090_v39 = vld [vmem:[%s7853_s3 + $0xa0] sm:$0xff] }
 0x168   : > { %v1120_v24 = vsel %vm6608_vm7, %v1046_v54, %v1119_v7  ;;  %v1123_v25 = vsel %vm6520_vm2, %v1047_v15, %v1122_v10  ;;  %v808_v27 = vpop.f32.mrf.mxu0  ;;  %v6778_v7 = vadd.f32 %v6450_v16, %v6515_v49  ;;  %v1226_v49 = vrot.slane %v1225_v45, 4 }
 0x169   : > { %v897_v12 = vpop.f32.mrf.mxu1  ;;  %1121 = vst [vmem:[#allocation2 + $0x18] sm:$0xf] %v1120_v24  ;;  %v976_v61 = vmax.f32 %v960_v30, %v938_v8  ;;  %v809_v56 = vadd.f32 %v6450_v16, %v808_v27  ;;  %v309_v8 = vld [vmem:[#allocation2 + $0x38] sm:$0x1] }
 0x16a   : > { %1124 = vst [vmem:[#allocation2 + $0x1c] sm:$0x1] %v1123_v25  ;;  %v310_v51 = vsel %vm6520_vm2, 0, %v309_v8  ;;  %v1231_v1 = vsel %vm6683_vm13, %v1226_v49, %v1230_v9  ;;  %v1131_v9 = vld [vmem:[#allocation2 + $0x28] sm:$0xf] }
 0x16b   : > { %v984_v40 = vrot.slane %v976_v61, 7  ;;  %v1003_v43 = vmax.f32 %v968_v20, %v976_v61  ;;  %311 = vst [vmem:[#allocation2 + $0x38] sm:$0x1] %v310_v51  ;;  %v898_v47 = vadd.f32 %v897_v12, %v809_v56  ;;  %v1550_v12 = vrot.slane %v6748_v26, 5  ;;  %v1125_v61 = vld [vmem:[#allocation2 + $0x20] sm:$0xf] }
 0x16c   : > { %v1128_v56 = vld [vmem:[#allocation2 + $0x24] sm:$0x1] }
 0x16d   : > { %v995_v53 = vsel %vm991_vm5, 0.0, %v984_v40  ;;  %v941_v3 = vmax.f32 %v898_v47, 0.0 }
 0x16e   : > { %v1011_v62 = vmax.f32 %v1003_v43, %v995_v53 }
 0x170   : > { %v1019_v10 = vpack.c.bf16 %v1011_v62, %v1011_v62  ;;  %v810_v14 = vpop.f32.mrf.mxu0  ;;  %v6067_v54 = vld [vmem:[#allocation2 + $0x14] sm:$0xf0] }
 0x171   : > { %v899_v33 = vpop.f32.mrf.mxu1  ;;  %v2626_v15 = vld [vmem:[#allocation2 + $0x18] sm:$0xe]  ;;  %v811_v20 = vadd.f32 %v6450_v16, %v810_v14  ;;  %v5093_v30 = vor.u32 %v6067_v54, %v5092_v0  ;;  %v6781_v18 = vld [vmem:[#allocation2 + $0x1c] sm:$0x1]  ;;  %v1551_v0 = vsel %vm6669_vm12, %v5136_v6, %v1550_v12  ;;  %v6104_v14 = vld [vmem:[%s7853_s3 + $0xf0] sm:$0xff] }
 0x172   : > { %v1158_v55 = vld [vmem:[#allocation2 + $0x18] sm:$0xf]  ;;  %v5471_v24 = vrot.slane %v2626_v15, 9  ;;  %v1182_v37 = vld [vmem:[#allocation2 + $0x1c] sm:$0x1]  ;;  %v1049_v25 = vshrl.u32 %v1019_v10, 16  ;;  %1788 = vmatpush.bf16.msra.mxu3 %v6104_v14 }
 0x173   : > { %v1233_v13 = vshrl.u32 %v1158_v55, 16  ;;  %v2655_v27 = vrot.slane %v6781_v18, 5  ;;  %v6785_v32 = vadd.f32 %v899_v33, %v811_v20  ;;  %1497 = vmatmul.bf16.gmra.mxu3 %v5093_v30  ;;  %v1236_v16 = vshll.u32 %v1158_v55, 16  ;;  %v1516_v40 = vld [vmem:[#allocation2 + $0x18] sm:$0xe]  ;;  %v6092_v55 = vld [vmem:[%s7853_s3 + $0xb0] sm:$0xff] }
 0x174   : > { %v1051_v35 = vrot.slane %v1049_v25, 7  ;;  %v1052_v36 = vshll.u32 %v1019_v10, 16  ;;  %v1554_v43 = vrot.slane %v1182_v37, 5  ;;  %v1242_v41 = vshll.u32 %v1182_v37, 16  ;;  %1654 = vmatpush.bf16.msra.mxu2 %v6092_v55  ;;  %v1143_v57 = vld [vmem:[#allocation2 + $0x38] sm:$0xf] }
 0x175   : > { %v1235_v34 = vrot.slane %v1233_v13, 4  ;;  %v2656_v38 = vsel %vm6669_vm12, %v5471_v24, %v2655_v27  ;;  %v942_v26 = vmax.f32 %v6785_v32, 0.0  ;;  %v1238_v31 = vrot.slane %v1236_v16, 5  ;;  %v6102_v16 = vld [vmem:[%s7853_s3 + $0xe0] sm:$0xff] }
 0x176   : > { %v2699_v8 = vunpack.c.l.b16 %v2656_v38  ;;  %v1054_v44 = vor.u32 %v1052_v36, %v1051_v35  ;;  %v1055_v51 = vrot.slane %v1051_v35, 4  ;;  %v5137_v52 = vrot.slane %v1516_v40, 9  ;;  %1789 = vmatpush.bf16.msra.mxu3 %v6103_v4  ;;  %v6088_v4 = vld [vmem:[%s7853_s3 + $0x90] sm:$0xff] }
 0x177   : > { %v961_v53 = vmax.f32 %v941_v3, %v942_v26  ;;  %v1239_v62 = vor.u32 %v1238_v31, %v1235_v34  ;;  %v1244_v15 = vrot.slane %v1242_v41, 5  ;;  %v1591_v20 = vunpack.c.l.b16 %v1551_v0 }
 0x178   : > { %v2706_v60 = vpack.c.b16 %v2699_v8, %v2698_v19  ;;  %v1126_v45 = vsel %vm6608_vm7, %v1054_v44, %v1125_v61  ;;  %v1129_v47 = vsel %vm6520_vm2, %v1055_v51, %v1128_v56  ;;  %v813_v2 = vpop.f32.mrf.mxu0  ;;  %v1555_v33 = vsel %vm6669_vm12, %v5137_v52, %v1554_v43  ;;  %v6091_v61 = vld [vmem:[%s7853_s3 + $0xa8] sm:$0xff]  ;;  %v6101_v8 = vld [vmem:[%s7853_s3 + $0xd8] sm:$0xff] }
 0x179   : > { %v902_v10 = vpop.f32.mrf.mxu1  ;;  %1127 = vst [vmem:[#allocation2 + $0x20] sm:$0xf] %v1126_v45  ;;  %v977_v6 = vmax.f32 %v961_v53, %v940_v11  ;;  %v1240_v54 = vrot.slane %v1239_v62, 4  ;;  %v1592_v19 = vunpack.c.l.b16 %v1555_v33  ;;  %v1321_v11 = vunpack.c.l.b16 %v1231_v1  ;;  %1655 = vmatpush.bf16.msra.mxu2 %v6091_v61  ;;  %v1134_v62 = vld [vmem:[#allocation2 + $0x2c] sm:$0x1] }
 0x17a   : > { %2770 = vmatmul.bf16.vlgmr.msrb.gmra.mxu0 %v2706_v60  ;;  %1130 = vst [vmem:[#allocation2 + $0x24] sm:$0x1] %v1129_v47  ;;  %v865_v27 = vadd.f32 %v6517_v50, %v6778_v7  ;;  %1790 = vmatpush.bf16.msra.mxu3 %v6102_v16  ;;  %v927_v31 = vmax.f32 %v6508_v46, 0.0  ;;  %v6089_v47 = vld [vmem:[%s7853_s3 + $0x98] sm:$0xff]  ;;  %v6100_v46 = vld [vmem:[%s7853_s3 + $0xd0] sm:$0xff] }
 0x17b   : > { %v985_v30 = vrot.slane %v977_v6, 7  ;;  %v1004_v24 = vmax.f32 %v6774_v29, %v977_v6  ;;  %v1245_v37 = vsel %vm6683_vm13, %v1240_v54, %v1244_v15  ;;  %v6819_v25 = vpack.c.b16 %v1592_v19, %v1591_v20  ;;  %v6285_v29 = vld [vmem:[%s7852_s2] ss:$0 sm:$0xff] }
 0x17c   : > { %v1322_v13 = vunpack.c.l.b16 %v1245_v37  ;;  %v814_v12 = vadd.f32 %v6285_v29, %v813_v2  ;;  %v928_v35 = vmax.f32 %v865_v27, 0.0 }
 0x17d   : > { %v996_v49 = vsel %vm991_vm5, 0.0, %v985_v30  ;;  %1656 = vmatpush.bf16.msra.mxu2 %v6090_v39 }
 0x17e   : > { %v1012_v3 = vmax.f32 %v1004_v24, %v996_v49  ;;  %v1328_v34 = vpack.c.b16 %v1322_v13, %v1321_v11  ;;  %v903_v36 = vadd.f32 %v902_v10, %v814_v12  ;;  %v954_v60 = vmax.f32 %v927_v31, %v928_v35  ;;  %1791 = vmatpush.bf16.msra.mxu3 %v6101_v8  ;;  %v1146_v8 = vld [vmem:[#allocation2 + $0x3c] sm:$0x1] }
 0x17f   : > { %v971_v1 = vmax.f32 %v6539_v21, %v928_v35 }
 0x180   : > { %v1020_v50 = vpack.c.bf16 %v1012_v3, %v1012_v3  ;;  %1396 = vmatmul.bf16.gmra.mxu2 %v1328_v34  ;;  %v815_v7 = vpop.f32.mrf.mxu0  ;;  %v1159_v40 = vld [vmem:[#allocation2 + $0x20] sm:$0xf]  ;;  %v943_v0 = vmax.f32 %v903_v36, 0.0  ;;  %v970_v24 = vmax.f32 %v954_v60, %v926_v23 }
 0x181   : > { %v816_v38 = vadd.f32 %v6285_v29, %v815_v7  ;;  %v904_v56 = vpop.f32.mrf.mxu1  ;;  %v1247_v52 = vshrl.u32 %v1159_v40, 16  ;;  %v1250_v53 = vshll.u32 %v1159_v40, 16  ;;  %v6849_v6 = vld [vmem:[#allocation2 + $0x24] sm:$0x1]  ;;  %v2627_v54 = vld [vmem:[#allocation2 + $0x20] sm:$0xe]  ;;  %1657 = vmatpush.bf16.msra.mxu2 %v6089_v47 }
 0x182   : > { %v1057_v43 = vshrl.u32 %v1020_v50, 16  ;;  %v1060_v51 = vshll.u32 %v1020_v50, 16  ;;  %v6855_v55 = vld [vmem:[#allocation2 + $0x24] sm:$0x1]  ;;  %v5472_v11 = vrot.slane %v2627_v54, 9  ;;  %v2659_v13 = vrot.slane %v6849_v6, 5  ;;  %1792 = vmatpush.bf16.msra.mxu3 %v6100_v46 }
 0x183   : > { %v905_v41 = vadd.f32 %v904_v56, %v816_v38  ;;  %v1249_v20 = vrot.slane %v1247_v52, 4  ;;  %v1252_v30 = vrot.slane %v1250_v53, 5  ;;  %v1256_v27 = vshll.u32 %v6855_v55, 16  ;;  %v1517_v12 = vld [vmem:[#allocation2 + $0x20] sm:$0xe]  ;;  %v6087_v52 = vld [vmem:[%s7853_s3 + $0x88] sm:$0xff] }
 0x184   : > { %v1059_v44 = vrot.slane %v1057_v43, 7  ;;  %v2660_v16 = vsel %vm6669_vm12, %v5472_v11, %v2659_v13  ;;  %v5096_v50 = vld [vmem:[#allocation2 + $0x20] sm:$0xf]  ;;  %v5138_v35 = vrot.slane %v1517_v12, 9  ;;  %v1558_v36 = vrot.slane %v6855_v55, 5 }
 0x185   : > { %v944_v45 = vmax.f32 %v905_v41, 0.0  ;;  %v1253_v29 = vor.u32 %v1252_v30, %v1249_v20  ;;  %1658 = vmatpush.bf16.msra.mxu2 %v6088_v4  ;;  %v6875_v7 = vrot.slane %v1256_v27, 5  ;;  %v1140_v30 = vld [vmem:[#allocation2 + $0x34] sm:$0x1] }
 0x186   : > { %v1062_v2 = vor.u32 %v1060_v51, %v1059_v44  ;;  %v1063_v10 = vrot.slane %v1059_v44, 4  ;;  %1793 = vmatpush.bf16.msra.mxu3 %v6099_v5  ;;  %v2700_v51 = vunpack.c.l.b16 %v2660_v16 }
 0x187   : > { %v962_v14 = vmax.f32 %v943_v0, %v944_v45  ;;  %v979_v33 = vmax.f32 %v6513_v48, %v944_v45  ;;  %v1254_v56 = vrot.slane %v1253_v29, 4 }
 0x188   : > { %v1132_v15 = vsel %vm6608_vm7, %v1062_v2, %v1131_v9  ;;  %v1135_v19 = vsel %vm6520_vm2, %v1063_v10, %v1134_v62 }
 0x189   : > { %1133 = vst [vmem:[#allocation2 + $0x28] sm:$0xf] %v1132_v15  ;;  %v978_v48 = vmax.f32 %v962_v14, %v942_v26  ;;  %v987_v21 = vrot.slane %v979_v33, 7  ;;  %v1006_v37 = vmax.f32 %v971_v1, %v979_v33  ;;  %1659 = vmatpush.bf16.msra.mxu2 %v6087_v52  ;;  %v6098_v1 = vld [vmem:[%s7853_s3 + $0xc0] sm:$0xff]  ;;  %v1259_v12 = vsel %vm6683_vm13, %v1254_v56, %v6875_v7 }
 0x18a   : > { %1136 = vst [vmem:[#allocation2 + $0x2c] sm:$0x1] %v1135_v19  ;;  %v6086_v14 = vld [vmem:[%s7853_s3 + $0x80] sm:$0xff]  ;;  %v1137_v19 = vld [vmem:[#allocation2 + $0x30] sm:$0xf]  ;;  %1794 = vmatpush.bf16.msra.mxu3 %v6098_v1 }
 0x18b   : > { %v986_v23 = vrot.slane %v978_v48, 7  ;;  %v998_v32 = vsel %vm991_vm5, 0.0, %v987_v21  ;;  %v1005_v26 = vmax.f32 %v970_v24, %v978_v48 }
 0x18c   : > { %v1014_v49 = vmax.f32 %v1006_v37, %v998_v32 }
 0x18d   : > { %v997_v61 = vsel %vm991_vm5, 0.0, %v986_v23  ;;  %1660 = vmatpush.bf16.msra.mxu2 %v6086_v14 }
 0x18e   : > { %v1013_v3 = vmax.f32 %v1005_v26, %v997_v61  ;;  %v1022_v34 = vpack.c.bf16 %v1014_v49, %v1014_v49  ;;  %v1559_v26 = vsel %vm6669_vm12, %v5138_v35, %v1558_v36  ;;  %v6907_v35 = vld [vmem:[#allocation2 + $0x10] sm:$0xf] }
 0x18f   : > { %v1593_v16 = vunpack.c.l.b16 %v1559_v26 }
 0x190   : > { %v1021_v38 = vpack.c.bf16 %v1013_v3, %v1013_v3  ;;  %v1073_v39 = vshrl.u32 %v1022_v34, 16  ;;  %v6068_v40 = vld [vmem:[#allocation2 + $0x24] sm:$0xf0]  ;;  %v1076_v62 = vshll.u32 %v1022_v34, 16 }
 0x191   : > { %v2628_v43 = vld [vmem:[#allocation2 + $0x28] sm:$0xe]  ;;  %v5097_v31 = vor.u32 %v6068_v40, %v5096_v50  ;;  %v6878_v41 = vld [vmem:[#allocation2 + $0x2c] sm:$0x1] }
 0x192   : > { %v5473_v44 = vrot.slane %v2628_v43, 9  ;;  %v1160_v9 = vld [vmem:[#allocation2 + $0x28] sm:$0xf]  ;;  %v1065_v53 = vshrl.u32 %v1021_v38, 16  ;;  %v1075_v60 = vrot.slane %v1073_v39, 7  ;;  %v2663_v0 = vrot.slane %v6878_v41, 5 }
 0x193   : > { %v1184_v45 = vld [vmem:[#allocation2 + $0x2c] sm:$0x1]  ;;  %v1068_v47 = vshll.u32 %v1021_v38, 16  ;;  %1502 = vmatmul.bf16.gmra.mxu3 %v5097_v31  ;;  %v1261_v2 = vshrl.u32 %v1160_v9, 16  ;;  %v1264_v10 = vshll.u32 %v1160_v9, 16  ;;  %v1323_v38 = vunpack.c.l.b16 %v1259_v12 }
 0x194   : > { %v1270_v46 = vshll.u32 %v1184_v45, 16  ;;  %v1067_v33 = vrot.slane %v1065_v53, 7  ;;  %v1078_v54 = vor.u32 %v1076_v62, %v1075_v60  ;;  %v1079_v15 = vrot.slane %v1075_v60, 4  ;;  %v1518_v20 = vld [vmem:[#allocation2 + $0x28] sm:$0xe] }
 0x195   : > { %v2664_v55 = vsel %vm6669_vm12, %v5473_v44, %v2663_v0  ;;  %v1263_v48 = vrot.slane %v1261_v2, 4  ;;  %v1266_v21 = vrot.slane %v1264_v10, 5  ;;  %v1562_v37 = vrot.slane %v1184_v45, 5  ;;  %v6940_v12 = vld [vmem:[#allocation2 + $0x4c] sm:$0x1] }
 0x196   : > { %v2701_v24 = vunpack.c.l.b16 %v2664_v55  ;;  %v1070_v4 = vor.u32 %v1068_v47, %v1067_v33  ;;  %v1071_v11 = vrot.slane %v1067_v33, 4  ;;  %v1144_v13 = vsel %vm6608_vm7, %v1078_v54, %v1143_v57 }
 0x197   : > { %v1147_v5 = vsel %vm6520_vm2, %v1079_v15, %v1146_v8  ;;  %1145 = vst [vmem:[#allocation2 + $0x38] sm:$0xf] %v1144_v13  ;;  %v1267_v32 = vor.u32 %v1266_v21, %v1263_v48  ;;  %v5139_v27 = vrot.slane %v1518_v20, 9  ;;  %v1272_v3 = vrot.slane %v1270_v46, 5  ;;  %v6113_v15 = vld [vmem:[%s7853_s3 + $0x138] sm:$0xff] }
 0x198   : > { %v2707_v23 = vpack.c.b16 %v2701_v24, %v2700_v51  ;;  %v1138_v49 = vsel %vm6608_vm7, %v1070_v4, %v1137_v19  ;;  %v1141_v29 = vsel %vm6520_vm2, %v1071_v11, %v1140_v30  ;;  %1148 = vst [vmem:[#allocation2 + $0x3c] sm:$0x1] %v1147_v5  ;;  %v2396_v43 = vshrl.u32 %v6907_v35, 16  ;;  %v6121_v20 = vld [vmem:[%s7853_s3 + $0x178] sm:$0xff]  ;;  %v2632_v4 = vld [vmem:[#allocation2 + $0x48] sm:$0xe]  ;;  %2033 = vmatpush.bf16.msrb.mxu2 %v6113_v15 }
 0x199   : > { %1139 = vst [vmem:[#allocation2 + $0x30] sm:$0xf] %v1138_v49  ;;  %v1268_v61 = vrot.slane %v1267_v32, 4  ;;  %v1563_v34 = vsel %vm6669_vm12, %v5139_v27, %v1562_v37  ;;  %v2399_v30 = vshll.u32 %v6907_v35, 16  ;;  %v6112_v11 = vld [vmem:[%s7853_s3 + $0x130] sm:$0xff]  ;;  %2207 = vmatpush.bf16.msrb.mxu3 %v6121_v20  ;;  %v2405_v15 = vshll.u32 %v6733_v17, 16 }
 0x19a   : > { %2775 = vmatmul.bf16.gmra.mxu0 %v2707_v23  ;;  %1142 = vst [vmem:[#allocation2 + $0x34] sm:$0x1] %v1141_v29  ;;  %v1594_v50 = vunpack.c.l.b16 %v1563_v34  ;;  %v6120_v32 = vld [vmem:[%s7853_s3 + $0x170] sm:$0xff]  ;;  %v6119_v17 = vld [vmem:[%s7853_s3 + $0x168] sm:$0xff] }
 0x19b   : > { %v1273_v36 = vsel %vm6683_vm13, %v1268_v61, %v1272_v3  ;;  %v2398_v3 = vrot.slane %v2396_v43, 4  ;;  %v2679_v43 = vrot.slane %v6940_v12, 5 }
 0x19c   : > { %v1324_v39 = vunpack.c.l.b16 %v1273_v36  ;;  %v6911_v40 = vpack.c.b16 %v1594_v50, %v1593_v16  ;;  %v2631_v50 = vld [vmem:[#allocation2 + $0x40] sm:$0xe]  ;;  %2034 = vmatpush.bf16.msrb.mxu2 %v6112_v11 }
 0x19d   : > { %2208 = vmatpush.bf16.msrb.mxu3 %v6120_v32 }
 0x19e   : > { %v1329_v7 = vpack.c.b16 %v1324_v39, %v1323_v38  ;;  %v6069_v56 = vld [vmem:[#allocation2 + $0x34] sm:$0xf0] }
 0x19f   : > { %v2630_v57 = vld [vmem:[#allocation2 + $0x38] sm:$0xe]  ;;  %v6914_v31 = vld [vmem:[#allocation2 + $0x3c] sm:$0x1] }
 0x1a0   : > { %v1162_v8 = vld [vmem:[#allocation2 + $0x38] sm:$0xf]  ;;  %v5475_v44 = vrot.slane %v2630_v57, 9  ;;  %v6916_v51 = vld [vmem:[#allocation2 + $0x3c] sm:$0x1]  ;;  %1401 = vmatmul.bf16.gmra.mxu2 %v1329_v7  ;;  %v2671_v60 = vrot.slane %v6914_v31, 5 }
 0x1a1   : > { %v1289_v9 = vshrl.u32 %v1162_v8, 16  ;;  %v5100_v52 = vld [vmem:[#allocation2 + $0x30] sm:$0xf]  ;;  %v1292_v62 = vshll.u32 %v1162_v8, 16  ;;  %v6919_v45 = vld [vmem:[#allocation2 + $0x34] sm:$0x1]  ;;  %2209 = vmatpush.bf16.msrb.mxu3 %v6119_v17 }
 0x1a2   : > { %v2629_v53 = vld [vmem:[#allocation2 + $0x30] sm:$0xe]  ;;  %v5101_v0 = vor.u32 %v6069_v56, %v5100_v52  ;;  %v2667_v46 = vrot.slane %v6919_v45, 5  ;;  %v2672_v1 = vsel %vm6669_vm12, %v5475_v44, %v2671_v60  ;;  %v1185_v14 = vld [vmem:[#allocation2 + $0x34] sm:$0x1]  ;;  %v1298_v55 = vshll.u32 %v6916_v51, 16 }
 0x1a3   : > { %v5474_v47 = vrot.slane %v2629_v53, 9  ;;  %v1161_v2 = vld [vmem:[#allocation2 + $0x30] sm:$0xf]  ;;  %v1291_v10 = vrot.slane %v1289_v9, 4  ;;  %v1294_v19 = vrot.slane %v1292_v62, 5  ;;  %v1284_v37 = vshll.u32 %v1185_v14, 16 }
 0x1a4   : > { %v1275_v33 = vshrl.u32 %v1161_v2, 16  ;;  %v1278_v54 = vshll.u32 %v1161_v2, 16  ;;  %1507 = vmatmul.bf16.gmra.mxu3 %v5101_v0  ;;  %v2703_v5 = vunpack.c.l.b16 %v2672_v1  ;;  %v1519_v26 = vld [vmem:[#allocation2 + $0x30] sm:$0xe]  ;;  %v1520_v27 = vld [vmem:[#allocation2 + $0x38] sm:$0xe] }
 0x1a5   : > { %v2668_v24 = vsel %vm6669_vm12, %v5474_v47, %v2667_v46  ;;  %v1295_v23 = vor.u32 %v1294_v19, %v1291_v10  ;;  %v1300_v29 = vrot.slane %v1298_v55, 5  ;;  %v5140_v61 = vrot.slane %v1519_v26, 9  ;;  %v6942_v7 = vld [vmem:[#allocation2 + $0x44] sm:$0x1]  ;;  %v2381_v52 = vld [vmem:[#allocation2 + $0x18] sm:$0xf] }
 0x1a6   : > { %v1277_v48 = vrot.slane %v1275_v33, 4  ;;  %v1280_v21 = vrot.slane %v1278_v54, 5  ;;  %v2702_v13 = vunpack.c.l.b16 %v2668_v24  ;;  %v1566_v35 = vrot.slane %v1185_v14, 5  ;;  %v6094_v19 = vld [vmem:[#allocation2 + $0xc] sm:$0xf0] }
 0x1a7   : > { %v1296_v16 = vrot.slane %v1295_v23, 4  ;;  %v5141_v36 = vrot.slane %v1520_v27, 9  ;;  %v1286_v39 = vrot.slane %v1284_v37, 5  ;;  %v1570_v56 = vrot.slane %v6916_v51, 5  ;;  %v5208_v55 = vld [vmem:[#allocation2 + $0x8] sm:$0xf] }
 0x1a8   : > { %v1281_v49 = vor.u32 %v1280_v21, %v1277_v48  ;;  %v2708_v34 = vpack.c.b16 %v2703_v5, %v2702_v13  ;;  %v2401_v57 = vrot.slane %v2399_v30, 5  ;;  %v5477_v44 = vrot.slane %v2632_v4, 9  ;;  %v2383_v24 = vld [vmem:[#allocation2 + $0x20] sm:$0xf]  ;;  %v6111_v21 = vld [vmem:[%s7853_s3 + $0x128] sm:$0xff] }
 0x1a9   : > { %v1301_v8 = vsel %vm6683_vm13, %v1296_v16, %v1300_v29  ;;  %v1567_v9 = vsel %vm6669_vm12, %v5140_v61, %v1566_v35  ;;  %v5476_v60 = vrot.slane %v2631_v50, 9  ;;  %v1571_v51 = vsel %vm6669_vm12, %v5141_v36, %v1570_v56  ;;  %2035 = vmatpush.bf16.msrb.mxu2 %v6111_v21  ;;  %v315_v26 = vld [vmem:[#allocation2 + $0x48] sm:$0x1]  ;;  %v6110_v35 = vld [vmem:[%s7853_s3 + $0x120] sm:$0xff] }
 0x1aa   : > { %v1282_v38 = vrot.slane %v1281_v49, 4  ;;  %2780 = vmatmul.bf16.gmra.mxu0 %v2708_v34  ;;  %v1595_v62 = vunpack.c.l.b16 %v1567_v9  ;;  %v1326_v47 = vunpack.c.l.b16 %v1301_v8  ;;  %v2675_v2 = vrot.slane %v6942_v7, 5  ;;  %v6118_v36 = vld [vmem:[%s7853_s3 + $0x160] sm:$0xff] }
 0x1ab   : > { %v1596_v10 = vunpack.c.l.b16 %v1571_v51  ;;  %v2402_v46 = vor.u32 %v2401_v57, %v2398_v3  ;;  %v2410_v1 = vshrl.u32 %v2381_v52, 16  ;;  %v2413_v14 = vshll.u32 %v2381_v52, 16  ;;  %2210 = vmatpush.bf16.msrb.mxu3 %v6118_v36 }
 0x1ac   : > { %v1287_v53 = vsel %vm6683_vm13, %v1282_v38, %v1286_v39  ;;  %v2676_v20 = vsel %vm6669_vm12, %v5476_v60, %v2675_v2  ;;  %v2680_v30 = vsel %vm6669_vm12, %v5477_v44, %v2679_v43  ;;  %v2419_v48 = vshll.u32 %v6781_v18, 16  ;;  %v2385_v43 = vld [vmem:[#allocation2 + $0x28] sm:$0xf] }
 0x1ad   : > { %v1325_v0 = vunpack.c.l.b16 %v1287_v53  ;;  %v6955_v54 = vpack.c.b16 %v1596_v10, %v1595_v62  ;;  %v2403_v37 = vrot.slane %v2402_v46, 4  ;;  %v2412_v4 = vrot.slane %v2410_v1, 4  ;;  %2036 = vmatpush.bf16.msrb.mxu2 %v6110_v35  ;;  %v5212_v46 = vld [vmem:[#allocation2 + $0x18] sm:$0xf] }
 0x1ae   : > { %v2415_v11 = vrot.slane %v2413_v14, 5  ;;  %v5209_v13 = vor.u32 %v6094_v19, %v5208_v55  ;;  %v2407_v5 = vrot.slane %v2405_v15, 5  ;;  %v2424_v32 = vshrl.u32 %v2383_v24, 16  ;;  %v6109_v1 = vld [vmem:[%s7853_s3 + $0x118] sm:$0xff]  ;;  %v6108_v19 = vld [vmem:[%s7853_s3 + $0x110] sm:$0xff] }
 0x1af   : > { %v1330_v33 = vpack.c.b16 %v1326_v47, %v1325_v0  ;;  %v2704_v18 = vunpack.c.l.b16 %v2676_v20  ;;  %v2705_v27 = vunpack.c.l.b16 %v2680_v30  ;;  %v2427_v49 = vshll.u32 %v2383_v24, 16  ;;  %v6095_v47 = vld [vmem:[#allocation2 + $0x1c] sm:$0xf0]  ;;  %v6116_v55 = vld [vmem:[%s7853_s3 + $0x150] sm:$0xff] }
 0x1b0   : > { %v2416_v23 = vor.u32 %v2415_v11, %v2412_v4  ;;  %v2421_v29 = vrot.slane %v2419_v48, 5  ;;  %v2408_v61 = vsel %vm6683_vm13, %v2403_v37, %v2407_v5  ;;  %v2426_v34 = vrot.slane %v2424_v32, 4  ;;  %v2389_v48 = vld [vmem:[#allocation2 + $0x38] sm:$0xf]  ;;  %v2387_v37 = vld [vmem:[#allocation2 + $0x30] sm:$0xf] }
 0x1b1   : > { %1406 = vmatmul.bf16.gmra.mxu2 %v1330_v33  ;;  %v2429_v16 = vrot.slane %v2427_v49, 5  ;;  %v316_v50 = vsel %vm6520_vm2, 0, %v315_v26  ;;  %v2709_v39 = vpack.c.b16 %v2705_v27, %v2704_v18  ;;  %v6981_v56 = vunpack.c.l.b16 %v2408_v61  ;;  %v6115_v4 = vld [vmem:[%s7853_s3 + $0x148] sm:$0xff] }
 0x1b2   : > { %v2417_v3 = vrot.slane %v2416_v23, 4  ;;  %317 = vst [vmem:[#allocation2 + $0x48] sm:$0x1] %v316_v50  ;;  %v2433_v9 = vshll.u32 %v6849_v6, 16  ;;  %v2438_v52 = vshrl.u32 %v2385_v43, 16  ;;  %v2441_v53 = vshll.u32 %v2385_v43, 16  ;;  %2037 = vmatpush.bf16.msrb.mxu2 %v6109_v1 }
 0x1b3   : > { %v2430_v8 = vor.u32 %v2429_v16, %v2426_v34  ;;  %v2447_v0 = vshll.u32 %v6878_v41, 16  ;;  %v6117_v6 = vld [vmem:[%s7853_s3 + $0x158] sm:$0xff]  ;;  %v5213_v41 = vor.u32 %v6095_v47, %v5212_v46  ;;  %v2466_v21 = vshrl.u32 %v2389_v48, 16  ;;  %v5216_v16 = vld [vmem:[#allocation2 + $0x28] sm:$0xf]  ;;  %v6132_v1 = vld [vmem:[%s7853_s3 + $0x1b0] sm:$0xff] }
 0x1b4   : > { %1795 = vmatmul.bf16.vlgmr.msra.gmra.mxu3 %v5209_v13  ;;  %v2422_v38 = vsel %vm6683_vm13, %v2417_v3, %v2421_v29  ;;  %v2440_v51 = vrot.slane %v2438_v52, 4  ;;  %v2443_v62 = vrot.slane %v2441_v53, 5  ;;  %v2435_v2 = vrot.slane %v2433_v9, 5  ;;  %v6096_v29 = vld [vmem:[#allocation2 + $0x2c] sm:$0xf0]  ;;  %v6107_v50 = vld [vmem:[%s7853_s3 + $0x108] sm:$0xff] }
 0x1b5   : > { %v6983_v57 = vunpack.c.l.b16 %v2422_v38  ;;  %v2431_v60 = vrot.slane %v2430_v8, 4  ;;  %v2449_v15 = vrot.slane %v2447_v0, 5  ;;  %2211 = vmatpush.bf16.msrb.mxu3 %v6117_v6  ;;  %v2469_v17 = vshll.u32 %v2389_v48, 16  ;;  %v6106_v9 = vld [vmem:[%s7853_s3 + $0x100] sm:$0xff]  ;;  %v5220_v52 = vld [vmem:[#allocation2 + $0x38] sm:$0xf] }
 0x1b6   : > { %v2444_v10 = vor.u32 %v2443_v62, %v2440_v51  ;;  %2038 = vmatpush.bf16.msrb.mxu2 %v6108_v19  ;;  %v2452_v11 = vshrl.u32 %v2387_v37, 16  ;;  %v2455_v13 = vshll.u32 %v2387_v37, 16  ;;  %v2468_v5 = vrot.slane %v2466_v21, 4  ;;  %v6097_v53 = vld [vmem:[#allocation2 + $0x3c] sm:$0xf0]  ;;  %v6141_v51 = vld [vmem:[%s7853_s3 + $0x1f8] sm:$0xff] }
 0x1b7   : > { %v2532_v44 = vpack.c.b16 %v6983_v57, %v6981_v56  ;;  %v2436_v14 = vsel %vm6683_vm13, %v2431_v60, %v2435_v2  ;;  %v2471_v23 = vrot.slane %v2469_v17, 5  ;;  %v2475_v32 = vshll.u32 %v6914_v31, 16  ;;  %v6114_v31 = vld [vmem:[%s7853_s3 + $0x140] sm:$0xff]  ;;  %v6133_v60 = vld [vmem:[%s7853_s3 + $0x1b8] sm:$0xff]  ;;  %v2071_v46 = vld [vmem:[#allocation2 + $0x10] sm:$0xe] }
 0x1b8   : > { %v2445_v33 = vrot.slane %v2444_v10, 4  ;;  %v7006_v20 = vunpack.c.l.b16 %v2436_v14  ;;  %v2454_v26 = vrot.slane %v2452_v11, 4  ;;  %v2457_v18 = vrot.slane %v2455_v13, 5  ;;  %v1827_v10 = vld [vmem:[#allocation2 + $0x14] sm:$0x1] }
 0x1b9   : > { %2212 = vmatpush.bf16.msrb.mxu3 %v6116_v55  ;;  %v2461_v27 = vshll.u32 %v6919_v45, 16  ;;  %v2472_v49 = vor.u32 %v2471_v23, %v2468_v5  ;;  %v2477_v34 = vrot.slane %v2475_v32, 5  ;;  %v5217_v38 = vor.u32 %v6096_v29, %v5216_v16  ;;  %v6140_v6 = vld [vmem:[%s7853_s3 + $0x1f0] sm:$0xff]  ;;  %v1825_v14 = vld [vmem:[#allocation2 + $0xc] sm:$0x1]  ;;  %v6169_v23 = vld [vmem:[%s7855_s5 + $0x78] sm:$0xff] }
 0x1ba   : > { %2785 = vmatmul.bf16.gmra.mxu0 %v2709_v39  ;;  %v2458_v61 = vor.u32 %v2457_v18, %v2454_v26  ;;  %2039 = vmatpush.bf16.msrb.mxu2 %v6107_v50  ;;  %v5221_v47 = vor.u32 %v6097_v53, %v5220_v52  ;;  %v2096_v21 = vrot.slane %v1825_v14, 5  ;;  %v6131_v29 = vld [vmem:[%s7853_s3 + $0x1a8] sm:$0xff]  ;;  %v1864_v16 = vshll.u32 %v1827_v10, 16  ;;  %v1828_v52 = vld [vmem:[#allocation2 + $0x18] sm:$0xf] }
 0x1bb   : > { %v2473_v3 = vrot.slane %v2472_v49, 4  ;;  %v2463_v36 = vrot.slane %v2461_v27, 5  ;;  %3181 = vmatpush.bf16.msrb.mxu1 %v6169_v23  ;;  %v1850_v50 = vshll.u32 %v1825_v14, 16  ;;  %v1872_v14 = vshll.u32 %v1828_v52, 16 }
 0x1bc   : > { %v2459_v35 = vrot.slane %v2458_v61, 4  ;;  %v6139_v61 = vld [vmem:[%s7853_s3 + $0x1e8] sm:$0xff] }
 0x1bd   : > { %2213 = vmatpush.bf16.msrb.mxu3 %v6115_v4  ;;  %v2478_v45 = vsel %vm6683_vm13, %v2473_v3, %v2477_v34 }
 0x1be   : > { %v7030_v8 = vunpack.c.l.b16 %v2478_v45  ;;  %2040 = vmatpush.bf16.msrb.mxu2 %v6106_v9  ;;  %v2072_v9 = vld [vmem:[#allocation2 + $0x18] sm:$0xe] }
 0x1c1   : > { %1661 = vmatmul.bf16.vlgmr.msra.gmra.mxu2 %v6703_v28  ;;  %v2450_v28 = vsel %vm6683_vm13, %v2445_v33, %v2449_v15  ;;  %2214 = vmatpush.bf16.msrb.mxu3 %v6114_v31  ;;  %v2070_v33 = vld [vmem:[#allocation2 + $0x8] sm:$0xe]  ;;  %v5303_v15 = vrot.slane %v2071_v46, 9 }
 0x1c2   : > { %v7008_v30 = vunpack.c.l.b16 %v2450_v28  ;;  %2342 = vmatpush.bf16.msra.mxu2 %v6133_v60  ;;  %v1824_v28 = vld [vmem:[#allocation2 + $0x8] sm:$0xf]  ;;  %v5302_v48 = vrot.slane %v2070_v33, 9 }
 0x1c3   : > { %v1841_v17 = vshrl.u32 %v1824_v28, 16  ;;  %v1844_v37 = vshll.u32 %v1824_v28, 16 }
 0x1c4   : > { %1800 = vmatmul.bf16.gmra.mxu3 %v5213_v41  ;;  %v2533_v24 = vpack.c.b16 %v7008_v30, %v7006_v20  ;;  %v2100_v41 = vrot.slane %v1827_v10, 5  ;;  %v2097_v5 = vsel %vm6669_vm12, %v5302_v48, %v2096_v21 }
 0x1c5   : > { %2588 = vmatpush.bf16.msra.mxu3 %v6141_v51  ;;  %v1843_v26 = vrot.slane %v1841_v17, 4  ;;  %v1846_v18 = vrot.slane %v1844_v37, 5  ;;  %v2143_v27 = vunpack.c.l.b16 %v2097_v5  ;;  %v6130_v51 = vld [vmem:[%s7853_s3 + $0x1a0] sm:$0xff] }
 0x1c6   : > { %2343 = vmatpush.bf16.msra.mxu2 %v6132_v1  ;;  %v2101_v4 = vsel %vm6669_vm12, %v5303_v15, %v2100_v41 }
 0x1c7   : > { %v2144_v32 = vunpack.c.l.b16 %v2101_v4  ;;  %v1847_v34 = vor.u32 %v1846_v18, %v1843_v26  ;;  %v1874_v4 = vrot.slane %v1872_v14, 5  ;;  %v6129_v18 = vld [vmem:[%s7853_s3 + $0x198] sm:$0xff] }
 0x1c9   : > { %2589 = vmatpush.bf16.msra.mxu3 %v6140_v6  ;;  %v2151_v3 = vpack.c.b16 %v2144_v32, %v2143_v27  ;;  %v1848_v45 = vrot.slane %v1847_v34, 4  ;;  %v1869_v6 = vshrl.u32 %v1828_v52, 16  ;;  %v6137_v27 = vld [vmem:[%s7853_s3 + $0x1d8] sm:$0xff] }
 0x1ca   : > { %2344 = vmatpush.bf16.msra.mxu2 %v6131_v29 }
 0x1cb   : > { %v1871_v37 = vrot.slane %v1869_v6, 4 }
 0x1cd   : > { %2590 = vmatpush.bf16.msra.mxu3 %v6139_v61  ;;  %v1875_v32 = vor.u32 %v1874_v4, %v1871_v37 }
 0x1ce   : > { %2345 = vmatpush.bf16.msra.mxu2 %v6130_v51  ;;  %v6136_v51 = vld [vmem:[%s7853_s3 + $0x1d0] sm:$0xff] }
 0x1d1   : > { %1666 = vmatmul.bf16.gmra.mxu2 %v6819_v25  ;;  %v2464_v25 = vsel %vm6683_vm13, %v2459_v35, %v2463_v36  ;;  %v1831_v35 = vld [vmem:[#allocation2 + $0x24] sm:$0x1]  ;;  %v2073_v36 = vld [vmem:[#allocation2 + $0x20] sm:$0xe] }
 0x1d2   : > { %v7028_v39 = vunpack.c.l.b16 %v2464_v25  ;;  %v1866_v25 = vrot.slane %v1864_v16, 5  ;;  %v5305_v53 = vrot.slane %v2073_v36, 9  ;;  %v2108_v60 = vrot.slane %v1831_v35, 5  ;;  %2346 = vmatpush.bf16.msra.mxu2 %v6129_v18  ;;  %v1835_v16 = vld [vmem:[#allocation2 + $0x34] sm:$0x1]  ;;  %v6134_v18 = vld [vmem:[%s7853_s3 + $0x1c0] sm:$0xff] }
 0x1d3   : > { %v1892_v26 = vshll.u32 %v1831_v35, 16  ;;  %v1876_v35 = vrot.slane %v1875_v32, 4 }
 0x1d4   : > { %1805 = vmatmul.bf16.gmra.mxu3 %v5217_v38  ;;  %v2534_v43 = vpack.c.b16 %v7030_v8, %v7028_v39  ;;  %v1829_v38 = vld [vmem:[#allocation2 + $0x1c] sm:$0x1]  ;;  %v2109_v41 = vsel %vm6669_vm12, %v5305_v53, %v2108_v60  ;;  %v2116_v53 = vrot.slane %v1835_v16, 5  ;;  %v6128_v60 = vld [vmem:[%s7853_s3 + $0x190] sm:$0xff]  ;;  %v6124_v8 = vld [vmem:[#allocation2 + $0x34] sm:$0xf0] }
 0x1d5   : > { %v2104_v1 = vrot.slane %v1829_v38, 5  ;;  %v1894_v36 = vrot.slane %v1892_v26, 5  ;;  %v6127_v26 = vld [vmem:[%s7853_s3 + $0x188] sm:$0xff]  ;;  %v6165_v39 = vld [vmem:[%s7855_s5 + $0x58] sm:$0xff] }
 0x1d6   : > { %v1493_v62 = vpop.f32.mrf.mxu3  ;;  %2347 = vmatpush.bf16.msra.mxu2 %v6128_v60 }
 0x1da   : > { %2348 = vmatpush.bf16.msra.mxu2 %v6127_v26 }
 0x1de   : > { %v7078_v28 = vpop.f32.mrf.mxu3 }
 0x1e1   : > { %1671 = vmatmul.bf16.gmra.mxu2 %v6911_v40  ;;  %v1826_v40 = vld [vmem:[#allocation2 + $0x10] sm:$0xf] }
 0x1e2   : > { %v1392_v0 = vpop.f32.mrf.mxu2  ;;  %v1855_v19 = vshrl.u32 %v1826_v40, 16  ;;  %v1858_v55 = vshll.u32 %v1826_v40, 16  ;;  %v5304_v40 = vrot.slane %v2072_v9, 9  ;;  %v1832_v9 = vld [vmem:[#allocation2 + $0x28] sm:$0xf] }
 0x1e3   : > { %v7044_v2 = vadd.f32 %v1493_v62, %v1392_v0  ;;  %v6138_v62 = vld [vmem:[%s7853_s3 + $0x1e0] sm:$0xff]  ;;  %v1852_v0 = vrot.slane %v1850_v50, 5  ;;  %v2075_v50 = vld [vmem:[#allocation2 + $0x30] sm:$0xe]  ;;  %v1897_v6 = vshrl.u32 %v1832_v9, 16  ;;  %v1900_v14 = vshll.u32 %v1832_v9, 16 }
 0x1e4   : > { %1810 = vmatmul.bf16.gmra.mxu3 %v5221_v47  ;;  %v1857_v11 = vrot.slane %v1855_v19, 4  ;;  %v1860_v13 = vrot.slane %v1858_v55, 5  ;;  %v2105_v17 = vsel %vm6669_vm12, %v5304_v40, %v2104_v1  ;;  %v5307_v52 = vrot.slane %v2075_v50, 9  ;;  %v2076_v50 = vld [vmem:[#allocation2 + $0x38] sm:$0xe] }
 0x1e5   : > { %2591 = vmatpush.bf16.msra.mxu3 %v6138_v62  ;;  %v1853_v33 = vsel %vm6683_vm13, %v1848_v45, %v1852_v0  ;;  %v2145_v5 = vunpack.c.l.b16 %v2105_v17  ;;  %v1833_v45 = vld [vmem:[#allocation2 + $0x2c] sm:$0x1]  ;;  %v1899_v4 = vrot.slane %v1897_v6, 4  ;;  %v2077_v9 = vld [vmem:[#allocation2 + $0x40] sm:$0xe] }
 0x1e6   : > { %v1861_v49 = vor.u32 %v1860_v13, %v1857_v11  ;;  %v1969_v21 = vunpack.c.l.b16 %v1853_v33  ;;  %v2146_v11 = vunpack.c.l.b16 %v2109_v41  ;;  %v2112_v40 = vrot.slane %v1833_v45, 5  ;;  %v6135_v17 = vld [vmem:[%s7853_s3 + $0x1c8] sm:$0xff] }
 0x1e8   : > { %v1862_v31 = vrot.slane %v1861_v49, 4  ;;  %v2152_v49 = vpack.c.b16 %v2146_v11, %v2145_v5  ;;  %v1902_v11 = vrot.slane %v1900_v14, 5 }
 0x1e9   : > { %2592 = vmatpush.bf16.msra.mxu3 %v6137_v27 }
 0x1ea   : > { %v1867_v47 = vsel %vm6683_vm13, %v1862_v31, %v1866_v25  ;;  %v7080_v19 = vpop.f32.mrf.mxu2  ;;  %v2074_v25 = vld [vmem:[#allocation2 + $0x28] sm:$0xe] }
 0x1eb   : > { %v1970_v15 = vunpack.c.l.b16 %v1867_v47 }
 0x1ed   : > { %v1977_v13 = vpack.c.b16 %v1970_v15, %v1969_v21  ;;  %2593 = vmatpush.bf16.msra.mxu3 %v6136_v51  ;;  %v2117_v15 = vsel %vm6669_vm12, %v5307_v52, %v2116_v53  ;;  %v5308_v53 = vrot.slane %v2076_v50, 9 }
 0x1ee   : > { %v2148_v37 = vunpack.c.l.b16 %v2117_v15 }
 0x1f1   : > { %1676 = vmatmul.bf16.gmra.mxu2 %v6955_v54  ;;  %v1830_v54 = vld [vmem:[#allocation2 + $0x20] sm:$0xf]  ;;  %2594 = vmatpush.bf16.msra.mxu3 %v6135_v17 }
 0x1f2   : > { %v1883_v10 = vshrl.u32 %v1830_v54, 16  ;;  %v1886_v46 = vshll.u32 %v1830_v54, 16  ;;  %v1834_v54 = vld [vmem:[#allocation2 + $0x30] sm:$0xf] }
 0x1f3   : > { %v1911_v47 = vshrl.u32 %v1834_v54, 16 }
 0x1f4   : > { %2215 = vmatmul.bf16.vlgmr.msrb.gmra.mxu3 %v2151_v3  ;;  %v1885_v55 = vrot.slane %v1883_v10, 4  ;;  %v1888_v48 = vrot.slane %v1886_v46, 5  ;;  %v1878_v3 = vshll.u32 %v1829_v38, 16  ;;  %v6168_v38 = vld [vmem:[%s7855_s5 + $0x70] sm:$0xff]  ;;  %v1914_v10 = vshll.u32 %v1834_v54, 16 }
 0x1f5   : > { %v5306_v46 = vrot.slane %v2074_v25, 9  ;;  %3182 = vmatpush.bf16.msrb.mxu1 %v6168_v38  ;;  %v1913_v41 = vrot.slane %v1911_v47, 4  ;;  %2595 = vmatpush.bf16.msra.mxu3 %v6134_v18  ;;  %v1839_v25 = vld [vmem:[#allocation2 + $0x44] sm:$0x1]  ;;  %v1838_v38 = vld [vmem:[#allocation2 + $0x40] sm:$0xf] }
 0x1f6   : > { %v1889_v23 = vor.u32 %v1888_v48, %v1885_v55  ;;  %v1498_v29 = vpop.f32.mrf.mxu3  ;;  %v1880_v62 = vrot.slane %v1878_v3, 5  ;;  %v1916_v55 = vrot.slane %v1914_v10, 5  ;;  %v5309_v47 = vrot.slane %v2077_v9, 9 }
 0x1f7   : > { %v2113_v21 = vsel %vm6669_vm12, %v5306_v46, %v2112_v40  ;;  %v2124_v10 = vrot.slane %v1839_v25, 5  ;;  %v1939_v40 = vshrl.u32 %v1838_v38, 16 }
 0x1f8   : > { %v1890_v34 = vrot.slane %v1889_v23, 4  ;;  %v1881_v1 = vsel %vm6683_vm13, %v1876_v35, %v1880_v62  ;;  %v2147_v23 = vunpack.c.l.b16 %v2113_v21  ;;  %v1917_v32 = vor.u32 %v1916_v55, %v1913_v41  ;;  %v1836_v35 = vld [vmem:[#allocation2 + $0x38] sm:$0xf] }
 0x1f9   : > { %v1971_v48 = vunpack.c.l.b16 %v1881_v1  ;;  %v1925_v62 = vshrl.u32 %v1836_v35, 16  ;;  %v1942_v1 = vshll.u32 %v1838_v38, 16  ;;  %v1941_v17 = vrot.slane %v1939_v40, 4 }
 0x1fa   : > { %v1895_v0 = vsel %vm6683_vm13, %v1890_v34, %v1894_v36  ;;  %v2153_v27 = vpack.c.b16 %v2148_v37, %v2147_v23  ;;  %v1918_v3 = vrot.slane %v1917_v32, 4  ;;  %v1837_v34 = vld [vmem:[#allocation2 + $0x3c] sm:$0x1] }
 0x1fb   : > { %v1972_v33 = vunpack.c.l.b16 %v1895_v0  ;;  %v2120_v60 = vrot.slane %v1837_v34, 5  ;;  %v1928_v0 = vshll.u32 %v1836_v35, 16  ;;  %v1927_v15 = vrot.slane %v1925_v62, 4 }
 0x1fc   : > { %v1944_v37 = vrot.slane %v1942_v1, 5  ;;  %v1934_v26 = vshll.u32 %v1837_v34, 16 }
 0x1fd   : > { %v1978_v5 = vpack.c.b16 %v1972_v33, %v1971_v48  ;;  %v2121_v14 = vsel %vm6669_vm12, %v5308_v53, %v2120_v60  ;;  %v1930_v41 = vrot.slane %v1928_v0, 5  ;;  %v2125_v48 = vsel %vm6669_vm12, %v5309_v47, %v2124_v10  ;;  %v6122_v47 = vld [vmem:[#allocation2 + $0x14] sm:$0xf0] }
 0x1fe   : > { %v2149_v21 = vunpack.c.l.b16 %v2121_v14  ;;  %v1945_v18 = vor.u32 %v1944_v37, %v1941_v17  ;;  %v1936_v50 = vrot.slane %v1934_v26, 5  ;;  %v6123_v37 = vld [vmem:[#allocation2 + $0x24] sm:$0xf0]  ;;  %v2503_v26 = vshll.u32 %v6940_v12, 16 }
 0x1ff   : > { %v1931_v23 = vor.u32 %v1930_v41, %v1927_v15  ;;  %v2393_v15 = vld [vmem:[#allocation2 + $0x48] sm:$0xf] }
 0x200   : > { %v1946_v35 = vrot.slane %v1945_v18, 4 }
 0x201   : > { %2041 = vmatmul.bf16.vlgmr.msrb.gmra.mxu2 %v1977_v13  ;;  %v7112_v13 = vpop.f32.mrf.mxu3 }
 0x203   : > { %v1397_v61 = vpop.f32.mrf.mxu2 }
 0x204   : > { %2220 = vmatmul.bf16.gmra.mxu3 %v2152_v49  ;;  %v7090_v31 = vadd.f32 %v1498_v29, %v1397_v61  ;;  %v1903_v49 = vor.u32 %v1902_v11, %v1899_v4  ;;  %v1920_v29 = vshll.u32 %v1835_v16, 16  ;;  %v1906_v61 = vshll.u32 %v1833_v45, 16  ;;  %v6126_v16 = vld [vmem:[%s7853_s3 + $0x180] sm:$0xff] }
 0x205   : > { %2349 = vmatpush.bf16.msra.mxu2 %v6126_v16 }
 0x206   : > { %v1904_v36 = vrot.slane %v1903_v49, 4  ;;  %v1922_v54 = vrot.slane %v1920_v29, 5  ;;  %v1908_v51 = vrot.slane %v1906_v61, 5  ;;  %v1932_v49 = vrot.slane %v1931_v23, 4 }
 0x207   : > { %v1948_v29 = vshll.u32 %v1839_v25, 16 }
 0x208   : > { %v1923_v45 = vsel %vm6683_vm13, %v1918_v3, %v1922_v54  ;;  %v1909_v46 = vsel %vm6683_vm13, %v1904_v36, %v1908_v51  ;;  %v6167_v3 = vld [vmem:[%s7855_s5 + $0x68] sm:$0xff]  ;;  %v1937_v54 = vsel %vm6683_vm13, %v1932_v49, %v1936_v50  ;;  %v2489_v49 = vshll.u32 %v6942_v7, 16 }
 0x209   : > { %v1974_v6 = vunpack.c.l.b16 %v1923_v45  ;;  %v1973_v55 = vunpack.c.l.b16 %v1909_v46  ;;  %3183 = vmatpush.bf16.msrb.mxu1 %v6167_v3  ;;  %v1950_v9 = vrot.slane %v1948_v29, 5  ;;  %v1975_v53 = vunpack.c.l.b16 %v1937_v54  ;;  %v5376_v46 = vld [vmem:[#allocation2 + $0x10] sm:$0xf] }
 0x20a   : > { %v5377_v1 = vor.u32 %v6122_v47, %v5376_v46  ;;  %v5388_v47 = vld [vmem:[#allocation2 + $0x40] sm:$0xf]  ;;  %v6125_v46 = vld [vmem:[#allocation2 + $0x44] sm:$0xf0] }
 0x20b   : > { %v7129_v33 = vpop.f32.mrf.mxu2  ;;  %v1979_v11 = vpack.c.b16 %v1974_v6, %v1973_v55  ;;  %v1951_v34 = vsel %vm6683_vm13, %v1946_v35, %v1950_v9  ;;  %v6166_v6 = vld [vmem:[%s7855_s5 + $0x60] sm:$0xff]  ;;  %v2505_v35 = vrot.slane %v2503_v26, 5 }
 0x20d   : > { %3184 = vmatpush.bf16.msrb.mxu1 %v6166_v6  ;;  %v5389_v6 = vor.u32 %v6125_v46, %v5388_v47  ;;  %v6176_v47 = vld [vmem:[%s7855_s5 + $0xb0] sm:$0xff]  ;;  %v6158_v46 = vld [vmem:[%s7855_s5 + $0x20] sm:$0xff] }
 0x211   : > { %2046 = vmatmul.bf16.gmra.mxu2 %v1978_v5  ;;  %v2150_v5 = vunpack.c.l.b16 %v2125_v48  ;;  %v2494_v48 = vshrl.u32 %v2393_v15, 16  ;;  %3185 = vmatpush.bf16.msrb.mxu1 %v6165_v39  ;;  %v391_v39 = vld [vmem:[#allocation3 + $0x14] sm:$0x1] }
 0x213   : > { %v2154_v32 = vpack.c.b16 %v2150_v5, %v2149_v21  ;;  %v2497_v21 = vshll.u32 %v2393_v15, 16  ;;  %v2496_v20 = vrot.slane %v2494_v48, 4  ;;  %v6164_v15 = vld [vmem:[%s7855_s5 + $0x50] sm:$0xff] }
 0x214   : > { %2225 = vmatmul.bf16.gmra.mxu3 %v2153_v27 }
 0x215   : > { %v2499_v30 = vrot.slane %v2497_v21, 5  ;;  %3186 = vmatpush.bf16.msrb.mxu1 %v6164_v15 }
 0x216   : > { %v1503_v52 = vpop.f32.mrf.mxu3 }
 0x21e   : > { %v1505_v4 = vpop.f32.mrf.mxu3 }
 0x221   : > { %2051 = vmatmul.bf16.gmra.mxu2 %v1979_v11 }
 0x223   : > { %v1402_v27 = vpop.f32.mrf.mxu2 }
 0x224   : > { %2230 = vmatmul.bf16.gmra.mxu3 %v2154_v32  ;;  %v7133_v61 = vadd.f32 %v1503_v52, %v1402_v27  ;;  %v1976_v52 = vunpack.c.l.b16 %v1951_v34  ;;  %v5384_v34 = vld [vmem:[#allocation2 + $0x30] sm:$0xf] }
 0x226   : > { %v1980_v16 = vpack.c.b16 %v1976_v52, %v1975_v53  ;;  %v5385_v53 = vor.u32 %v6124_v8, %v5384_v34  ;;  %v361_v34 = vld [vmem:[#allocation3 + $0x10] sm:$0x1]  ;;  %v6159_v8 = vld [vmem:[%s7855_s5 + $0x28] sm:$0xff] }
 0x227   : > { %v1508_v36 = vpop.f32.mrf.mxu3 }
 0x22b   : > { %v1404_v60 = vpop.f32.mrf.mxu2 }
 0x22c   : > { %v7142_v25 = vadd.f32 %v1505_v4, %v1404_v60  ;;  %v5380_v4 = vld [vmem:[#allocation2 + $0x20] sm:$0xf] }
 0x22d   : > { %v5381_v23 = vor.u32 %v6123_v37, %v5380_v4 }
 0x22f   : > { %v1510_v38 = vpop.f32.mrf.mxu3 }
 0x231   : > { %2056 = vmatmul.bf16.gmra.mxu2 %v1980_v16 }
 0x234   : > { %v1407_v51 = vpop.f32.mrf.mxu2  ;;  %2596 = vmatmul.bf16.vlgmr.msra.gmra.mxu3 %v2532_v44  ;;  %v2391_v44 = vld [vmem:[#allocation2 + $0x40] sm:$0xf] }
 0x235   : > { %v7147_v45 = vadd.f32 %v1508_v36, %v1407_v51  ;;  %v2480_v41 = vshrl.u32 %v2391_v44, 16  ;;  %v2483_v55 = vshll.u32 %v2391_v44, 16  ;;  %v2491_v36 = vrot.slane %v2489_v49, 5 }
 0x237   : > { %v1796_v62 = vpop.f32.mrf.mxu3  ;;  %v2482_v11 = vrot.slane %v2480_v41, 4  ;;  %v2485_v32 = vrot.slane %v2483_v55, 5 }
 0x23c   : > { %v1409_v0 = vpop.f32.mrf.mxu2 }
 0x23d   : > { %v7149_v10 = vadd.f32 %v1510_v38, %v1409_v0 }
 0x23f   : > { %v7151_v40 = vpop.f32.mrf.mxu3 }
 0x241   : > { %2350 = vmatmul.bf16.vlgmr.msra.gmra.mxu2 %v5377_v1 }
 0x244   : > { %v1662_v14 = vpop.f32.mrf.mxu2  ;;  %2601 = vmatmul.bf16.gmra.mxu3 %v2533_v24  ;;  %v2486_v24 = vor.u32 %v2485_v32, %v2482_v11  ;;  %v6163_v11 = vld [vmem:[%s7855_s5 + $0x48] sm:$0xff] }
 0x245   : > { %v1682_v56 = vadd.f32 %v1662_v14, %v7044_v2  ;;  %v2500_v2 = vor.u32 %v2499_v30, %v2496_v20  ;;  %3187 = vmatpush.bf16.msrb.mxu1 %v6163_v11  ;;  %v6161_v30 = vld [vmem:[%s7855_s5 + $0x38] sm:$0xff]  ;;  %v394_v11 = vld [vmem:[#allocation3 + $0x1c] sm:$0x1] }
 0x246   : > { %v2487_v3 = vrot.slane %v2486_v24, 4  ;;  %v358_v24 = vld [vmem:[#allocation3 + $0x8] sm:$0x1]  ;;  %3282 = vmatpush.bf16.msrb.mxu2 %v6161_v30 }
 0x247   : > { %v1801_v57 = vpop.f32.mrf.mxu3  ;;  %v2501_v50 = vrot.slane %v2500_v2, 4  ;;  %v7181_v60 = vadd.f32 %v1796_v62, %v1682_v56  ;;  %v388_v2 = vld [vmem:[#allocation3 + $0xc] sm:$0x1]  ;;  %v359_v26 = vsel %vm6520_vm2, 0, %v358_v24 }
 0x248   : > { %v2492_v54 = vsel %vm6683_vm13, %v2487_v3, %v2491_v36  ;;  %360 = vst [vmem:[#allocation3 + $0x8] sm:$0x1] %v359_v26  ;;  %v6160_v36 = vld [vmem:[%s7855_s5 + $0x30] sm:$0xff] }
 0x249   : > { %v2506_v12 = vsel %vm6683_vm13, %v2501_v50, %v2505_v35  ;;  %v2530_v7 = vunpack.c.l.b16 %v2492_v54  ;;  %v6177_v54 = vld [vmem:[%s7855_s5 + $0xb8] sm:$0xff] }
 0x24a   : > { %3283 = vmatpush.bf16.msrb.mxu2 %v6160_v36  ;;  %3448 = vmatpush.bf16.msrb.mxu3 %v6177_v54  ;;  %v7288_v54 = vld [vmem:[%s7854_s4] ss:$0 sm:$0xff] }
 0x24c   : > { %v7160_v17 = vpop.f32.mrf.mxu2 }
 0x24e   : > { %3284 = vmatpush.bf16.msrb.mxu2 %v6159_v8  ;;  %3449 = vmatpush.bf16.msrb.mxu3 %v6176_v47 }
 0x24f   : > { %v7162_v5 = vpop.f32.mrf.mxu3 }
 0x251   : > { %2355 = vmatmul.bf16.gmra.mxu2 %v5381_v23 }
 0x252   : > { %3285 = vmatpush.bf16.msrb.mxu2 %v6158_v46 }
 0x254   : > { %v1667_v18 = vpop.f32.mrf.mxu2  ;;  %2606 = vmatmul.bf16.gmra.mxu3 %v2534_v43  ;;  %v2531_v43 = vunpack.c.l.b16 %v2506_v12  ;;  %v6189_v12 = vld [vmem:[%s7855_s5 + $0xf8] sm:$0xff] }
 0x255   : > { %v1684_v27 = vadd.f32 %v1667_v18, %v7090_v31  ;;  %v389_v18 = vsel %vm6527_vm4, 0, %v388_v2  ;;  %3582 = vmatpush.bf16.msra.mxu0 %v6189_v12  ;;  %v395_v2 = vsel %vm6527_vm4, 0, %v394_v11  ;;  %v6172_v11 = vld [vmem:[%s7855_s5 + $0x90] sm:$0xff] }
 0x256   : > { %v2535_v52 = vpack.c.b16 %v2531_v43, %v2530_v7  ;;  %390 = vst [vmem:[#allocation3 + $0xc] sm:$0x1] %v389_v18  ;;  %v362_v7 = vsel %vm6520_vm2, 0, %v361_v34  ;;  %v392_v43 = vsel %vm6527_vm4, 0, %v391_v39  ;;  %v6156_v34 = vld [vmem:[%s7855_s5 + $0x10] sm:$0xff] }
 0x257   : > { %v1806_v29 = vpop.f32.mrf.mxu3  ;;  %v7188_v14 = vadd.f32 %v1801_v57, %v1684_v27  ;;  %363 = vst [vmem:[#allocation3 + $0x10] sm:$0x1] %v362_v7  ;;  %v6155_v7 = vld [vmem:[%s7855_s5 + $0x8] sm:$0xff] }
 0x258   : > { %393 = vst [vmem:[#allocation3 + $0x14] sm:$0x1] %v392_v43  ;;  %v367_v43 = vld [vmem:[#allocation3 + $0x20] sm:$0x1] }
 0x259   : > { %396 = vst [vmem:[#allocation3 + $0x1c] sm:$0x1] %v395_v2  ;;  %v368_v47 = vsel %vm6520_vm2, 0, %v367_v43 }
 0x25a   : > { %369 = vst [vmem:[#allocation3 + $0x20] sm:$0x1] %v368_v47 }
 0x25c   : > { %v7174_v9 = vpop.f32.mrf.mxu2 }
 0x25f   : > { %v7179_v31 = vpop.f32.mrf.mxu3 }
 0x261   : > { %2360 = vmatmul.bf16.gmra.mxu2 %v5385_v53  ;;  %v2771_v53 = vpop.f32.mrf.mxu0 }
 0x264   : > { %v1672_v38 = vpop.f32.mrf.mxu2  ;;  %2611 = vmatmul.bf16.gmra.mxu3 %v2535_v52 }
 0x265   : > { %v1686_v16 = vadd.f32 %v1672_v38, %v7133_v61  ;;  %v1496_v38 = vadd.f32 %v7078_v28, %v7080_v19  ;;  %v6162_v28 = vld [vmem:[%s7855_s5 + $0x40] sm:$0xff] }
 0x266   : > { %3188 = vmatpush.bf16.msrb.mxu1 %v6162_v28  ;;  %v1501_v28 = vadd.f32 %v7112_v13, %v7129_v33  ;;  %v6154_v13 = vld [vmem:[%s7855_s5] sm:$0xff]  ;;  %v6184_v33 = vld [vmem:[%s7855_s5 + $0xd0] sm:$0xff] }
 0x267   : > { %v1811_v51 = vpop.f32.mrf.mxu3  ;;  %v7198_v55 = vadd.f32 %v1806_v29, %v1686_v16 }
 0x269   : > { %v2773_v26 = vpop.f32.mrf.mxu0 }
 0x26c   : > { %v7184_v0 = vpop.f32.mrf.mxu2 }
 0x26f   : > { %v7186_v1 = vpop.f32.mrf.mxu3 }
 0x271   : > { %2365 = vmatmul.bf16.gmra.mxu2 %v5389_v6  ;;  %v6188_v6 = vld [vmem:[%s7855_s5 + $0xf0] sm:$0xff] }
 0x272   : > { %3583 = vmatpush.bf16.msra.mxu0 %v6188_v6 }
 0x274   : > { %v1677_v44 = vpop.f32.mrf.mxu2 }
 0x275   : > { %v1688_v62 = vadd.f32 %v1677_v44, %v7147_v45 }
 0x277   : > { %v2216_v56 = vpop.f32.mrf.mxu3  ;;  %v7206_v45 = vadd.f32 %v1811_v51, %v1688_v62  ;;  %v1683_v51 = vadd.f32 %v7160_v17, %v1496_v38  ;;  %v6175_v17 = vld [vmem:[%s7855_s5 + $0xa8] sm:$0xff] }
 0x278   : > { %v364_v62 = vld [vmem:[#allocation3 + $0x18] sm:$0x1]  ;;  %3450 = vmatpush.bf16.msrb.mxu3 %v6175_v17 }
 0x279   : > { %v1817_v30 = vadd.f32 %v7151_v40, %v1683_v51  ;;  %v6174_v40 = vld [vmem:[%s7855_s5 + $0xa0] sm:$0xff]  ;;  %v6185_v51 = vld [vmem:[%s7855_s5 + $0xd8] sm:$0xff] }
 0x27c   : > { %v7194_v61 = vpop.f32.mrf.mxu2  ;;  %3451 = vmatpush.bf16.msrb.mxu3 %v6174_v40 }
 0x27f   : > { %v7196_v41 = vpop.f32.mrf.mxu3 }
 0x284   : > { %v2042_v48 = vpop.f32.mrf.mxu2 }
 0x285   : > { %v2062_v16 = vadd.f32 %v2042_v48, %v7181_v60  ;;  %v6157_v60 = vld [vmem:[%s7855_s5 + $0x18] sm:$0xff]  ;;  %v6187_v48 = vld [vmem:[%s7855_s5 + $0xe8] sm:$0xff] }
 0x286   : > { %3286 = vmatpush.bf16.msrb.mxu2 %v6157_v60  ;;  %3584 = vmatpush.bf16.msra.mxu0 %v6187_v48 }
 0x287   : > { %v7200_v21 = vpop.f32.mrf.mxu3  ;;  %v2236_v19 = vadd.f32 %v2216_v56, %v2062_v16  ;;  %v365_v56 = vsel %vm6520_vm2, 0, %v364_v62 }
 0x288   : > { %366 = vst [vmem:[#allocation3 + $0x18] sm:$0x1] %v365_v56 }
 0x28a   : > { %3287 = vmatpush.bf16.msrb.mxu2 %v6156_v34 }
 0x28c   : > { %v7202_v57 = vpop.f32.mrf.mxu2 }
 0x28d   : > { %v2063_v18 = vadd.f32 %v7202_v57, %v1817_v30  ;;  %v6186_v57 = vld [vmem:[%s7855_s5 + $0xe0] sm:$0xff]  ;;  %v355_v30 = vld [vmem:[#allocation3] sm:$0x1] }
 0x28e   : > { %3585 = vmatpush.bf16.msra.mxu0 %v6186_v57  ;;  %3288 = vmatpush.bf16.msrb.mxu2 %v6155_v7  ;;  %v6183_v57 = vld [vmem:[%s7855_s5 + $0xc8] sm:$0xff] }
 0x28f   : > { %v7204_v37 = vpop.f32.mrf.mxu3  ;;  %v2237_v8 = vadd.f32 %v7196_v41, %v2063_v18  ;;  %v356_v18 = vsel %vm6520_vm2, 0, %v355_v30 }
 0x290   : > { %357 = vst [vmem:[#allocation3] sm:$0x1] %v356_v18 }
 0x292   : > { %3586 = vmatpush.bf16.msra.mxu0 %v6185_v51  ;;  %3289 = vmatpush.bf16.msrb.mxu2 %v6154_v13 }
 0x294   : > { %v7208_v4 = vpop.f32.mrf.mxu2 }
 0x295   : > { %v2064_v17 = vadd.f32 %v7208_v4, %v7188_v14  ;;  %v2908_v4 = vld [vmem:[#allocation3 + $0x8] sm:$0xf] }
 0x296   : > { %3587 = vmatpush.bf16.msra.mxu0 %v6184_v33 }
 0x297   : > { %v7213_v23 = vpop.f32.mrf.mxu3 }
 0x29a   : > { %3588 = vmatpush.bf16.msra.mxu0 %v6183_v57 }
 0x29c   : > { %v7215_v32 = vpop.f32.mrf.mxu2 }
 0x29f   : > { %v7217_v20 = vpop.f32.mrf.mxu3 }
 0x2a4   : > { %v7226_v27 = vpop.f32.mrf.mxu2 }
 0x2a7   : > { %v7228_v49 = vpop.f32.mrf.mxu3 }
 0x2ac   : > { %v7230_v29 = vpop.f32.mrf.mxu2 }
 0x2af   : > { %v7232_v3 = vpop.f32.mrf.mxu3 }
 0x2b4   : > { %v7234_v50 = vpop.f32.mrf.mxu2 }
 0x2b7   : > { %v2597_v35 = vpop.f32.mrf.mxu3 }
 0x2bc   : > { %v7252_v52 = vpop.f32.mrf.mxu2 }
 0x2bf   : > { %v2599_v44 = vpop.f32.mrf.mxu3 }
 0x2c4   : > { %v2351_v15 = vpop.f32.mrf.mxu2 }
 0x2c5   : > { %v2371_v24 = vadd.f32 %v2351_v15, %v2236_v19  ;;  %v2776_v19 = vpop.f32.mrf.mxu0  ;;  %v1685_v15 = vadd.f32 %v7174_v9, %v1501_v28  ;;  %v6171_v9 = vld [vmem:[%s7855_s5 + $0x88] sm:$0xff] }
 0x2c7   : > { %v2617_v36 = vadd.f32 %v2597_v35, %v2371_v24  ;;  %v6173_v35 = vld [vmem:[%s7855_s5 + $0x98] sm:$0xff]  ;;  %v2602_v38 = vpop.f32.mrf.mxu3  ;;  %v1819_v40 = vadd.f32 %v7162_v5, %v1685_v15  ;;  %v385_v15 = vld [vmem:[#allocation3 + $0x4] sm:$0x1] }
 0x2c8   : > { %3452 = vmatpush.bf16.msrb.mxu3 %v6173_v35  ;;  %v386_v33 = vsel %vm6527_vm4, 0, %v385_v15 }
 0x2c9   : > { %v2791_v12 = vadd.f32 %v2771_v53, %v2617_v36  ;;  %v397_v53 = vld [vmem:[#allocation3 + $0x24] sm:$0x1]  ;;  %v370_v36 = vld [vmem:[#allocation3 + $0x28] sm:$0x1]  ;;  %v2065_v5 = vadd.f32 %v7215_v32, %v1819_v40  ;;  %v6170_v32 = vld [vmem:[%s7855_s5 + $0x80] sm:$0xff] }
 0x2ca   : > { %v398_v41 = vsel %vm6527_vm4, 0, %v397_v53  ;;  %v371_v35 = vsel %vm6520_vm2, 0, %v370_v36  ;;  %387 = vst [vmem:[#allocation3 + $0x4] sm:$0x1] %v386_v33 }
 0x2cb   : > { %v2803_v39 = vadd.f32 %v7288_v54, %v2791_v12  ;;  %399 = vst [vmem:[#allocation3 + $0x24] sm:$0x1] %v398_v41  ;;  %v400_v12 = vld [vmem:[#allocation3 + $0x2c] sm:$0x1] }
 0x2cc   : > { %v2353_v16 = vpop.f32.mrf.mxu2  ;;  %3453 = vmatpush.bf16.msrb.mxu3 %v6172_v11  ;;  %372 = vst [vmem:[#allocation3 + $0x28] sm:$0x1] %v371_v35  ;;  %v2914_v11 = vld [vmem:[#allocation3 + $0x10] sm:$0xf] }
 0x2cd   : > { %v2811_v46 = vmax.f32 %v2803_v39, 0.0  ;;  %v2372_v6 = vadd.f32 %v2353_v16, %v2237_v8 }
 0x2cf   : > { %v2819_v60 = vpack.c.bf16 %v2811_v46, %v2811_v46  ;;  %v2618_v62 = vadd.f32 %v2599_v44, %v2372_v6  ;;  %v2911_v44 = vld [vmem:[#allocation3 + $0xc] sm:$0x1]  ;;  %v2604_v53 = vpop.f32.mrf.mxu3  ;;  %v2778_v46 = vpop.f32.mrf.mxu0 }
 0x2d0   : > { %3454 = vmatpush.bf16.msrb.mxu3 %v6171_v9  ;;  %v2066_v9 = vadd.f32 %v7226_v27, %v7198_v55 }
 0x2d1   : > { %v2828_v48 = vshrl.u32 %v2819_v60, 16  ;;  %v2792_v56 = vadd.f32 %v2773_v26, %v2618_v62  ;;  %v2831_v14 = vshll.u32 %v2819_v60, 16  ;;  %v2238_v26 = vadd.f32 %v7200_v21, %v2064_v17  ;;  %v6182_v17 = vld [vmem:[%s7855_s5 + $0xc0] sm:$0xff] }
 0x2d2   : > { %v401_v21 = vsel %vm6527_vm4, 0, %v400_v12  ;;  %v1687_v60 = vadd.f32 %v7184_v0, %v7142_v25  ;;  %v2239_v62 = vadd.f32 %v7204_v37, %v2065_v5  ;;  %3589 = vmatpush.bf16.msra.mxu0 %v6182_v17  ;;  %v2923_v17 = vld [vmem:[#allocation3 + $0x1c] sm:$0x1] }
 0x2d3   : > { %v2830_v24 = vrot.slane %v2828_v48, 7  ;;  %v2804_v2 = vadd.f32 %v7288_v54, %v2792_v56  ;;  %402 = vst [vmem:[#allocation3 + $0x2c] sm:$0x1] %v401_v21  ;;  %v373_v48 = vld [vmem:[#allocation3 + $0x30] sm:$0x1] }
 0x2d4   : > { %v2356_v34 = vpop.f32.mrf.mxu2  ;;  %3455 = vmatpush.bf16.msrb.mxu3 %v6170_v32  ;;  %v374_v25 = vsel %vm6520_vm2, 0, %v373_v48  ;;  %v1821_v30 = vadd.f32 %v7179_v31, %v1687_v60 }
 0x2d5   : > { %v2833_v39 = vor.u32 %v2831_v14, %v2830_v24  ;;  %v2834_v8 = vrot.slane %v2830_v24, 4  ;;  %v2812_v7 = vmax.f32 %v2804_v2, 0.0  ;;  %v2373_v43 = vadd.f32 %v2356_v34, %v2238_v26  ;;  %v2917_v14 = vld [vmem:[#allocation3 + $0x14] sm:$0x1]  ;;  %375 = vst [vmem:[#allocation3 + $0x30] sm:$0x1] %v374_v25 }
 0x2d6   : > { %v403_v2 = vld [vmem:[#allocation3 + $0x34] sm:$0x1]  ;;  %v3311_v34 = vld [vmem:[#allocation3] sm:$0xe]  ;;  %v2067_v35 = vadd.f32 %v7230_v29, %v1821_v30  ;;  %v6197_v29 = vld [vmem:[%s7855_s5 + $0x138] sm:$0xff] }
 0x2d7   : > { %v2909_v16 = vsel %vm6608_vm7, %v2833_v39, %v2908_v4  ;;  %v2912_v51 = vsel %vm6520_vm2, %v2834_v8, %v2911_v44  ;;  %v2820_v47 = vpack.c.bf16 %v2812_v7, %v2812_v7  ;;  %v2619_v41 = vadd.f32 %v2602_v38, %v2373_v43  ;;  %v5576_v44 = vld [vmem:[#allocation3] sm:$0xf]  ;;  %v2607_v55 = vpop.f32.mrf.mxu3  ;;  %v2781_v5 = vpop.f32.mrf.mxu0  ;;  %3828 = vmatpush.bf16.msra.mxu1 %v6197_v29 }
 0x2d8   : > { %2910 = vst [vmem:[#allocation3 + $0x8] sm:$0xf] %v2909_v16  ;;  %v1689_v38 = vadd.f32 %v7194_v61, %v7149_v10  ;;  %v404_v21 = vsel %vm6527_vm4, 0, %v403_v2  ;;  %v7379_v39 = vadd.f32 %v7234_v50, %v7206_v45  ;;  %v2956_v45 = vld [vmem:[#allocation3] sm:$0xf] }
 0x2d9   : > { %2913 = vst [vmem:[#allocation3 + $0xc] sm:$0x1] %v2912_v51  ;;  %v2836_v6 = vshrl.u32 %v2820_v47, 16  ;;  %v2793_v28 = vadd.f32 %v2776_v19, %v2619_v41  ;;  %v2839_v19 = vshll.u32 %v2820_v47, 16  ;;  %v2240_v51 = vadd.f32 %v7213_v23, %v2066_v9  ;;  %v2920_v41 = vld [vmem:[#allocation3 + $0x18] sm:$0xf] }
 0x2da   : > { %v1823_v24 = vadd.f32 %v7186_v1, %v1689_v38  ;;  %v5622_v47 = vrot.slane %v3311_v34, 9  ;;  %405 = vst [vmem:[#allocation3 + $0x34] sm:$0x1] %v404_v21  ;;  %v2989_v32 = vshrl.u32 %v2956_v45, 16  ;;  %v406_v34 = vld [vmem:[#allocation3 + $0x3c] sm:$0x1] }
 0x2db   : > { %v2838_v56 = vrot.slane %v2836_v6, 7  ;;  %v2805_v13 = vadd.f32 %v7288_v54, %v2793_v28  ;;  %v2980_v6 = vld [vmem:[#allocation3 + $0x4] sm:$0x1] }
 0x2dc   : > { %v2358_v4 = vpop.f32.mrf.mxu2  ;;  %v3337_v60 = vrot.slane %v2980_v6, 5  ;;  %v2998_v15 = vshll.u32 %v2980_v6, 16  ;;  %v2991_v33 = vrot.slane %v2989_v32, 4 }
 0x2dd   : > { %v2841_v10 = vor.u32 %v2839_v19, %v2838_v56  ;;  %v2842_v0 = vrot.slane %v2838_v56, 4  ;;  %v2813_v61 = vmax.f32 %v2805_v13, 0.0  ;;  %v2374_v37 = vadd.f32 %v2358_v4, %v2239_v62 }
 0x2de   : > { %v2992_v62 = vshll.u32 %v2956_v45, 16  ;;  %v3338_v13 = vsel %vm6669_vm12, %v5622_v47, %v3337_v60  ;;  %v7394_v4 = vrot.slane %v2998_v15, 5 }
 0x2df   : > { %v2915_v26 = vsel %vm6608_vm7, %v2841_v10, %v2914_v11  ;;  %v2918_v18 = vsel %vm6520_vm2, %v2842_v0, %v2917_v14  ;;  %v2821_v36 = vpack.c.bf16 %v2813_v61, %v2813_v61  ;;  %v2620_v12 = vadd.f32 %v2604_v53, %v2374_v37  ;;  %v6150_v40 = vld [vmem:[#allocation3 + $0x4] sm:$0xf0]  ;;  %v2783_v47 = vpop.f32.mrf.mxu0 }
 0x2e0   : > { %v3312_v57 = vld [vmem:[#allocation3 + $0x8] sm:$0xe]  ;;  %2916 = vst [vmem:[#allocation3 + $0x10] sm:$0xf] %v2915_v26  ;;  %v5577_v27 = vor.u32 %v6150_v40, %v5576_v44  ;;  %v7373_v31 = vld [vmem:[#allocation3 + $0xc] sm:$0x1]  ;;  %v7386_v53 = vadd.f32 %v7252_v52, %v1823_v24  ;;  %v3384_v9 = vunpack.c.l.b16 %v3338_v13  ;;  %v2241_v40 = vadd.f32 %v7217_v20, %v2067_v35 }
 0x2e1   : > { %v5623_v1 = vrot.slane %v3312_v57, 9  ;;  %2919 = vst [vmem:[#allocation3 + $0x14] sm:$0x1] %v2918_v18  ;;  %v2844_v8 = vshrl.u32 %v2821_v36, 16  ;;  %v2794_v7 = vadd.f32 %v2778_v46, %v2620_v12  ;;  %v3341_v43 = vrot.slane %v7373_v31, 5 }
 0x2e2   : > { %v2847_v16 = vshll.u32 %v2821_v36, 16  ;;  %3290 = vmatmul.bf16.vlgmr.msrb.gmra.mxu2 %v5577_v27  ;;  %v2957_v11 = vld [vmem:[#allocation3 + $0x8] sm:$0xf]  ;;  %v2994_v14 = vrot.slane %v2992_v62, 5  ;;  %v376_v26 = vld [vmem:[#allocation3 + $0x38] sm:$0x1]  ;;  %v2242_v62 = vadd.f32 %v7228_v49, %v7379_v39 }
 0x2e3   : > { %v2846_v50 = vrot.slane %v2844_v8, 7  ;;  %v2806_v46 = vadd.f32 %v7288_v54, %v2794_v7  ;;  %v3342_v28 = vsel %vm6669_vm12, %v5623_v1, %v3341_v43  ;;  %v5696_v37 = vld [vmem:[#allocation3 + $0x8] sm:$0xf]  ;;  %v3003_v2 = vshrl.u32 %v2957_v11, 16  ;;  %v2926_v57 = vld [vmem:[#allocation3 + $0x20] sm:$0xf]  ;;  %v2609_v1 = vpop.f32.mrf.mxu3 }
 0x2e4   : > { %v2361_v52 = vpop.f32.mrf.mxu2  ;;  %v3385_v38 = vunpack.c.l.b16 %v3342_v28  ;;  %v2995_v24 = vor.u32 %v2994_v14, %v2991_v33  ;;  %v2929_v27 = vld [vmem:[#allocation3 + $0x24] sm:$0x1]  ;;  %v3006_v7 = vshll.u32 %v2957_v11, 16  ;;  %v3012_v20 = vshll.u32 %v7373_v31, 16 }
 0x2e5   : > { %v2849_v23 = vor.u32 %v2847_v16, %v2846_v50  ;;  %v2850_v48 = vrot.slane %v2846_v50, 4  ;;  %v2814_v56 = vmax.f32 %v2806_v46, 0.0  ;;  %v2375_v19 = vadd.f32 %v2361_v52, %v2240_v51  ;;  %v6196_v43 = vld [vmem:[%s7855_s5 + $0x130] sm:$0xff] }
 0x2e6   : > { %v3392_v21 = vpack.c.b16 %v3385_v38, %v3384_v9  ;;  %v3005_v8 = vrot.slane %v3003_v2, 4  ;;  %v377_v35 = vsel %vm6520_vm2, 0, %v376_v26  ;;  %v407_v46 = vsel %vm6527_vm4, 0, %v406_v34  ;;  %3829 = vmatpush.bf16.msra.mxu1 %v6196_v43  ;;  %v409_v14 = vld [vmem:[#allocation3 + $0x44] sm:$0x1]  ;;  %v6195_v9 = vld [vmem:[%s7855_s5 + $0x128] sm:$0xff] }
 0x2e7   : > { %v2921_v25 = vsel %vm6608_vm7, %v2849_v23, %v2920_v41  ;;  %v2924_v10 = vsel %vm6520_vm2, %v2850_v48, %v2923_v17  ;;  %v2822_v0 = vpack.c.bf16 %v2814_v56, %v2814_v56  ;;  %v2621_v61 = vadd.f32 %v2607_v55, %v2375_v19  ;;  %v6178_v44 = vld [vmem:[#allocation3 + $0xc] sm:$0xf0]  ;;  %378 = vst [vmem:[#allocation3 + $0x38] sm:$0x1] %v377_v35  ;;  %v379_v23 = vld [vmem:[#allocation3 + $0x40] sm:$0x1] }
 0x2e8   : > { %2922 = vst [vmem:[#allocation3 + $0x18] sm:$0xf] %v2921_v25  ;;  %v5697_v30 = vor.u32 %v6178_v44, %v5696_v37  ;;  %v2996_v55 = vrot.slane %v2995_v24, 4  ;;  %v7404_v29 = vld [vmem:[#allocation3 + $0x14] sm:$0x1]  ;;  %3456 = vmatmul.bf16.vlgmr.msrb.gmra.mxu3 %v3392_v21  ;;  %v3008_v41 = vrot.slane %v3006_v7, 5 }
 0x2e9   : > { %2925 = vst [vmem:[#allocation3 + $0x1c] sm:$0x1] %v2924_v10  ;;  %v2852_v18 = vshrl.u32 %v2822_v0, 16  ;;  %v2855_v36 = vshll.u32 %v2822_v0, 16  ;;  %v2795_v12 = vadd.f32 %v2781_v5, %v2621_v61  ;;  %v3313_v51 = vld [vmem:[#allocation3 + $0x10] sm:$0xe] }
 0x2ea   : > { %3590 = vmatmul.bf16.vlgmr.msra.gmra.mxu0 %v5697_v30  ;;  %v3001_v50 = vsel %vm6683_vm13, %v2996_v55, %v7394_v4  ;;  %v5624_v6 = vrot.slane %v3313_v51, 9  ;;  %408 = vst [vmem:[#allocation3 + $0x3c] sm:$0x1] %v407_v46  ;;  %v3009_v52 = vor.u32 %v3008_v41, %v3005_v8  ;;  %v3014_v60 = vrot.slane %v3012_v20, 5  ;;  %v5580_v38 = vld [vmem:[#allocation3 + $0x10] sm:$0xf]  ;;  %3830 = vmatpush.bf16.msra.mxu1 %v6195_v9  ;;  %v2786_v46 = vpop.f32.mrf.mxu0 }
 0x2eb   : > { %v2854_v16 = vrot.slane %v2852_v18, 7  ;;  %v2807_v5 = vadd.f32 %v7288_v54, %v2795_v12  ;;  %v3345_v15 = vrot.slane %v7404_v29, 5  ;;  %v3117_v25 = vunpack.c.l.b16 %v3001_v50  ;;  %v2932_v24 = vld [vmem:[#allocation3 + $0x28] sm:$0xf]  ;;  %v2612_v21 = vpop.f32.mrf.mxu3  ;;  %v6204_v50 = vld [vmem:[%s7855_s5 + $0x170] sm:$0xff] }
 0x2ec   : > { %v2363_v45 = vpop.f32.mrf.mxu2  ;;  %v3010_v4 = vrot.slane %v3009_v52, 4  ;;  %v380_v26 = vsel %vm6520_vm2, 0, %v379_v23  ;;  %v410_v18 = vsel %vm6527_vm4, 0, %v409_v14  ;;  %v6217_v41 = vld [vmem:[%s7855_s5 + $0x1b8] sm:$0xff]  ;;  %v6224_v9 = vld [vmem:[%s7855_s5 + $0x1f0] sm:$0xff] }
 0x2ed   : > { %v2857_v28 = vor.u32 %v2855_v36, %v2854_v16  ;;  %v2858_v31 = vrot.slane %v2854_v16, 4  ;;  %v2815_v32 = vmax.f32 %v2807_v5, 0.0  ;;  %v2376_v17 = vadd.f32 %v2363_v45, %v2241_v40  ;;  %v2958_v36 = vld [vmem:[#allocation3 + $0x10] sm:$0xf]  ;;  %v2935_v40 = vld [vmem:[#allocation3 + $0x2c] sm:$0x1]  ;;  %4137 = vmatpush.bf16.msra.mxu3 %v6217_v41 }
 0x2ee   : > { %v3346_v37 = vsel %vm6669_vm12, %v5624_v6, %v3345_v15  ;;  %v3015_v2 = vsel %vm6683_vm13, %v3010_v4, %v3014_v60  ;;  %381 = vst [vmem:[#allocation3 + $0x40] sm:$0x1] %v380_v26  ;;  %v3017_v16 = vshrl.u32 %v2958_v36, 16  ;;  %v3020_v5 = vshll.u32 %v2958_v36, 16  ;;  %v6194_v45 = vld [vmem:[%s7855_s5 + $0x120] sm:$0xff] }
 0x2ef   : > { %v2927_v48 = vsel %vm6608_vm7, %v2857_v28, %v2926_v57  ;;  %v2930_v56 = vsel %vm6520_vm2, %v2858_v31, %v2929_v27  ;;  %v2823_v19 = vpack.c.bf16 %v2815_v32, %v2815_v32  ;;  %v2622_v11 = vadd.f32 %v2609_v1, %v2376_v17  ;;  %v6151_v13 = vld [vmem:[#allocation3 + $0x14] sm:$0xf0]  ;;  %v6205_v1 = vld [vmem:[%s7855_s5 + $0x178] sm:$0xff]  ;;  %411 = vst [vmem:[#allocation3 + $0x44] sm:$0x1] %v410_v18 }
 0x2f0   : > { %v3314_v33 = vld [vmem:[#allocation3 + $0x18] sm:$0xe]  ;;  %2928 = vst [vmem:[#allocation3 + $0x20] sm:$0xf] %v2927_v48  ;;  %v5581_v10 = vor.u32 %v6151_v13, %v5580_v38  ;;  %v7422_v0 = vld [vmem:[#allocation3 + $0x1c] sm:$0x1]  ;;  %v3118_v57 = vunpack.c.l.b16 %v3015_v2  ;;  %v3386_v8 = vunpack.c.l.b16 %v3346_v37  ;;  %4002 = vmatpush.bf16.msra.mxu2 %v6205_v1  ;;  %3831 = vmatpush.bf16.msra.mxu1 %v6194_v45  ;;  %v2243_v2 = vadd.f32 %v7232_v3, %v7386_v53 }
 0x2f1   : > { %v5625_v49 = vrot.slane %v3314_v33, 9  ;;  %2931 = vst [vmem:[#allocation3 + $0x24] sm:$0x1] %v2930_v56  ;;  %v2860_v39 = vshrl.u32 %v2823_v19, 16  ;;  %v2796_v61 = vadd.f32 %v2783_v47, %v2622_v11  ;;  %v3349_v44 = vrot.slane %v7422_v0, 5  ;;  %v6225_v17 = vld [vmem:[%s7855_s5 + $0x1f8] sm:$0xff] }
 0x2f2   : > { %v2863_v30 = vshll.u32 %v2823_v19, 16  ;;  %3295 = vmatmul.bf16.gmra.mxu2 %v5581_v10  ;;  %v2959_v43 = vld [vmem:[#allocation3 + $0x18] sm:$0xf]  ;;  %v3125_v47 = vpack.c.b16 %v3118_v57, %v3117_v25  ;;  %v3019_v31 = vrot.slane %v3017_v16, 4  ;;  %v3022_v32 = vrot.slane %v3020_v5, 5  ;;  %v6193_v33 = vld [vmem:[%s7855_s5 + $0x118] sm:$0xff]  ;;  %4383 = vmatpush.bf16.msrb.mxu0 %v6225_v17 }
 0x2f3   : > { %v2862_v12 = vrot.slane %v2860_v39, 7  ;;  %v2808_v34 = vadd.f32 %v7288_v54, %v2796_v61  ;;  %v3350_v27 = vsel %vm6669_vm12, %v5625_v49, %v3349_v44  ;;  %v5700_v15 = vld [vmem:[#allocation3 + $0x18] sm:$0xf]  ;;  %v3026_v48 = vshll.u32 %v7404_v29, 16  ;;  %v2938_v10 = vld [vmem:[#allocation3 + $0x30] sm:$0xf] }
 0x2f4   : > { %v2366_v55 = vpop.f32.mrf.mxu2  ;;  %v3387_v7 = vunpack.c.l.b16 %v3350_v27  ;;  %3189 = vmatmul.bf16.vlgmr.msrb.gmra.mxu1 %v3125_v47  ;;  %v3023_v11 = vor.u32 %v3022_v32, %v3019_v31  ;;  %v3031_v13 = vshrl.u32 %v2959_v43, 16  ;;  %v3034_v25 = vshll.u32 %v2959_v43, 16  ;;  %4003 = vmatpush.bf16.msra.mxu2 %v6204_v50  ;;  %v6203_v29 = vld [vmem:[%s7855_s5 + $0x168] sm:$0xff]  ;;  %v2941_v36 = vld [vmem:[#allocation3 + $0x34] sm:$0x1]  ;;  %v2614_v43 = vpop.f32.mrf.mxu3 }
 0x2f5   : > { %v2865_v20 = vor.u32 %v2863_v30, %v2862_v12  ;;  %v2866_v35 = vrot.slane %v2862_v12, 4  ;;  %v2816_v51 = vmax.f32 %v2808_v34, 0.0  ;;  %v2377_v6 = vadd.f32 %v2366_v55, %v2242_v62  ;;  %v6216_v62 = vld [vmem:[%s7855_s5 + $0x1b0] sm:$0xff]  ;;  %3832 = vmatpush.bf16.msra.mxu1 %v6193_v33  ;;  %v6215_v27 = vld [vmem:[%s7855_s5 + $0x1a8] sm:$0xff]  ;;  %v6202_v55 = vld [vmem:[%s7855_s5 + $0x160] sm:$0xff]  ;;  %v2788_v31 = vpop.f32.mrf.mxu0 }
 0x2f6   : > { %v3393_v28 = vpack.c.b16 %v3387_v7, %v3386_v8  ;;  %v3028_v4 = vrot.slane %v3026_v48, 5  ;;  %v3024_v39 = vrot.slane %v3023_v11, 4  ;;  %v3033_v61 = vrot.slane %v3031_v13, 4  ;;  %4138 = vmatpush.bf16.msra.mxu3 %v6216_v62  ;;  %4384 = vmatpush.bf16.msrb.mxu0 %v6224_v9  ;;  %v6223_v8 = vld [vmem:[%s7855_s5 + $0x1e8] sm:$0xff]  ;;  %v6192_v7 = vld [vmem:[%s7855_s5 + $0x110] sm:$0xff]  ;;  %v6201_v62 = vld [vmem:[%s7855_s5 + $0x158] sm:$0xff] }
 0x2f7   : > { %v2933_v52 = vsel %vm6608_vm7, %v2865_v20, %v2932_v24  ;;  %v2936_v60 = vsel %vm6520_vm2, %v2866_v35, %v2935_v40  ;;  %v2824_v38 = vpack.c.bf16 %v2816_v51, %v2816_v51  ;;  %v6179_v23 = vld [vmem:[#allocation3 + $0x1c] sm:$0xf0]  ;;  %v2623_v56 = vadd.f32 %v2612_v21, %v2377_v6 }
 0x2f8   : > { %2934 = vst [vmem:[#allocation3 + $0x28] sm:$0xf] %v2933_v52  ;;  %v5701_v19 = vor.u32 %v6179_v23, %v5700_v15  ;;  %v3040_v37 = vshll.u32 %v7422_v0, 16  ;;  %v7469_v44 = vld [vmem:[#allocation3 + $0x24] sm:$0x1]  ;;  %v3036_v26 = vrot.slane %v3034_v25, 5  ;;  %3461 = vmatmul.bf16.gmra.mxu3 %v3393_v28  ;;  %v3029_v0 = vsel %vm6683_vm13, %v3024_v39, %v3028_v4  ;;  %4004 = vmatpush.bf16.msra.mxu2 %v6203_v29 }
 0x2f9   : > { %2937 = vst [vmem:[#allocation3 + $0x2c] sm:$0x1] %v2936_v60  ;;  %v2868_v14 = vshrl.u32 %v2824_v38, 16  ;;  %v2797_v49 = vadd.f32 %v2786_v46, %v2623_v56  ;;  %v2871_v24 = vshll.u32 %v2824_v38, 16  ;;  %v3315_v18 = vld [vmem:[#allocation3 + $0x20] sm:$0xe]  ;;  %3833 = vmatpush.bf16.msra.mxu1 %v6192_v7  ;;  %v3119_v23 = vunpack.c.l.b16 %v3029_v0 }
 0x2fa   : > { %3595 = vmatmul.bf16.gmra.mxu0 %v5701_v19  ;;  %v3042_v34 = vrot.slane %v3040_v37, 5  ;;  %v2960_v57 = vld [vmem:[#allocation3 + $0x20] sm:$0xf]  ;;  %v3037_v21 = vor.u32 %v3036_v26, %v3033_v61  ;;  %v5626_v20 = vrot.slane %v3315_v18, 9  ;;  %v3353_v35 = vrot.slane %v7469_v44, 5  ;;  %4139 = vmatpush.bf16.msra.mxu3 %v6215_v27  ;;  %v6214_v28 = vld [vmem:[%s7855_s5 + $0x1a0] sm:$0xff] }
 0x2fb   : > { %v2870_v30 = vrot.slane %v2868_v14, 7  ;;  %v2809_v12 = vadd.f32 %v7288_v54, %v2797_v49  ;;  %v5584_v5 = vld [vmem:[#allocation3 + $0x20] sm:$0xf]  ;;  %v3045_v51 = vshrl.u32 %v2960_v57, 16  ;;  %4385 = vmatpush.bf16.msrb.mxu0 %v6223_v8  ;;  %v6222_v56 = vld [vmem:[%s7855_s5 + $0x1e0] sm:$0xff]  ;;  %v6213_v49 = vld [vmem:[%s7855_s5 + $0x198] sm:$0xff] }
 0x2fc   : > { %v2368_v40 = vpop.f32.mrf.mxu2  ;;  %v3038_v41 = vrot.slane %v3037_v21, 4  ;;  %4005 = vmatpush.bf16.msra.mxu2 %v6202_v55  ;;  %v3354_v33 = vsel %vm6669_vm12, %v5626_v20, %v3353_v35  ;;  %v2944_v61 = vld [vmem:[#allocation3 + $0x38] sm:$0xf]  ;;  %v2947_v37 = vld [vmem:[#allocation3 + $0x3c] sm:$0x1]  ;;  %v6212_v8 = vld [vmem:[%s7855_s5 + $0x190] sm:$0xff] }
 0x2fd   : > { %v2873_v1 = vor.u32 %v2871_v24, %v2870_v30  ;;  %v2874_v3 = vrot.slane %v2870_v30, 4  ;;  %v2378_v53 = vadd.f32 %v2368_v40, %v2243_v2  ;;  %v2817_v16 = vmax.f32 %v2809_v12, 0.0  ;;  %v6221_v12 = vld [vmem:[%s7855_s5 + $0x1d8] sm:$0xff]  ;;  %v6199_v20 = vld [vmem:[%s7855_s5 + $0x148] sm:$0xff] }
 0x2fe   : > { %v3043_v15 = vsel %vm6683_vm13, %v3038_v41, %v3042_v34  ;;  %v3047_v29 = vrot.slane %v3045_v51, 4  ;;  %4140 = vmatpush.bf16.msra.mxu3 %v6214_v28  ;;  %v3388_v26 = vunpack.c.l.b16 %v3354_v33  ;;  %v6219_v33 = vld [vmem:[%s7855_s5 + $0x1c8] sm:$0xff] }
 0x2ff   : > { %v2939_v47 = vsel %vm6608_vm7, %v2873_v1, %v2938_v10  ;;  %v2942_v45 = vsel %vm6520_vm2, %v2874_v3, %v2941_v36  ;;  %v2624_v50 = vadd.f32 %v2614_v43, %v2378_v53  ;;  %v6152_v46 = vld [vmem:[#allocation3 + $0x24] sm:$0xf0]  ;;  %v2825_v32 = vpack.c.bf16 %v2817_v16, %v2817_v16  ;;  %v6200_v36 = vld [vmem:[%s7855_s5 + $0x150] sm:$0xff]  ;;  %4386 = vmatpush.bf16.msrb.mxu0 %v6222_v56 }
 0x300   : > { %v3316_v6 = vld [vmem:[#allocation3 + $0x28] sm:$0xe]  ;;  %2940 = vst [vmem:[#allocation3 + $0x30] sm:$0xf] %v2939_v47  ;;  %v5585_v17 = vor.u32 %v6152_v46, %v5584_v5  ;;  %v7499_v52 = vld [vmem:[#allocation3 + $0x2c] sm:$0x1]  ;;  %v3120_v13 = vunpack.c.l.b16 %v3043_v15  ;;  %4006 = vmatpush.bf16.msra.mxu2 %v6201_v62 }
 0x301   : > { %v5627_v60 = vrot.slane %v3316_v6, 9  ;;  %2943 = vst [vmem:[#allocation3 + $0x34] sm:$0x1] %v2942_v45  ;;  %v2798_v38 = vadd.f32 %v2788_v31, %v2624_v50  ;;  %v3357_v48 = vrot.slane %v7499_v52, 5  ;;  %v2876_v19 = vshrl.u32 %v2825_v32, 16  ;;  %v6191_v50 = vld [vmem:[%s7855_s5 + $0x108] sm:$0xff] }
 0x302   : > { %v2879_v11 = vshll.u32 %v2825_v32, 16  ;;  %3300 = vmatmul.bf16.gmra.mxu2 %v5585_v17  ;;  %v2961_v14 = vld [vmem:[#allocation3 + $0x28] sm:$0xf]  ;;  %v3048_v10 = vshll.u32 %v2960_v57, 16  ;;  %v3126_v9 = vpack.c.b16 %v3120_v13, %v3119_v23  ;;  %v3054_v57 = vshll.u32 %v7469_v44, 16  ;;  %4141 = vmatpush.bf16.msra.mxu3 %v6213_v49  ;;  %v6198_v13 = vld [vmem:[%s7855_s5 + $0x140] sm:$0xff] }
 0x303   : > { %v2810_v4 = vadd.f32 %v7288_v54, %v2798_v38  ;;  %v3358_v25 = vsel %vm6669_vm12, %v5627_v60, %v3357_v48  ;;  %v2878_v39 = vrot.slane %v2876_v19, 7  ;;  %v3059_v24 = vshrl.u32 %v2961_v14, 16  ;;  %v5704_v34 = vld [vmem:[#allocation3 + $0x28] sm:$0xf]  ;;  %4387 = vmatpush.bf16.msrb.mxu0 %v6221_v12  ;;  %v2950_v46 = vld [vmem:[#allocation3 + $0x40] sm:$0xf]  ;;  %3834 = vmatpush.bf16.msra.mxu1 %v6191_v50 }
 0x304   : > { %v3389_v30 = vunpack.c.l.b16 %v3358_v25  ;;  %v3050_v18 = vrot.slane %v3048_v10, 5  ;;  %v3062_v54 = vshll.u32 %v2961_v14, 16  ;;  %3194 = vmatmul.bf16.gmra.mxu1 %v3126_v9  ;;  %v3068_v55 = vshll.u32 %v7499_v52, 16  ;;  %4007 = vmatpush.bf16.msra.mxu2 %v6200_v36  ;;  %v6220_v60 = vld [vmem:[%s7855_s5 + $0x1d0] sm:$0xff]  ;;  %v6211_v38 = vld [vmem:[%s7855_s5 + $0x188] sm:$0xff] }
 0x305   : > { %v2818_v2 = vmax.f32 %v2810_v4, 0.0  ;;  %v2881_v40 = vor.u32 %v2879_v11, %v2878_v39  ;;  %v2882_v0 = vrot.slane %v2878_v39, 4  ;;  %v3061_v27 = vrot.slane %v3059_v24, 4  ;;  %v2953_v15 = vld [vmem:[#allocation3 + $0x44] sm:$0x1]  ;;  %v6210_v24 = vld [vmem:[%s7855_s5 + $0x180] sm:$0xff] }
 0x306   : > { %v3051_v53 = vor.u32 %v3050_v18, %v3047_v29  ;;  %v3064_v21 = vrot.slane %v3062_v54, 5  ;;  %v3394_v44 = vpack.c.b16 %v3389_v30, %v3388_v26  ;;  %v3070_v17 = vrot.slane %v3068_v55, 5  ;;  %4142 = vmatpush.bf16.msra.mxu3 %v6212_v8  ;;  %v6190_v29 = vld [vmem:[%s7855_s5 + $0x100] sm:$0xff]  ;;  %v7571_v9 = vld [vmem:[#allocation3 + $0x8] sm:$0xe] }
 0x307   : > { %v2826_v1 = vpack.c.bf16 %v2818_v2, %v2818_v2  ;;  %v6180_v3 = vld [vmem:[#allocation3 + $0x2c] sm:$0xf0]  ;;  %v2945_v7 = vsel %vm6608_vm7, %v2881_v40, %v2944_v61  ;;  %v2948_v43 = vsel %vm6520_vm2, %v2882_v0, %v2947_v37  ;;  %v3056_v23 = vrot.slane %v3054_v57, 5  ;;  %4388 = vmatpush.bf16.msrb.mxu0 %v6220_v60  ;;  %v7569_v37 = vld [vmem:[#allocation3 + $0xc] sm:$0x1]  ;;  %3835 = vmatpush.bf16.msra.mxu1 %v6190_v29 }
 0x308   : > { %v5705_v16 = vor.u32 %v6180_v3, %v5704_v34  ;;  %v7533_v5 = vld [vmem:[#allocation3 + $0x34] sm:$0x1]  ;;  %v2962_v35 = vld [vmem:[#allocation3 + $0x30] sm:$0xf]  ;;  %2946 = vst [vmem:[#allocation3 + $0x38] sm:$0xf] %v2945_v7  ;;  %v3065_v47 = vor.u32 %v3064_v21, %v3061_v27  ;;  %3466 = vmatmul.bf16.gmra.mxu3 %v3394_v44  ;;  %4008 = vmatpush.bf16.msra.mxu2 %v6199_v20 }
 0x309   : > { %v2884_v51 = vshrl.u32 %v2826_v1, 16  ;;  %v3317_v45 = vld [vmem:[#allocation3 + $0x30] sm:$0xe]  ;;  %2949 = vst [vmem:[#allocation3 + $0x3c] sm:$0x1] %v2948_v43  ;;  %v2887_v41 = vshll.u32 %v2826_v1, 16 }
 0x30a   : > { %3600 = vmatmul.bf16.gmra.mxu0 %v5705_v16  ;;  %v3052_v6 = vrot.slane %v3051_v53, 4  ;;  %v3073_v28 = vshrl.u32 %v2962_v35, 16  ;;  %v3066_v32 = vrot.slane %v3065_v47, 4  ;;  %v3076_v52 = vshll.u32 %v2962_v35, 16  ;;  %v5588_v4 = vld [vmem:[#allocation3 + $0x30] sm:$0xf]  ;;  %4143 = vmatpush.bf16.msra.mxu3 %v6211_v38 }
 0x30b   : > { %v2886_v31 = vrot.slane %v2884_v51, 7  ;;  %v5628_v48 = vrot.slane %v3317_v45, 9  ;;  %v3361_v62 = vrot.slane %v7533_v5, 5  ;;  %v7573_v30 = vld [vmem:[#allocation3 + $0x10] sm:$0xe]  ;;  %4389 = vmatpush.bf16.msrb.mxu0 %v6219_v33  ;;  %v3082_v57 = vshll.u32 %v7533_v5, 16 }
 0x30c   : > { %v3071_v11 = vsel %vm6683_vm13, %v3066_v32, %v3070_v17  ;;  %v3057_v14 = vsel %vm6683_vm13, %v3052_v6, %v3056_v23  ;;  %v7558_v25 = vrot.slane %v3073_v28, 4  ;;  %v7567_v61 = vrot.slane %v3076_v52, 5  ;;  %4009 = vmatpush.bf16.msra.mxu2 %v6198_v13  ;;  %v6218_v40 = vld [vmem:[%s7855_s5 + $0x1c0] sm:$0xff]  ;;  %v4176_v16 = vld [vmem:[#allocation3 + $0x18] sm:$0xf]  ;;  %v6233_v52 = vld [vmem:[%s7855_s5 + $0x238] sm:$0xff] }
 0x30d   : > { %v2889_v56 = vor.u32 %v2887_v41, %v2886_v31  ;;  %v2890_v19 = vrot.slane %v2886_v31, 4  ;;  %v3122_v39 = vunpack.c.l.b16 %v3071_v11  ;;  %v3362_v26 = vsel %vm6669_vm12, %v5628_v48, %v3361_v62  ;;  %v7584_v21 = vld [vmem:[#allocation3 + $0x14] sm:$0x1]  ;;  %v4174_v55 = vld [vmem:[#allocation3 + $0x10] sm:$0xf]  ;;  %4557 = vmatpush.bf16.msrb.mxu1 %v6233_v52  ;;  %v6232_v13 = vld [vmem:[%s7855_s5 + $0x230] sm:$0xff] }
 0x30e   : > { %v3121_v18 = vunpack.c.l.b16 %v3057_v14  ;;  %v3390_v1 = vunpack.c.l.b16 %v3362_v26  ;;  %4144 = vmatpush.bf16.msra.mxu3 %v6210_v24  ;;  %v5790_v7 = vrot.slane %v7571_v9, 9  ;;  %v3891_v43 = vrot.slane %v7569_v37, 5  ;;  %v7594_v32 = vld [vmem:[#allocation3 + $0x1c] sm:$0x1]  ;;  %v3619_v48 = vld [vmem:[#allocation3 + $0x8] sm:$0xf] }
 0x30f   : > { %v2951_v10 = vsel %vm6608_vm7, %v2889_v56, %v2950_v46  ;;  %v2954_v49 = vsel %vm6520_vm2, %v2890_v19, %v2953_v15  ;;  %v6153_v42 = vld [vmem:[#allocation3 + $0x34] sm:$0xf0]  ;;  %v5791_v44 = vrot.slane %v7573_v30, 9  ;;  %v3079_v20 = vor.u32 %v7567_v61, %v7558_v25  ;;  %4390 = vmatpush.bf16.msrb.mxu0 %v6218_v40  ;;  %v3621_v11 = vld [vmem:[#allocation3 + $0x10] sm:$0xf] }
 0x310   : > { %2952 = vst [vmem:[#allocation3 + $0x40] sm:$0xf] %v2951_v10  ;;  %v3318_v2 = vld [vmem:[#allocation3 + $0x38] sm:$0xe]  ;;  %v5589_v54 = vor.u32 %v6153_v42, %v5588_v4  ;;  %v2987_v36 = vld [vmem:[#allocation3 + $0x3c] sm:$0x1]  ;;  %v3127_v27 = vpack.c.b16 %v3122_v39, %v3121_v18  ;;  %v3892_v10 = vsel %vm6669_vm12, %v5790_v7, %v3891_v43 }
 0x311   : > { %2955 = vst [vmem:[#allocation3 + $0x44] sm:$0x1] %v2954_v49  ;;  %v5629_v12 = vrot.slane %v3318_v2, 9  ;;  %v3365_v0 = vrot.slane %v2987_v36, 5  ;;  %v2963_v34 = vld [vmem:[#allocation3 + $0x38] sm:$0xf]  ;;  %4558 = vmatpush.bf16.msrb.mxu1 %v6232_v13  ;;  %v3938_v40 = vunpack.c.l.b16 %v3892_v10 }
 0x312   : > { %3305 = vmatmul.bf16.gmra.mxu2 %v5589_v54  ;;  %v3087_v3 = vshrl.u32 %v2963_v34, 16  ;;  %v3090_v53 = vshll.u32 %v2963_v34, 16  ;;  %v5708_v47 = vld [vmem:[#allocation3 + $0x38] sm:$0xf]  ;;  %v3096_v45 = vshll.u32 %v2987_v36, 16  ;;  %v3895_v50 = vrot.slane %v7584_v21, 5 }
 0x313   : > { %v3366_v8 = vsel %vm6669_vm12, %v5629_v12, %v3365_v0  ;;  %v4191_v41 = vshrl.u32 %v4174_v55, 16  ;;  %v4194_v46 = vshll.u32 %v4174_v55, 16  ;;  %v4205_v17 = vshrl.u32 %v4176_v16, 16  ;;  %v7604_v25 = vld [vmem:[#allocation3 + $0x14] sm:$0x1] }
 0x314   : > { %v3391_v5 = vunpack.c.l.b16 %v3366_v8  ;;  %v3089_v35 = vrot.slane %v3087_v3, 4  ;;  %v3092_v51 = vrot.slane %v3090_v53, 5  ;;  %3199 = vmatmul.bf16.gmra.mxu1 %v3127_v27  ;;  %v4208_v23 = vshll.u32 %v4176_v16, 16  ;;  %v3868_v16 = vld [vmem:[#allocation3 + $0x20] sm:$0xe] }
 0x315   : > { %v4193_v38 = vrot.slane %v4191_v41, 4  ;;  %v4196_v15 = vrot.slane %v4194_v46, 5  ;;  %v3084_v62 = vrot.slane %v3082_v57, 5  ;;  %v4207_v19 = vrot.slane %v4205_v17, 4  ;;  %v4178_v57 = vld [vmem:[#allocation3 + $0x20] sm:$0xf] }
 0x316   : > { %v3395_v6 = vpack.c.b16 %v3391_v5, %v3390_v1  ;;  %v3093_v31 = vor.u32 %v3092_v51, %v3089_v35  ;;  %v3080_v33 = vrot.slane %v3079_v20, 4  ;;  %v3098_v14 = vrot.slane %v3096_v45, 5  ;;  %v4180_v5 = vld [vmem:[#allocation3 + $0x28] sm:$0xf]  ;;  %v3625_v13 = vld [vmem:[#allocation3 + $0x20] sm:$0xf] }
 0x317   : > { %v6181_v28 = vld [vmem:[#allocation3 + $0x3c] sm:$0xf0]  ;;  %v3896_v4 = vsel %vm6669_vm12, %v5791_v44, %v3895_v50  ;;  %v4210_v29 = vrot.slane %v4208_v23, 5  ;;  %v4197_v49 = vor.u32 %v4196_v15, %v4193_v38  ;;  %v4214_v39 = vshll.u32 %v7594_v32, 16  ;;  %v7616_v44 = vld [vmem:[#allocation3 + $0x24] sm:$0x1] }
 0x318   : > { %v5709_v60 = vor.u32 %v6181_v28, %v5708_v47  ;;  %v3094_v56 = vrot.slane %v3093_v31, 4  ;;  %v3636_v61 = vshrl.u32 %v3619_v48, 16  ;;  %3471 = vmatmul.bf16.gmra.mxu3 %v3395_v6  ;;  %v3639_v24 = vshll.u32 %v3619_v48, 16  ;;  %v7621_v6 = vld [vmem:[#allocation3 + $0x1c] sm:$0x1] }
 0x319   : > { %v4211_v30 = vor.u32 %v4210_v29, %v4207_v19  ;;  %v3650_v42 = vshrl.u32 %v3621_v11, 16  ;;  %v3939_v2 = vunpack.c.l.b16 %v3896_v4  ;;  %v4200_v26 = vshll.u32 %v7604_v25, 16  ;;  %v3867_v28 = vld [vmem:[#allocation3 + $0x18] sm:$0xe]  ;;  %v5864_v38 = vld [vmem:[#allocation3 + $0x10] sm:$0xf] }
 0x31a   : > { %3605 = vmatmul.bf16.gmra.mxu0 %v5709_v60  ;;  %v3099_v9 = vsel %vm6683_vm13, %v3094_v56, %v3098_v14  ;;  %v3653_v18 = vshll.u32 %v3621_v11, 16  ;;  %v3085_v54 = vsel %vm6683_vm13, %v3080_v33, %v3084_v62  ;;  %v4198_v0 = vrot.slane %v4197_v49, 4  ;;  %v6206_v15 = vld [vmem:[#allocation3 + $0x14] sm:$0xf0]  ;;  %v7629_v29 = vld [vmem:[#allocation3 + $0x2c] sm:$0x1] }
 0x31b   : > { %v4212_v36 = vrot.slane %v4211_v30, 4  ;;  %v3124_v12 = vunpack.c.l.b16 %v3099_v9  ;;  %v4216_v34 = vrot.slane %v4214_v39, 5  ;;  %v3638_v27 = vrot.slane %v3636_v61, 4  ;;  %v7633_v30 = vld [vmem:[#allocation3 + $0x24] sm:$0x1] }
 0x31c   : > { %v3641_v1 = vrot.slane %v3639_v24, 5  ;;  %v3652_v3 = vrot.slane %v3650_v42, 4  ;;  %v3655_v53 = vrot.slane %v3653_v18, 5  ;;  %v3123_v55 = vunpack.c.l.b16 %v3085_v54  ;;  %v6230_v24 = vld [vmem:[%s7855_s5 + $0x220] sm:$0xff] }
 0x31d   : > { %v3946_v8 = vpack.c.b16 %v3939_v2, %v3938_v40  ;;  %v4202_v7 = vrot.slane %v4200_v26, 5  ;;  %v4217_v43 = vsel %vm6683_vm13, %v4212_v36, %v4216_v34  ;;  %v4219_v20 = vshrl.u32 %v4178_v57, 16  ;;  %v3623_v26 = vld [vmem:[#allocation3 + $0x18] sm:$0xf] }
 0x31e   : > { %v4222_v35 = vshll.u32 %v4178_v57, 16  ;;  %v3128_v51 = vpack.c.b16 %v3124_v12, %v3123_v55  ;;  %v4320_v45 = vunpack.c.l.b16 %v4217_v43  ;;  %v3642_v50 = vor.u32 %v3641_v1, %v3638_v27 }
 0x31f   : > { %v4203_v47 = vsel %vm6683_vm13, %v4198_v0, %v4202_v7  ;;  %v3645_v41 = vshll.u32 %v7569_v37, 16  ;;  %v3656_v46 = vor.u32 %v3655_v53, %v3652_v3  ;;  %v3659_v31 = vshll.u32 %v7584_v21, 16  ;;  %v6231_v21 = vld [vmem:[%s7855_s5 + $0x228] sm:$0xff] }
 0x320   : > { %v5793_v17 = vrot.slane %v3868_v16, 9  ;;  %v3903_v52 = vrot.slane %v7616_v44, 5  ;;  %v4233_v60 = vshrl.u32 %v4180_v5, 16  ;;  %v4319_v23 = vunpack.c.l.b16 %v4203_v47  ;;  %4559 = vmatpush.bf16.msrb.mxu1 %v6231_v21 }
 0x321   : > { %v4221_v48 = vrot.slane %v4219_v20, 4  ;;  %v4224_v62 = vrot.slane %v4222_v35, 5  ;;  %v4236_v56 = vshll.u32 %v4180_v5, 16  ;;  %v5792_v19 = vrot.slane %v3867_v28, 9  ;;  %v4184_v5 = vld [vmem:[#allocation3 + $0x38] sm:$0xf] }
 0x322   : > { %4010 = vmatmul.bf16.vlgmr.msra.gmra.mxu2 %v3946_v8  ;;  %v3899_v37 = vrot.slane %v7621_v6, 5  ;;  %v4235_v11 = vrot.slane %v4233_v60, 4  ;;  %v4327_v33 = vpack.c.b16 %v4320_v45, %v4319_v23  ;;  %v3643_v14 = vrot.slane %v3642_v50, 4 }
 0x323   : > { %v3657_v4 = vrot.slane %v3656_v46, 4  ;;  %v4238_v10 = vrot.slane %v4236_v56, 5  ;;  %v5865_v49 = vor.u32 %v6206_v15, %v5864_v38  ;;  %v3647_v39 = vrot.slane %v3645_v41, 5  ;;  %v3869_v46 = vld [vmem:[#allocation3 + $0x28] sm:$0xe] }
 0x324   : > { %3204 = vmatmul.bf16.gmra.mxu1 %v3128_v51  ;;  %v3661_v61 = vrot.slane %v3659_v31, 5  ;;  %v3904_v9 = vsel %vm6669_vm12, %v5793_v17, %v3903_v52  ;;  %v4225_v42 = vor.u32 %v4224_v62, %v4221_v48  ;;  %v3678_v18 = vshrl.u32 %v3625_v13, 16  ;;  %v4182_v51 = vld [vmem:[#allocation3 + $0x30] sm:$0xf]  ;;  %v7650_v17 = vld [vmem:[#allocation3 + $0x2c] sm:$0x1] }
 0x325   : > { %v4239_v2 = vor.u32 %v4238_v10, %v4235_v11  ;;  %v3681_v54 = vshll.u32 %v3625_v13, 16  ;;  %v4242_v36 = vshll.u32 %v7629_v29, 16  ;;  %v3648_v12 = vsel %vm6683_vm13, %v3643_v14, %v3647_v39  ;;  %4560 = vmatpush.bf16.msrb.mxu1 %v6230_v24  ;;  %v7652_v52 = vld [vmem:[#allocation3 + $0x34] sm:$0x1]  ;;  %v3870_v15 = vld [vmem:[#allocation3 + $0x30] sm:$0xe] }
 0x326   : > { %v3662_v40 = vsel %vm6683_vm13, %v3657_v4, %v3661_v61  ;;  %v3900_v0 = vsel %vm6669_vm12, %v5792_v19, %v3899_v37  ;;  %v4228_v34 = vshll.u32 %v7633_v30, 16  ;;  %v3941_v57 = vunpack.c.l.b16 %v3904_v9  ;;  %v6207_v4 = vld [vmem:[#allocation3 + $0x24] sm:$0xf0]  ;;  %v5868_v9 = vld [vmem:[#allocation3 + $0x20] sm:$0xf] }
 0x327   : > { %v4240_v27 = vrot.slane %v4239_v2, 4  ;;  %v3664_v1 = vshrl.u32 %v3623_v26, 16  ;;  %v3667_v3 = vshll.u32 %v3623_v26, 16  ;;  %v4226_v53 = vrot.slane %v4225_v42, 4  ;;  %v7661_v26 = vld [vmem:[#allocation3 + $0x3c] sm:$0x1] }
 0x328   : > { %4145 = vmatmul.bf16.vlgmr.msra.gmra.mxu3 %v5865_v49  ;;  %v3680_v55 = vrot.slane %v3678_v18, 4  ;;  %v3683_v8 = vrot.slane %v3681_v54, 5  ;;  %v3765_v7 = vunpack.c.l.b16 %v3662_v40  ;;  %v3940_v43 = vunpack.c.l.b16 %v3900_v0  ;;  %v3629_v18 = vld [vmem:[#allocation3 + $0x30] sm:$0xf]  ;;  %v6228_v0 = vld [vmem:[%s7855_s5 + $0x210] sm:$0xff] }
 0x329   : > { %v4244_v16 = vrot.slane %v4242_v36, 5  ;;  %v3764_v20 = vunpack.c.l.b16 %v3648_v12  ;;  %v4230_v35 = vrot.slane %v4228_v34, 5  ;;  %v3666_v50 = vrot.slane %v3664_v1, 4  ;;  %v7663_v12 = vld [vmem:[#allocation3 + $0x34] sm:$0x1] }
 0x32a   : > { %4391 = vmatmul.bf16.vlgmr.msrb.gmra.mxu0 %v4327_v33  ;;  %v3947_v47 = vpack.c.b16 %v3941_v57, %v3940_v43  ;;  %v3669_v41 = vrot.slane %v3667_v3, 5  ;;  %v3684_v31 = vor.u32 %v3683_v8, %v3680_v55  ;;  %v4261_v60 = vshrl.u32 %v4184_v5, 16  ;;  %v382_v3 = vld [vmem:[#allocation3 + $0x48] sm:$0x1] }
 0x32b   : > { %v4245_v45 = vsel %vm6683_vm13, %v4240_v27, %v4244_v16  ;;  %v4231_v28 = vsel %vm6683_vm13, %v4226_v53, %v4230_v35  ;;  %v3772_v38 = vpack.c.b16 %v3765_v7, %v3764_v20  ;;  %v4247_v23 = vshrl.u32 %v4182_v51, 16  ;;  %v3627_v8 = vld [vmem:[#allocation3 + $0x28] sm:$0xf]  ;;  %v412_v20 = vld [vmem:[#allocation3 + $0x4c] sm:$0x1] }
 0x32c   : > { %v4250_v48 = vshll.u32 %v4182_v51, 16  ;;  %v4264_v62 = vshll.u32 %v4184_v5, 16  ;;  %v4322_v56 = vunpack.c.l.b16 %v4245_v45  ;;  %v3673_v19 = vshll.u32 %v7621_v6, 16 }
 0x32d   : > { %v3687_v37 = vshll.u32 %v7616_v44, 16  ;;  %v5794_v11 = vrot.slane %v3869_v46, 9  ;;  %v4321_v13 = vunpack.c.l.b16 %v4231_v28  ;;  %v3670_v21 = vor.u32 %v3669_v41, %v3666_v50  ;;  %v6229_v44 = vld [vmem:[%s7855_s5 + $0x218] sm:$0xff] }
 0x32e   : > { %v4263_v33 = vrot.slane %v4261_v60, 4  ;;  %v4266_v14 = vrot.slane %v4264_v62, 5  ;;  %v3685_v10 = vrot.slane %v3684_v31, 4  ;;  %v3907_v49 = vrot.slane %v7650_v17, 5  ;;  %4561 = vmatpush.bf16.msrb.mxu1 %v6229_v44  ;;  %v4186_v31 = vld [vmem:[#allocation3 + $0x40] sm:$0xf] }
 0x32f   : > { %v5795_v39 = vrot.slane %v3870_v15, 9  ;;  %v3911_v61 = vrot.slane %v7652_v52, 5  ;;  %v4249_v24 = vrot.slane %v4247_v23, 4  ;;  %v4252_v42 = vrot.slane %v4250_v48, 5  ;;  %v7682_v62 = vld [vmem:[#allocation3 + $0x3c] sm:$0x1] }
 0x330   : > { %v4328_v6 = vpack.c.b16 %v4322_v56, %v4321_v13  ;;  %v3689_v2 = vrot.slane %v3687_v37, 5  ;;  %v5869_v54 = vor.u32 %v6207_v4, %v5868_v9  ;;  %v3671_v36 = vrot.slane %v3670_v21, 4  ;;  %v3871_v56 = vld [vmem:[#allocation3 + $0x38] sm:$0xe]  ;;  %v3872_v13 = vld [vmem:[#allocation3 + $0x40] sm:$0xe] }
 0x331   : > { %v4267_v40 = vor.u32 %v4266_v14, %v4263_v33  ;;  %v3675_v34 = vrot.slane %v3673_v19, 5  ;;  %v3908_v27 = vsel %vm6669_vm12, %v5794_v11, %v3907_v49  ;;  %v3912_v1 = vsel %vm6669_vm12, %v5795_v39, %v3911_v61  ;;  %v7686_v11 = vld [vmem:[#allocation3 + $0x44] sm:$0x1] }
 0x332   : > { %4015 = vmatmul.bf16.gmra.mxu2 %v3947_v47  ;;  %v3690_v57 = vsel %vm6683_vm13, %v3685_v10, %v3689_v2  ;;  %v4253_v53 = vor.u32 %v4252_v42, %v4249_v24  ;;  %v4270_v55 = vshll.u32 %v7661_v26, 16  ;;  %v3706_v7 = vshrl.u32 %v3629_v18, 16  ;;  %4562 = vmatpush.bf16.msrb.mxu1 %v6228_v0 }
 0x333   : > { %v3709_v43 = vshll.u32 %v3629_v18, 16  ;;  %v4256_v16 = vshll.u32 %v7663_v12, 16  ;;  %v383_v5 = vsel %vm6520_vm2, 0, %v382_v3  ;;  %v3676_v35 = vsel %vm6683_vm13, %v3671_v36, %v3675_v34  ;;  %v4420_v36 = vld [vmem:[#allocation3 + $0x10] sm:$0xe] }
 0x334   : > { %3836 = vmatmul.bf16.vlgmr.msra.gmra.mxu1 %v3772_v38  ;;  %v3942_v51 = vunpack.c.l.b16 %v3908_v27  ;;  %v3943_v47 = vunpack.c.l.b16 %v3912_v1  ;;  %v4268_v45 = vrot.slane %v4267_v40, 4  ;;  %384 = vst [vmem:[#allocation3 + $0x48] sm:$0x1] %v383_v5  ;;  %v3767_v50 = vunpack.c.l.b16 %v3690_v57  ;;  %v6208_v57 = vld [vmem:[#allocation3 + $0x34] sm:$0xf0] }
 0x335   : > { %v3692_v41 = vshrl.u32 %v3627_v8, 16  ;;  %v3695_v46 = vshll.u32 %v3627_v8, 16  ;;  %v413_v28 = vsel %vm6527_vm4, 0, %v412_v20  ;;  %v4254_v60 = vrot.slane %v4253_v53, 4  ;;  %v5872_v5 = vld [vmem:[#allocation3 + $0x30] sm:$0xf] }
 0x336   : > { %v4272_v38 = vrot.slane %v4270_v55, 5  ;;  %v3708_v58 = vrot.slane %v3706_v7, 4  ;;  %v3711_v15 = vrot.slane %v3709_v43, 5  ;;  %414 = vst [vmem:[#allocation3 + $0x4c] sm:$0x1] %v413_v28  ;;  %v3766_v23 = vunpack.c.l.b16 %v3676_v35  ;;  %v6227_v55 = vld [vmem:[%s7855_s5 + $0x208] sm:$0xff] }
 0x337   : > { %v4258_v48 = vrot.slane %v4256_v16, 5  ;;  %v3948_v19 = vpack.c.b16 %v3943_v47, %v3942_v51  ;;  %v4275_v63 = vshrl.u32 %v4186_v31, 16  ;;  %v4278_v21 = vshll.u32 %v4186_v31, 16  ;;  %v7699_v43 = vld [vmem:[#allocation3 + $0x44] sm:$0x1]  ;;  %4563 = vmatpush.bf16.msrb.mxu1 %v6227_v55 }
 0x338   : > { %4150 = vmatmul.bf16.gmra.mxu3 %v5869_v54  ;;  %v4273_v37 = vsel %vm6683_vm13, %v4268_v45, %v4272_v38  ;;  %v3773_v33 = vpack.c.b16 %v3767_v50, %v3766_v23  ;;  %v3694_v14 = vrot.slane %v3692_v41, 4  ;;  %v3697_v10 = vrot.slane %v3695_v46, 5  ;;  %v6226_v45 = vld [vmem:[%s7855_s5 + $0x200] sm:$0xff]  ;;  %v3631_v28 = vld [vmem:[#allocation3 + $0x38] sm:$0xf] }
 0x339   : > { %v4259_v4 = vsel %vm6683_vm13, %v4254_v60, %v4258_v48  ;;  %v3712_v49 = vor.u32 %v3711_v15, %v3708_v58  ;;  %v5796_v39 = vrot.slane %v3871_v56, 9  ;;  %v4324_v61 = vunpack.c.l.b16 %v4273_v37  ;;  %v3633_v38 = vld [vmem:[#allocation3 + $0x40] sm:$0xf]  ;;  %v4421_v58 = vld [vmem:[#allocation3 + $0x18] sm:$0xe] }
 0x33a   : > { %4396 = vmatmul.bf16.gmra.mxu0 %v4328_v6  ;;  %v3915_v9 = vrot.slane %v7682_v62, 5  ;;  %v5797_v24 = vrot.slane %v3872_v13, 9  ;;  %v3919_v42 = vrot.slane %v7686_v11, 5  ;;  %v4277_v6 = vrot.slane %v4275_v63, 4 }
 0x33b   : > { %v4188_v44 = vld [vmem:[#allocation3 + $0x48] sm:$0xf]  ;;  %v4280_v2 = vrot.slane %v4278_v21, 5  ;;  %v4323_v40 = vunpack.c.l.b16 %v4259_v4  ;;  %v3701_v0 = vshll.u32 %v7650_v17, 16  ;;  %v3715_v34 = vshll.u32 %v7652_v52, 16  ;;  %4564 = vmatpush.bf16.msrb.mxu1 %v6226_v45 }
 0x33c   : > { %v4289_v18 = vshrl.u32 %v4188_v44, 16  ;;  %v4292_v54 = vshll.u32 %v4188_v44, 16  ;;  %v3698_v27 = vor.u32 %v3697_v10, %v3694_v14  ;;  %v3713_v1 = vrot.slane %v3712_v49, 4 }
 0x33d   : > { %v4329_v8 = vpack.c.b16 %v4324_v61, %v4323_v40  ;;  %v3916_v7 = vsel %vm6669_vm12, %v5796_v39, %v3915_v9  ;;  %v7701_v16 = vld [vmem:[#allocation3 + $0x4c] sm:$0x1]  ;;  %v5958_v17 = vrot.slane %v4420_v36, 9  ;;  %v4446_v52 = vrot.slane %v7604_v25, 5 }
 0x33e   : > { %v4291_v3 = vrot.slane %v4289_v18, 4  ;;  %v4294_v53 = vrot.slane %v4292_v54, 5  ;;  %v3920_v20 = vsel %vm6669_vm12, %v5797_v24, %v3919_v42  ;;  %v4281_v35 = vor.u32 %v4280_v2, %v4277_v6 }
 0x33f   : > { %v4298_v47 = vshll.u32 %v7701_v16, 16  ;;  %v5873_v50 = vor.u32 %v6208_v57, %v5872_v5  ;;  %v3703_v41 = vrot.slane %v3701_v0, 5  ;;  %v3717_v46 = vrot.slane %v3715_v34, 5 }
 0x340   : > { %v4295_v51 = vor.u32 %v4294_v53, %v4291_v3  ;;  %v3699_v31 = vrot.slane %v3698_v27, 4  ;;  %v3944_v25 = vunpack.c.l.b16 %v3916_v7  ;;  %v4284_v60 = vshll.u32 %v7699_v43, 16  ;;  %v4422_v27 = vld [vmem:[#allocation3 + $0x20] sm:$0xe]  ;;  %v6209_v53 = vld [vmem:[#allocation3 + $0x44] sm:$0xf0] }
 0x341   : > { %v3945_v15 = vunpack.c.l.b16 %v3920_v20  ;;  %v4447_v23 = vsel %vm6669_vm12, %v5958_v17, %v4446_v52  ;;  %v5959_v48 = vrot.slane %v4421_v58, 9  ;;  %v4450_v56 = vrot.slane %v7594_v32, 5  ;;  %v5876_v3 = vld [vmem:[#allocation3 + $0x40] sm:$0xf] }
 0x342   : > { %4020 = vmatmul.bf16.gmra.mxu2 %v3948_v19  ;;  %v3718_v19 = vsel %vm6683_vm13, %v3713_v1, %v3717_v46  ;;  %v4282_v37 = vrot.slane %v4281_v35, 4  ;;  %v4296_v13 = vrot.slane %v4295_v51, 4  ;;  %v4300_v63 = vrot.slane %v4298_v47, 5  ;;  %v4423_v47 = vld [vmem:[#allocation3 + $0x28] sm:$0xe] }
 0x343   : > { %v3720_v21 = vshrl.u32 %v3631_v28, 16  ;;  %v3737_v14 = vshll.u32 %v3633_v38, 16  ;;  %v4451_v4 = vsel %vm6669_vm12, %v5959_v48, %v4450_v56  ;;  %v4286_v10 = vrot.slane %v4284_v60, 5 }
 0x344   : > { %3841 = vmatmul.bf16.gmra.mxu1 %v3773_v33  ;;  %v3734_v33 = vshrl.u32 %v3633_v38, 16  ;;  %v3723_v49 = vshll.u32 %v3631_v28, 16  ;;  %v4493_v39 = vunpack.c.l.b16 %v4447_v23  ;;  %v4494_v61 = vunpack.c.l.b16 %v4451_v4  ;;  %v4424_v23 = vld [vmem:[#allocation3 + $0x30] sm:$0xe] }
 0x345   : > { %v3704_v32 = vsel %vm6683_vm13, %v3699_v31, %v3703_v41  ;;  %v3769_v9 = vunpack.c.l.b16 %v3718_v19  ;;  %v3949_v24 = vpack.c.b16 %v3945_v15, %v3944_v25  ;;  %v4287_v42 = vsel %vm6683_vm13, %v4282_v37, %v4286_v10  ;;  %v4425_v19 = vld [vmem:[#allocation3 + $0x38] sm:$0xe] }
 0x346   : > { %v4301_v44 = vsel %vm6683_vm13, %v4296_v13, %v4300_v63  ;;  %v7724_v6 = vpack.c.b16 %v4494_v61, %v4493_v39  ;;  %v3736_v2 = vrot.slane %v3734_v33, 4  ;;  %v3739_v18 = vrot.slane %v3737_v14, 5  ;;  %v4426_v39 = vld [vmem:[#allocation3 + $0x40] sm:$0xe]  ;;  %v4427_v61 = vld [vmem:[#allocation3 + $0x48] sm:$0xe] }
 0x347   : > { %v3768_v54 = vunpack.c.l.b16 %v3704_v32  ;;  %v3722_v36 = vrot.slane %v3720_v21, 4  ;;  %v3725_v40 = vrot.slane %v3723_v49, 5  ;;  %v4325_v0 = vunpack.c.l.b16 %v4287_v42 }
 0x348   : > { %4155 = vmatmul.bf16.gmra.mxu3 %v5873_v50  ;;  %v4326_v34 = vunpack.c.l.b16 %v4301_v44  ;;  %v3740_v1 = vor.u32 %v3739_v18, %v3736_v2  ;;  %v3743_v7 = vshll.u32 %v7686_v11, 16  ;;  %v5960_v17 = vrot.slane %v4422_v27, 9 }
 0x349   : > { %v3774_v57 = vpack.c.b16 %v3769_v9, %v3768_v54  ;;  %v3726_v55 = vor.u32 %v3725_v40, %v3722_v36  ;;  %v4454_v52 = vrot.slane %v7633_v30, 5  ;;  %v5877_v5 = vor.u32 %v6209_v53, %v5876_v3 }
 0x34a   : > { %4401 = vmatmul.bf16.gmra.mxu0 %v4329_v8  ;;  %v4330_v8 = vpack.c.b16 %v4326_v34, %v4325_v0  ;;  %v3729_v20 = vshll.u32 %v7682_v62, 16  ;;  %v3741_v35 = vrot.slane %v3740_v1, 4  ;;  %v3745_v45 = vrot.slane %v3743_v7, 5 }
 0x34b   : > { %v3727_v51 = vrot.slane %v3726_v55, 4  ;;  %v4455_v50 = vsel %vm6669_vm12, %v5960_v17, %v4454_v52  ;;  %v5961_v41 = vrot.slane %v4423_v47, 9  ;;  %v4458_v46 = vrot.slane %v7629_v29, 5 }
 0x34c   : > { %v3731_v28 = vrot.slane %v3729_v20, 5  ;;  %v3746_v11 = vsel %vm6683_vm13, %v3741_v35, %v3745_v45  ;;  %v4495_v31 = vunpack.c.l.b16 %v4455_v50  ;;  %v5962_v29 = vrot.slane %v4424_v23, 9 }
 0x34d   : > { %v4459_v30 = vsel %vm6669_vm12, %v5961_v41, %v4458_v46  ;;  %v3771_v60 = vunpack.c.l.b16 %v3746_v11  ;;  %v4462_v56 = vrot.slane %v7663_v12, 5  ;;  %v5963_v13 = vrot.slane %v4425_v19, 9 }
 0x34e   : > { %v4496_v62 = vunpack.c.l.b16 %v4459_v30  ;;  %v3732_v25 = vsel %vm6683_vm13, %v3727_v51, %v3731_v28  ;;  %v4466_v63 = vrot.slane %v7661_v26, 5  ;;  %v5964_v12 = vrot.slane %v4426_v39, 9 }
 0x34f   : > { %v3770_v58 = vunpack.c.l.b16 %v3732_v25  ;;  %v4463_v37 = vsel %vm6669_vm12, %v5962_v29, %v4462_v56  ;;  %v4470_v9 = vrot.slane %v7699_v43, 5  ;;  %v4474_v42 = vrot.slane %v7701_v16, 5 }
 0x350   : > { %v4502_v38 = vpack.c.b16 %v4496_v62, %v4495_v31  ;;  %v4467_v21 = vsel %vm6669_vm12, %v5963_v13, %v4466_v63  ;;  %v4497_v14 = vunpack.c.l.b16 %v4463_v37 }
 0x351   : > { %v3775_v15 = vpack.c.b16 %v3771_v60, %v3770_v58  ;;  %v4498_v4 = vunpack.c.l.b16 %v4467_v21  ;;  %v4471_v26 = vsel %vm6669_vm12, %v5964_v12, %v4470_v9 }
 0x352   : > { %4025 = vmatmul.bf16.gmra.mxu2 %v3949_v24  ;;  %v5965_v24 = vrot.slane %v4427_v61, 9  ;;  %v4499_v36 = vunpack.c.l.b16 %v4471_v26  ;;  %v4596_v26 = vld [vmem:[#allocation2 + $0x10] sm:$0xf] }
 0x353   : > { %v4503_v10 = vpack.c.b16 %v4498_v4, %v4497_v14 }
 0x354   : > { %3846 = vmatmul.bf16.gmra.mxu1 %v3774_v57  ;;  %v4475_v2 = vsel %vm6669_vm12, %v5965_v24, %v4474_v42  ;;  %v4594_v42 = vld [vmem:[#allocation2 + $0x8] sm:$0xf] }
 0x355   : > { %v4500_v40 = vunpack.c.l.b16 %v4475_v2 }
 0x357   : > { %v4504_v0 = vpack.c.b16 %v4500_v40, %v4499_v36  ;;  %v4614_v36 = vshll.u32 %v4594_v42, 16 }
 0x358   : > { %4160 = vmatmul.bf16.gmra.mxu3 %v5877_v5 }
 0x35a   : > { %4406 = vmatmul.bf16.gmra.mxu0 %v4330_v8 }
 0x364   : > { %3851 = vmatmul.bf16.gmra.mxu1 %v3775_v15 }
 0x365   : > { %v3291_v48 = vpop.f32.mrf.mxu2 }
 0x367   : > { %v3591_v27 = vpop.f32.mrf.mxu0 }
 0x36b   : > { %v3457_v33 = vpop.f32.mrf.mxu3 }
 0x36d   : > { %v7744_v49 = vpop.f32.mrf.mxu2 }
 0x36f   : > { %v3593_v8 = vpop.f32.mrf.mxu0 }
 0x371   : > { %v3190_v32 = vpop.f32.mrf.mxu1 }
 0x372   : > { %v3292_v44 = vadd.f32 %v3291_v48, %v3190_v32 }
 0x373   : > { %v3459_v54 = vpop.f32.mrf.mxu3 }
 0x374   : > { %v3477_v18 = vadd.f32 %v3457_v33, %v3292_v44  ;;  %4565 = vmatmul.bf16.vlgmr.msrb.gmra.mxu1 %v7724_v6 }
 0x375   : > { %v3296_v57 = vpop.f32.mrf.mxu2 }
 0x376   : > { %v3611_v6 = vadd.f32 %v3591_v27, %v3477_v18  ;;  %v4611_v18 = vshrl.u32 %v4594_v42, 16 }
 0x377   : > { %v3596_v35 = vpop.f32.mrf.mxu0 }
 0x379   : > { %v3192_v34 = vpop.f32.mrf.mxu1 }
 0x37a   : > { %v3294_v12 = vadd.f32 %v7744_v49, %v3192_v34 }
 0x37b   : > { %v3462_v43 = vpop.f32.mrf.mxu3 }
 0x37c   : > { %v3478_v44 = vadd.f32 %v3459_v54, %v3294_v12 }
 0x37d   : > { %v7753_v3 = vpop.f32.mrf.mxu2 }
 0x37e   : > { %v3612_v27 = vadd.f32 %v3593_v8, %v3478_v44 }
 0x37f   : > { %v7765_v41 = vpop.f32.mrf.mxu0 }
 0x381   : > { %v3195_v1 = vpop.f32.mrf.mxu1 }
 0x382   : > { %v3297_v16 = vadd.f32 %v3296_v57, %v3195_v1  ;;  %v4628_v57 = vshll.u32 %v4596_v26, 16 }
 0x383   : > { %v7755_v55 = vpop.f32.mrf.mxu3 }
 0x384   : > { %v3479_v53 = vadd.f32 %v3462_v43, %v3297_v16  ;;  %4570 = vmatmul.bf16.gmra.mxu1 %v4502_v38  ;;  %v4613_v16 = vrot.slane %v4611_v18, 4 }
 0x385   : > { %v3301_v7 = vpop.f32.mrf.mxu2 }
 0x386   : > { %v3613_v50 = vadd.f32 %v3596_v35, %v3479_v53  ;;  %v4616_v53 = vrot.slane %v4614_v36, 5 }
 0x387   : > { %v3601_v62 = vpop.f32.mrf.mxu0 }
 0x388   : > { %v4617_v54 = vor.u32 %v4616_v53, %v4613_v16 }
 0x389   : > { %v7757_v22 = vpop.f32.mrf.mxu1 }
 0x38b   : > { %v3467_v17 = vpop.f32.mrf.mxu3 }
 0x38d   : > { %v7759_v51 = vpop.f32.mrf.mxu2 }
 0x38f   : > { %v7769_v15 = vpop.f32.mrf.mxu0 }
 0x391   : > { %v3200_v52 = vpop.f32.mrf.mxu1 }
 0x392   : > { %v3302_v5 = vadd.f32 %v3301_v7, %v3200_v52  ;;  %v4630_v7 = vrot.slane %v4628_v57, 5  ;;  %v4595_v52 = vld [vmem:[#allocation2 + $0xc] sm:$0x1] }
 0x393   : > { %v7763_v45 = vpop.f32.mrf.mxu3 }
 0x394   : > { %v3481_v20 = vadd.f32 %v3467_v17, %v3302_v5  ;;  %4575 = vmatmul.bf16.gmra.mxu1 %v4503_v10 }
 0x395   : > { %v3306_v46 = vpop.f32.mrf.mxu2 }
 0x396   : > { %v3615_v60 = vadd.f32 %v3601_v62, %v3481_v20  ;;  %v4597_v20 = vld [vmem:[#allocation2 + $0x14] sm:$0x1] }
 0x397   : > { %v3606_v48 = vpop.f32.mrf.mxu0 }
 0x399   : > { %v7761_v47 = vpop.f32.mrf.mxu1 }
 0x39b   : > { %v3472_v30 = vpop.f32.mrf.mxu3 }
 0x39d   : > { %v7775_v13 = vpop.f32.mrf.mxu2 }
 0x39f   : > { %v7781_v14 = vpop.f32.mrf.mxu0 }
 0x3a1   : > { %v3205_v28 = vpop.f32.mrf.mxu1 }
 0x3a2   : > { %v3307_v11 = vadd.f32 %v3306_v46, %v3205_v28  ;;  %v4620_v46 = vshll.u32 %v4595_v52, 16  ;;  %v4599_v52 = vld [vmem:[#allocation2 + $0x1c] sm:$0x1] }
 0x3a3   : > { %v7779_v33 = vpop.f32.mrf.mxu3 }
 0x3a4   : > { %v3483_v31 = vadd.f32 %v3472_v30, %v3307_v11  ;;  %4580 = vmatmul.bf16.gmra.mxu1 %v4504_v0  ;;  %v4625_v0 = vshrl.u32 %v4596_v26, 16  ;;  %v3299_v11 = vadd.f32 %v7753_v3, %v7757_v22  ;;  %v4618_v30 = vrot.slane %v4617_v54, 4 }
 0x3a5   : > { %v4011_v4 = vpop.f32.mrf.mxu2 }
 0x3a6   : > { %v3617_v29 = vadd.f32 %v3606_v48, %v3483_v31  ;;  %v4627_v34 = vrot.slane %v4625_v0, 4  ;;  %v4634_v31 = vshll.u32 %v4597_v20, 16  ;;  %v4622_v48 = vrot.slane %v4620_v46, 5  ;;  %v4601_v20 = vld [vmem:[#allocation2 + $0x24] sm:$0x1] }
 0x3a7   : > { %v4392_v61 = vpop.f32.mrf.mxu0  ;;  %v4648_v46 = vshll.u32 %v4599_v52, 16 }
 0x3a8   : > { %v4631_v28 = vor.u32 %v4630_v7, %v4627_v34  ;;  %v4623_v3 = vsel %vm6683_vm13, %v4618_v30, %v4622_v48  ;;  %v4636_v22 = vrot.slane %v4634_v31, 5  ;;  %v4662_v31 = vshll.u32 %v4601_v20, 16 }
 0x3a9   : > { %v7767_v25 = vpop.f32.mrf.mxu1  ;;  %v4742_v18 = vunpack.c.l.bf16 %v4623_v3 }
 0x3ab   : > { %v4146_v39 = vpop.f32.mrf.mxu3 }
 0x3ad   : > { %v4013_v24 = vpop.f32.mrf.mxu2 }
 0x3af   : > { %v4394_v1 = vpop.f32.mrf.mxu0 }
 0x3b1   : > { %v3837_v38 = vpop.f32.mrf.mxu1 }
 0x3b2   : > { %v3857_v58 = vadd.f32 %v3837_v38, %v3611_v6  ;;  %v7795_v38 = vld [vmem:[%s7856_s6] ss:$0 sm:$0xff] }
 0x3b3   : > { %v4148_v2 = vpop.f32.mrf.mxu3 }
 0x3b4   : > { %v4031_v43 = vadd.f32 %v4011_v4, %v3857_v58  ;;  %v4598_v58 = vld [vmem:[#allocation2 + $0x18] sm:$0xf] }
 0x3b5   : > { %v4016_v49 = vpop.f32.mrf.mxu2 }
 0x3b6   : > { %v4166_v17 = vadd.f32 %v4146_v39, %v4031_v43  ;;  %v4639_v39 = vshrl.u32 %v4598_v58, 16 }
 0x3b8   : > { %v4412_v8 = vadd.f32 %v4392_v61, %v4166_v17  ;;  %v4642_v61 = vshll.u32 %v4598_v58, 16  ;;  %v4641_v57 = vrot.slane %v4639_v39, 4  ;;  %v4602_v58 = vld [vmem:[#allocation2 + $0x28] sm:$0xf] }
 0x3b9   : > { %v3839_v23 = vpop.f32.mrf.mxu1  ;;  %v4667_v39 = vshrl.u32 %v4602_v58, 16 }
 0x3ba   : > { %v3858_v6 = vadd.f32 %v3839_v23, %v3612_v27  ;;  %v4397_v23 = vpop.f32.mrf.mxu0  ;;  %v4644_v43 = vrot.slane %v4642_v61, 5 }
 0x3bb   : > { %v4151_v35 = vpop.f32.mrf.mxu3 }
 0x3bc   : > { %v4032_v5 = vadd.f32 %v4013_v24, %v3858_v6 }
 0x3bd   : > { %v4018_v4 = vpop.f32.mrf.mxu2 }
 0x3be   : > { %v4167_v62 = vadd.f32 %v4148_v2, %v4032_v5 }
 0x3c0   : > { %v4413_v12 = vadd.f32 %v4394_v1, %v4167_v62 }
 0x3c1   : > { %v3842_v56 = vpop.f32.mrf.mxu1 }
 0x3c2   : > { %v7771_v19 = vadd.f32 %v3842_v56, %v3613_v50  ;;  %v3480_v56 = vadd.f32 %v7755_v55, %v3299_v11 }
 0x3c3   : > { %v4153_v0 = vpop.f32.mrf.mxu3 }
 0x3c4   : > { %v4033_v55 = vadd.f32 %v4016_v49, %v7771_v19  ;;  %v3614_v2 = vadd.f32 %v7765_v41, %v3480_v56  ;;  %v4399_v19 = vpop.f32.mrf.mxu0  ;;  %v4645_v49 = vor.u32 %v4644_v43, %v4641_v57 }
 0x3c6   : > { %v4168_v7 = vadd.f32 %v4151_v35, %v4033_v55  ;;  %v3304_v35 = vadd.f32 %v7759_v51, %v7761_v47  ;;  %v4646_v30 = vrot.slane %v4645_v49, 4  ;;  %v4670_v51 = vshll.u32 %v4602_v58, 16 }
 0x3c9   : > { %v7773_v37 = vpop.f32.mrf.mxu1 }
 0x3ca   : > { %v3860_v27 = vadd.f32 %v7773_v37, %v3614_v2 }
 0x3cb   : > { %v4156_v48 = vpop.f32.mrf.mxu3 }
 0x3cc   : > { %v4034_v41 = vadd.f32 %v4018_v4, %v3860_v27  ;;  %v4604_v4 = vld [vmem:[#allocation2 + $0x30] sm:$0xf]  ;;  %v4402_v61 = vpop.f32.mrf.mxu0 }
 0x3ce   : > { %v4169_v62 = vadd.f32 %v4153_v0, %v4034_v41 }
 0x3d1   : > { %v3847_v63 = vpop.f32.mrf.mxu1 }
 0x3d2   : > { %v7777_v21 = vadd.f32 %v3847_v63, %v3615_v60  ;;  %v4600_v63 = vld [vmem:[#allocation2 + $0x20] sm:$0xf] }
 0x3d3   : > { %v4653_v44 = vshrl.u32 %v4600_v63, 16  ;;  %v4656_v26 = vshll.u32 %v4600_v63, 16  ;;  %v3482_v63 = vadd.f32 %v7763_v45, %v3304_v35 }
 0x3d5   : > { %v4655_v6 = vrot.slane %v4653_v44, 4  ;;  %v4658_v34 = vrot.slane %v4656_v26, 5  ;;  %v3616_v45 = vadd.f32 %v7769_v15, %v3482_v63 }
 0x3d9   : > { %v7783_v10 = vpop.f32.mrf.mxu1 }
 0x3da   : > { %v3862_v0 = vadd.f32 %v7783_v10, %v3616_v45  ;;  %v3309_v10 = vadd.f32 %v7775_v13, %v7767_v25 }
 0x3e1   : > { %v3852_v32 = vpop.f32.mrf.mxu1 }
 0x3e2   : > { %v7786_v9 = vadd.f32 %v3852_v32, %v3617_v29  ;;  %v4632_v29 = vrot.slane %v4631_v28, 4  ;;  %v4659_v28 = vor.u32 %v4658_v34, %v4655_v6  ;;  %v4603_v34 = vld [vmem:[#allocation2 + $0x2c] sm:$0x1] }
 0x3e3   : > { %v4676_v41 = vshll.u32 %v4603_v34, 16 }
 0x3e4   : > { %v4637_v42 = vsel %vm6683_vm13, %v4632_v29, %v4636_v22  ;;  %v4650_v29 = vrot.slane %v4648_v46, 5  ;;  %v4660_v56 = vrot.slane %v4659_v28, 4  ;;  %v4664_v22 = vrot.slane %v4662_v31, 5 }
 0x3e5   : > { %v4743_v53 = vunpack.c.l.bf16 %v4637_v42  ;;  %v4684_v42 = vshll.u32 %v4604_v4, 16 }
 0x3e6   : > { %v4651_v3 = vsel %vm6683_vm13, %v4646_v30, %v4650_v29  ;;  %v4678_v30 = vrot.slane %v4676_v41, 5 }
 0x3e7   : > { %v4744_v26 = vunpack.c.l.bf16 %v4651_v3 }
 0x3e9   : > { %v7788_v40 = vpop.f32.mrf.mxu1 }
 0x3f1   : > { %v4566_v50 = vpop.f32.mrf.mxu1 }
 0x3f2   : > { %v4586_v60 = vadd.f32 %v4566_v50, %v4412_v8  ;;  %v4021_v50 = vpop.f32.mrf.mxu2  ;;  %v4414_v8 = vadd.f32 %v4397_v23, %v4168_v7  ;;  %v4415_v23 = vadd.f32 %v4399_v19, %v4169_v62  ;;  %v4158_v7 = vpop.f32.mrf.mxu3  ;;  %v4605_v19 = vld [vmem:[#allocation2 + $0x34] sm:$0x1]  ;;  %v3484_v62 = vadd.f32 %v7779_v33, %v3309_v10 }
 0x3f3   : > { %v4035_v44 = vadd.f32 %v4021_v50, %v7777_v21  ;;  %v4404_v50 = vpop.f32.mrf.mxu0  ;;  %v4690_v46 = vshll.u32 %v4605_v19, 16 }
 0x3f4   : > { %v4734_v32 = vadd.f32 %v7795_v38, %v4586_v60  ;;  %v3618_v33 = vadd.f32 %v7781_v14, %v3484_v62 }
 0x3f6   : > { %v4750_v16 = vadd.f32 %v4742_v18, %v4734_v32  ;;  %v4669_v18 = vrot.slane %v4667_v39, 4 }
 0x3f8   : > { %v4758_v54 = vmax.f32 %v4750_v16, 0.0 }
 0x3f9   : > { %v4568_v24 = vpop.f32.mrf.mxu1 }
 0x3fa   : > { %v4587_v36 = vadd.f32 %v4568_v24, %v4413_v12  ;;  %v4665_v12 = vsel %vm6683_vm13, %v4660_v56, %v4664_v22  ;;  %v4681_v24 = vshrl.u32 %v4604_v4, 16  ;;  %v4023_v2 = vpop.f32.mrf.mxu2  ;;  %v4161_v63 = vpop.f32.mrf.mxu3 }
 0x3fb   : > { %v4745_v27 = vunpack.c.l.bf16 %v4665_v12  ;;  %v4036_v15 = vadd.f32 %v4023_v2, %v3862_v0  ;;  %v3864_v12 = vadd.f32 %v7788_v40, %v3618_v33  ;;  %v4407_v45 = vpop.f32.mrf.mxu0 }
 0x3fc   : > { %v4735_v1 = vadd.f32 %v7795_v38, %v4587_v36  ;;  %v4672_v36 = vrot.slane %v4670_v51, 5  ;;  %v4683_v16 = vrot.slane %v4681_v24, 4 }
 0x3fd   : > { %v4171_v28 = vadd.f32 %v4158_v7, %v4036_v15 }
 0x3fe   : > { %v4751_v17 = vadd.f32 %v4743_v53, %v4735_v1  ;;  %v4686_v1 = vrot.slane %v4684_v42, 5  ;;  %v4170_v53 = vadd.f32 %v4156_v48, %v4035_v44  ;;  %v4673_v21 = vor.u32 %v4672_v36, %v4669_v18  ;;  %v4607_v36 = vld [vmem:[#allocation2 + $0x3c] sm:$0x1] }
 0x3ff   : > { %v4692_v48 = vrot.slane %v4690_v46, 5  ;;  %v4417_v56 = vadd.f32 %v4404_v50, %v4171_v28 }
 0x400   : > { %v4759_v5 = vmax.f32 %v4751_v17, 0.0  ;;  %v4416_v20 = vadd.f32 %v4402_v61, %v4170_v53 }
 0x401   : > { %v4571_v37 = vpop.f32.mrf.mxu1 }
 0x402   : > { %v6237_v11 = vpack.c.bf16 %v4759_v5, %v4758_v54  ;;  %v4588_v60 = vadd.f32 %v4571_v37, %v4414_v8  ;;  %v4687_v54 = vor.u32 %v4686_v1, %v4683_v16  ;;  %v4674_v37 = vrot.slane %v4673_v21, 4  ;;  %v4026_v8 = vpop.f32.mrf.mxu2  ;;  %v4163_v34 = vpop.f32.mrf.mxu3 }
 0x403   : > { %v4037_v51 = vadd.f32 %v4026_v8, %v7786_v9  ;;  %v4704_v1 = vshll.u32 %v4607_v36, 16 }
 0x404   : > { %6238 = vst [vmem:[%s7811_s23] sm:$0xff] %v6237_v11   ;;  %v4736_v47 = vadd.f32 %v7795_v38, %v4588_v60  ;;  %v4606_v11 = vld [vmem:[#allocation2 + $0x38] sm:$0xf]  ;;  %v4688_v31 = vrot.slane %v4687_v54, 4  ;;  %v4608_v60 = vld [vmem:[#allocation2 + $0x40] sm:$0xf]  ;;  %v4679_v58 = vsel %vm6683_vm13, %v4674_v37, %v4678_v30 }
 0x405   : > { %v4695_v25 = vshrl.u32 %v4606_v11, 16  ;;  %v4698_v13 = vshll.u32 %v4606_v11, 16  ;;  %v4709_v22 = vshrl.u32 %v4608_v60, 16  ;;  %v4712_v39 = vshll.u32 %v4608_v60, 16 }
 0x406   : > { %v4752_v57 = vadd.f32 %v4744_v26, %v4736_v47  ;;  %v4693_v3 = vsel %vm6683_vm13, %v4688_v31, %v4692_v48  ;;  %v4746_v47 = vunpack.c.l.bf16 %v4679_v58  ;;  %v4172_v2 = vadd.f32 %v4161_v63, %v4037_v51 }
 0x407   : > { %v4697_v61 = vrot.slane %v4695_v25, 4  ;;  %v4747_v44 = vunpack.c.l.bf16 %v4693_v3  ;;  %v4711_v26 = vrot.slane %v4709_v22, 4 }
 0x408   : > { %v4760_v17 = vmax.f32 %v4752_v57, 0.0 }
 0x409   : > { %v4573_v32 = vpop.f32.mrf.mxu1 }
 0x40a   : > { %v4589_v55 = vadd.f32 %v4573_v32, %v4415_v23  ;;  %v4700_v32 = vrot.slane %v4698_v13, 5  ;;  %v4028_v9 = vpop.f32.mrf.mxu2 }
 0x40b   : > { %v4038_v14 = vadd.f32 %v4028_v9, %v3864_v12 }
 0x40c   : > { %v4737_v43 = vadd.f32 %v7795_v38, %v4589_v55  ;;  %v4714_v55 = vrot.slane %v4712_v39, 5  ;;  %v4701_v0 = vor.u32 %v4700_v32, %v4697_v61 }
 0x40d   : > { %v4173_v15 = vadd.f32 %v4163_v34, %v4038_v14 }
 0x40e   : > { %v4753_v6 = vadd.f32 %v4745_v27, %v4737_v43  ;;  %v4609_v27 = vld [vmem:[#allocation2 + $0x44] sm:$0x1]  ;;  %v4715_v40 = vor.u32 %v4714_v55, %v4711_v26  ;;  %v4702_v7 = vrot.slane %v4701_v0, 4 }
 0x40f   : > { %v4718_v21 = vshll.u32 %v4609_v27, 16 }
 0x410   : > { %v4761_v52 = vmax.f32 %v4753_v6, 0.0  ;;  %v4418_v6 = vadd.f32 %v4407_v45, %v4172_v2  ;;  %v4716_v19 = vrot.slane %v4715_v40, 4 }
 0x411   : > { %v4576_v49 = vpop.f32.mrf.mxu1  ;;  %v4720_v54 = vrot.slane %v4718_v21, 5 }
 0x412   : > { %v6242_v5 = vpack.c.bf16 %v4761_v52, %v4760_v17  ;;  %v4590_v35 = vadd.f32 %v4576_v49, %v4416_v20  ;;  %v4706_v52 = vrot.slane %v4704_v1, 5  ;;  %v4409_v49 = vpop.f32.mrf.mxu0 }
 0x413   : > { %v4721_v50 = vsel %vm6683_vm13, %v4716_v19, %v4720_v54 }
 0x414   : > { %6254 = vst [vmem:[%s7811_s23 + $0x8] sm:$0xff] %v6242_v5   ;;  %v4738_v29 = vadd.f32 %v7795_v38, %v4590_v35  ;;  %v4707_v41 = vsel %vm6683_vm13, %v4702_v7, %v4706_v52  ;;  %v4419_v5 = vadd.f32 %v4409_v49, %v4173_v15  ;;  %v4749_v11 = vunpack.c.l.bf16 %v4721_v50 }
 0x415   : > { %v4748_v37 = vunpack.c.l.bf16 %v4707_v41 }
 0x416   : > { %v4754_v24 = vadd.f32 %v4746_v47, %v4738_v29 }
 0x418   : > { %v4762_v57 = vmax.f32 %v4754_v24, 0.0 }
 0x419   : > { %v4578_v4 = vpop.f32.mrf.mxu1 }
 0x41a   : > { %v4591_v23 = vadd.f32 %v4578_v4, %v4417_v56 }
 0x41c   : > { %v4739_v42 = vadd.f32 %v7795_v38, %v4591_v23 }
 0x41e   : > { %v4755_v18 = vadd.f32 %v4747_v44, %v4739_v42 }
 0x420   : > { %v4763_v43 = vmax.f32 %v4755_v18, 0.0 }
 0x421   : > { %v4581_v16 = vpop.f32.mrf.mxu1 }
 0x422   : > { %v6247_v53 = vpack.c.bf16 %v4763_v43, %v4762_v57  ;;  %v4592_v17 = vadd.f32 %v4581_v16, %v4418_v6 }
 0x424   : > { %6255 = vst [vmem:[%s7811_s23 + $0x10] sm:$0xff] %v6247_v53   ;;  %v4740_v10 = vadd.f32 %v7795_v38, %v4592_v17 }
 0x426   : > { %v4756_v28 = vadd.f32 %v4748_v37, %v4740_v10 }
 0x428   : > { %v4764_v30 = vmax.f32 %v4756_v28, 0.0 }
 0x429   : > { %v4583_v20 = vpop.f32.mrf.mxu1 }
 0x42a   : > { %v4593_v46 = vadd.f32 %v4583_v20, %v4419_v5 }
 0x42c   : > { %v4741_v35 = vadd.f32 %v7795_v38, %v4593_v46 }
 0x42e   : > { %v4757_v8 = vadd.f32 %v4749_v11, %v4741_v35 }
 0x430   : > { %v4765_v31 = vmax.f32 %v4757_v8, 0.0 }
 0x432   : > { %v6252_v62 = vpack.c.bf16 %v4765_v31, %v4764_v30 }
 0x434   : > { %6256 = vst [vmem:[%s7811_s23 + $0x18] sm:$0xff] %v6252_v62  }
 0x435 PF: > { %s17_s24 = sadd.s32 1, %s6292_s24  }
 0x436   : > { %p14_p4 = scmp.ge.s32.totalorder %s17_s24, 4  }
 0x438   :  { %16 = sbr.rel (!%p14_p4) target bundleno = 1 (0x1), region = 100 }

</bundles_post_ra>
